<compile_context>
chip_gen: v7x
topology: tpu7x:2x2x1
jax: 0.10.0
libtpu: 0.0.40
codegen_flags: <defaults>
</compile_context>

<pallas_src>
import functools

import jax
import jax.numpy as jnp
from jax.experimental import pallas as pl
from jax.experimental.pallas import tpu as pltpu


def _round_up(n, m):
    return ((n + m - 1) // m) * m


# ---------------------------------------------------------------------------
# Kernel
# ---------------------------------------------------------------------------
def cvae_kernel(x_ref, eps_ref, oh_ref, win_ref, wout_ref, b_ref,
                xrec_ref, mulv_ref, *, layout):
    f32 = jnp.float32
    bf16 = jnp.bfloat16
    L = layout
    D, H, Z = L["input_dim"], L["hidden_dim"], L["latent_dim"]
    NC, MU = L["nc_pad"], L["mu_pad"]

    x = x_ref[...]        # bf16 [TB, D]
    oh = oh_ref[...]      # bf16 [TB, NC] one-hot (padded cols are zero)

    # ---- encoder -----------------------------------------------------------
    # encoder_fc1(x ++ onehot) == x @ W1_img + onehot @ W1_cls + b1
    h = (jnp.dot(x, win_ref[L["r_w1"]:L["r_w1"] + D, :],
                 preferred_element_type=f32)
         + jnp.dot(oh, win_ref[L["r_w1c"]:L["r_w1c"] + NC, :],
                   preferred_element_type=f32)
         + b_ref[:, L["o_b1"]:L["o_b1"] + H])
    h = jnp.maximum(h, 0.0)

    h = (jnp.dot(h.astype(bf16), win_ref[L["r_w2"]:L["r_w2"] + H, :],
                 preferred_element_type=f32)
         + b_ref[:, L["o_b2"]:L["o_b2"] + H])
    h = jnp.maximum(h, 0.0)

    # fused (mu | logvar | zero-pad) head -> lane-dense [TB, MU]
    mulv = (jnp.dot(h.astype(bf16), wout_ref[:, 0:MU],
                    preferred_element_type=f32)
            + b_ref[:, L["o_bmulv"]:L["o_bmulv"] + MU])
    mu = mulv[:, :Z]
    logvar = mulv[:, Z:2 * Z]

    # ---- reparameterize ----------------------------------------------------
    z = mu + eps_ref[...] * jnp.exp(0.5 * logvar)

    # ---- decoder -----------------------------------------------------------
    # decoder_fc1(z ++ onehot) == z @ Wd1_lat + onehot @ Wd1_cls + bd1
    hd = (jnp.dot(z.astype(bf16), win_ref[L["r_wd1"]:L["r_wd1"] + Z, :],
                  preferred_element_type=f32)
          + jnp.dot(oh, win_ref[L["r_wd1c"]:L["r_wd1c"] + NC, :],
                    preferred_element_type=f32)
          + b_ref[:, L["o_bd1"]:L["o_bd1"] + H])
    hd = jnp.maximum(hd, 0.0)

    hd = (jnp.dot(hd.astype(bf16), win_ref[L["r_wd2"]:L["r_wd2"] + H, :],
                  preferred_element_type=f32)
          + b_ref[:, L["o_bd2"]:L["o_bd2"] + H])
    hd = jnp.maximum(hd, 0.0)

    logits = (jnp.dot(hd.astype(bf16), wout_ref[:, MU:MU + D],
                      preferred_element_type=f32)
              + b_ref[:, L["o_bout"]:L["o_bout"] + D])

    xrec_ref[...] = jax.nn.sigmoid(logits)
    mulv_ref[...] = mulv


# ---------------------------------------------------------------------------
# Parameter init / packing
# ---------------------------------------------------------------------------
def init_params(key, input_dim=784, hidden_dim=400, latent_dim=20, num_classes=10):
    """Logical f32 parameters, [in_features, out_features] layout (PyTorch-like)."""
    def linear(k, fi, fo):
        kw, kb = jax.random.split(k)
        bound = 1.0 / jnp.sqrt(fi)
        w = jax.random.uniform(kw, (fi, fo), jnp.float32, -bound, bound)
        b = jax.random.uniform(kb, (fo,), jnp.float32, -bound, bound)
        return w, b

    ks = jax.random.split(key, 7)
    p = {}
    p["enc1_w"], p["enc1_b"] = linear(ks[0], input_dim + num_classes, hidden_dim)
    p["enc2_w"], p["enc2_b"] = linear(ks[1], hidden_dim, hidden_dim)
    p["mu_w"], p["mu_b"] = linear(ks[2], hidden_dim, latent_dim)
    p["lv_w"], p["lv_b"] = linear(ks[3], hidden_dim, latent_dim)
    p["dec1_w"], p["dec1_b"] = linear(ks[4], latent_dim + num_classes, hidden_dim)
    p["dec2_w"], p["dec2_b"] = linear(ks[5], hidden_dim, hidden_dim)
    p["out_w"], p["out_b"] = linear(ks[6], hidden_dim, input_dim)
    return p


def pack_params(p, input_dim=784, hidden_dim=400, latent_dim=20, num_classes=10):
    """Packs all weights into 2 bf16 buffers + 1 f32 bias buffer for the kernel."""
    bf16 = jnp.bfloat16
    H = hidden_dim
    nc_pad = _round_up(num_classes, 16)     # one-hot width, bf16 sublane friendly
    lat_pad = _round_up(latent_dim, 16)     # keeps packed row offsets 16-aligned
    mu_pad = 128                            # lane-dense mu|logvar head
    h_lane = _round_up(H, 128)              # 128-aligned bias segments

    def pad_rows(w, rows):
        return jnp.pad(w, ((0, rows - w.shape[0]), (0, 0)))

    # --- W_in: all the 400-column weights stacked along the K axis -----------
    w1 = p["enc1_w"][:input_dim]                       # [D, H]
    w1c = pad_rows(p["enc1_w"][input_dim:], nc_pad)    # [nc_pad, H]
    w2 = p["enc2_w"]                                   # [H, H]
    wd1 = pad_rows(p["dec1_w"][:latent_dim], lat_pad)  # [lat_pad, H]
    wd1c = pad_rows(p["dec1_w"][latent_dim:], nc_pad)  # [nc_pad, H]
    wd2 = p["dec2_w"]                                  # [H, H]
    w_in = jnp.concatenate([w1, w1c, w2, wd1, wd1c, wd2], axis=0).astype(bf16)

    # --- W_out: padded (mu|logvar) head | output projection ------------------
    wmulv = jnp.concatenate([p["mu_w"], p["lv_w"]], axis=1)          # [H, 2Z]
    wmulv = jnp.pad(wmulv, ((0, 0), (0, mu_pad - 2 * latent_dim)))   # [H, mu_pad]
    w_out = jnp.concatenate([wmulv, p["out_w"]], axis=1).astype(bf16)  # [H, mu_pad+D]

    # --- biases: one f32 row with 128-aligned segments -----------------------
    def seg(b, width):
        b = b.reshape(1, -1)
        return jnp.pad(b, ((0, 0), (0, width - b.shape[-1])))

    bmulv = jnp.concatenate([p["mu_b"], p["lv_b"]])
    biases = jnp.concatenate(
        [seg(p["enc1_b"], h_lane), seg(p["enc2_b"], h_lane),
         seg(p["dec1_b"], h_lane), seg(p["dec2_b"], h_lane),
         seg(bmulv, mu_pad), p["out_b"].reshape(1, -1)],
        axis=1).astype(jnp.float32)

    layout = dict(
        input_dim=input_dim, hidden_dim=H, latent_dim=latent_dim,
        num_classes=num_classes, nc_pad=nc_pad, mu_pad=mu_pad,
        r_w1=0,
        r_w1c=input_dim,
        r_w2=input_dim + nc_pad,
        r_wd1=input_dim + nc_pad + H,
        r_wd1c=input_dim + nc_pad + H + lat_pad,
        r_wd2=input_dim + nc_pad + H + lat_pad + nc_pad,
        o_b1=0, o_b2=h_lane, o_bd1=2 * h_lane, o_bd2=3 * h_lane,
        o_bmulv=4 * h_lane, o_bout=4 * h_lane + mu_pad,
    )
    packed = {"w_in": w_in, "w_out": w_out, "biases": biases}
    return packed, layout


# ---------------------------------------------------------------------------
# Wrapper
# ---------------------------------------------------------------------------
def _mxu_row_cap():
    try:
        kind = jax.devices()[0].device_kind.lower()
    except Exception:
        return 256
    return 128 if "v5" in kind else 256     # v5*: 128-tall MXU; v6e/v7x: 256


def _pick_tile(b_rounded16):
    if b_rounded16 <= 16:
        return b_rounded16
    # at least 2 grid steps so the (parallel) batch axis shards across both
    # v7x TensorCores; cap so the tile fills the MXU rows without waste.
    half = _round_up((b_rounded16 + 1) // 2, 16)
    return min(_mxu_row_cap(), half)


def gen_model_forward(x, labels, packed, eps, *, layout):
    """x: [B,1,28,28] f32, labels: [B] int32, eps: [B, latent] f32.

    Returns (x_recon [B, 784], mu [B, latent], logvar [B, latent]), matching
    GenModel.forward (eps replaces torch.randn_like in reparameterize).
    """
    B = x.shape[0]
    D = layout["input_dim"]
    Z = layout["latent_dim"]
    NC_PAD = layout["nc_pad"]
    MU_PAD = layout["mu_pad"]

    B16 = _round_up(B, 16)
    TB = _pick_tile(B16)
    B_pad = _round_up(B16, TB)
    pad = B_pad - B

    # glue: flatten NCHW, cast to bf16 (halves x HBM traffic), build one-hot
    x_flat = x.reshape(B, -1).astype(jnp.bfloat16)
    onehot = jax.nn.one_hot(labels, NC_PAD, dtype=jnp.bfloat16)   # padded cols 0
    eps_p = eps
    if pad:
        x_flat = jnp.pad(x_flat, ((0, pad), (0, 0)))
        onehot = jnp.pad(onehot, ((0, pad), (0, 0)))
        eps_p = jnp.pad(eps_p, ((0, pad), (0, 0)))

    row_spec = lambda cols: pl.BlockSpec((TB, cols), lambda i: (i, 0))
    const_spec = lambda a: pl.BlockSpec(a.shape, lambda i: (0, 0))

    vmem_limit = (32 if TB >= 128 else 16) * 1024 * 1024

    xrec, mulv = pl.pallas_call(
        functools.partial(cvae_kernel, layout=layout),
        grid=(B_pad // TB,),
        in_specs=[
            row_spec(D), row_spec(Z), row_spec(NC_PAD),
            const_spec(packed["w_in"]),
            const_spec(packed["w_out"]),
            const_spec(packed["biases"]),
        ],
        out_specs=(row_spec(D), row_spec(MU_PAD)),
        out_shape=(
            jax.ShapeDtypeStruct((B_pad, D), jnp.float32),
            jax.ShapeDtypeStruct((B_pad, MU_PAD), jnp.float32),
        ),
        compiler_params=pltpu.CompilerParams(
            dimension_semantics=("parallel",),
            vmem_limit_bytes=vmem_limit,
        ),
    )(x_flat, eps_p, onehot, packed["w_in"], packed["w_out"], packed["biases"])

    x_recon = xrec[:B]
    mu = mulv[:B, :Z]
    logvar = mulv[:B, Z:2 * Z]
    return x_recon, mu, logvar


# ---------------------------------------------------------------------------
# Pure-JAX f32 reference (mirrors the PyTorch module)
# ---------------------------------------------------------------------------
def reference_forward(x, labels, p, eps, num_classes=10):
    xf = x.reshape(x.shape[0], -1)
    oh = jax.nn.one_hot(labels, num_classes, dtype=jnp.float32)
    xc = jnp.concatenate([xf, oh], axis=1)
    h = jax.nn.relu(xc @ p["enc1_w"] + p["enc1_b"])
    h = jax.nn.relu(h @ p["enc2_w"] + p["enc2_b"])
    mu = h @ p["mu_w"] + p["mu_b"]
    logvar = h @ p["lv_w"] + p["lv_b"]
    z = mu + eps * jnp.exp(0.5 * logvar)
    zc = jnp.concatenate([z, oh], axis=1)
    hd = jax.nn.relu(zc @ p["dec1_w"] + p["dec1_b"])
    hd = jax.nn.relu(hd @ p["dec2_w"] + p["dec2_b"])
    xr = jax.nn.sigmoid(hd @ p["out_w"] + p["out_b"])
    return xr, mu, logvar


if __name__ == "__main__":
    input_dim, hidden_dim, latent_dim, num_classes = 784, 400, 20, 10
    batch = 4

    key = jax.random.PRNGKey(0)
    k_params, k_x, k_labels, k_eps = jax.random.split(key, 4)

    params = init_params(k_params, input_dim, hidden_dim, latent_dim, num_classes)
    packed, layout = pack_params(params, input_dim, hidden_dim, latent_dim, num_classes)

    x = jax.random.uniform(k_x, (batch, 1, 28, 28), jnp.float32)       # NCHW, like PyTorch
    labels = jax.random.randint(k_labels, (batch,), 0, num_classes, jnp.int32)
    eps = jax.random.normal(k_eps, (batch, latent_dim), jnp.float32)   # reparameterization noise

    fwd = jax.jit(functools.partial(gen_model_forward, layout=layout))
    x_recon, mu, logvar = fwd(x, labels, packed, eps)
    jax.block_until_ready((x_recon, mu, logvar))

    # shape / sanity checks
    assert x_recon.shape == (batch, input_dim)
    assert mu.shape == (batch, latent_dim)
    assert logvar.shape == (batch, latent_dim)
    assert bool(jnp.all((x_recon >= 0.0) & (x_recon <= 1.0)))
    assert bool(jnp.all(jnp.isfinite(mu))) and bool(jnp.all(jnp.isfinite(logvar)))

    # numeric check vs f32 reference (bf16 weights -> loose tolerance)
    xr_ref, mu_ref, lv_ref = reference_forward(x, labels, params, eps, num_classes)
    assert bool(jnp.allclose(x_recon, xr_ref, atol=5e-2, rtol=5e-2))
    assert bool(jnp.allclose(mu, mu_ref, atol=1e-1, rtol=5e-2))
    assert bool(jnp.allclose(logvar, lv_ref, atol=1e-1, rtol=5e-2))

    print("KERNEL_OK")
</pallas_src>

<mosaic_0001>
module attributes {stable_mosaic.version = 11 : i64} {
  func.func @cvae_kernel(%arg0: i32, %arg1: memref<16x784xbf16, #tpu.memory_space<vmem>>, %arg2: memref<16x20xf32, #tpu.memory_space<vmem>>, %arg3: memref<16x16xbf16, #tpu.memory_space<vmem>>, %arg4: memref<1648x400xbf16, #tpu.memory_space<vmem>>, %arg5: memref<400x912xbf16, #tpu.memory_space<vmem>>, %arg6: memref<1x2960xf32, #tpu.memory_space<vmem>>, %arg7: memref<16x784xf32, #tpu.memory_space<vmem>>, %arg8: memref<16x128xf32, #tpu.memory_space<vmem>>) attributes {dimension_semantics = [#tpu.dimension_semantics<parallel>], iteration_bounds = array<i64: 1>, scalar_prefetch = 0 : i64, scratch_operands = 0 : i64, tpu.core_type = #tpu.core_type<tc>, window_params = [{transform_indices = @transform_0, window_bounds = array<i64: 16, 784>}, {transform_indices = @transform_1, window_bounds = array<i64: 16, 20>}, {transform_indices = @transform_2, window_bounds = array<i64: 16, 16>}, {pipeline_mode = #tpu.pipeline_mode<synchronous>, transform_indices = @transform_3, window_bounds = array<i64: 1648, 400>}, {pipeline_mode = #tpu.pipeline_mode<synchronous>, transform_indices = @transform_4, window_bounds = array<i64: 400, 912>}, {pipeline_mode = #tpu.pipeline_mode<synchronous>, transform_indices = @transform_5, window_bounds = array<i64: 1, 2960>}, {transform_indices = @transform_6, window_bounds = array<i64: 16, 784>}, {transform_indices = @transform_7, window_bounds = array<i64: 16, 128>}]} {
    %c0 = arith.constant 0 : index
    %c0_0 = arith.constant 0 : index
    %0 = vector.load %arg1[%c0, %c0_0] : memref<16x784xbf16, #tpu.memory_space<vmem>>, vector<16x784xbf16>
    %c0_1 = arith.constant 0 : index
    %c0_2 = arith.constant 0 : index
    %1 = vector.load %arg3[%c0_1, %c0_2] : memref<16x16xbf16, #tpu.memory_space<vmem>>, vector<16x16xbf16>
    %c0_3 = arith.constant 0 : index
    %c0_4 = arith.constant 0 : index
    %2 = vector.load %arg4[%c0_3, %c0_4] : memref<1648x400xbf16, #tpu.memory_space<vmem>>, vector<784x400xbf16>
    %cst = arith.constant dense<0.000000e+00> : vector<16x400xf32>
    %3 = tpu.matmul %0, %2, %cst {dimension_numbers = #tpu.dot_dimension_numbers<[1], [0], [0], [1], [0, 0, 1, 1], [], []>} : vector<16x784xbf16>, vector<784x400xbf16>, vector<16x400xf32> -> vector<16x400xf32>
    %c784 = arith.constant 784 : index
    %c0_5 = arith.constant 0 : index
    %4 = vector.load %arg4[%c784, %c0_5] : memref<1648x400xbf16, #tpu.memory_space<vmem>>, vector<16x400xbf16>
    %cst_6 = arith.constant dense<0.000000e+00> : vector<16x400xf32>
    %5 = tpu.matmul %1, %4, %cst_6 {dimension_numbers = #tpu.dot_dimension_numbers<[1], [0], [0], [1], [0, 0, 1, 1], [], []>} : vector<16x16xbf16>, vector<16x400xbf16>, vector<16x400xf32> -> vector<16x400xf32>
    %6 = arith.addf %3, %5 : vector<16x400xf32>
    %c0_7 = arith.constant 0 : index
    %c0_8 = arith.constant 0 : index
    %7 = vector.load %arg6[%c0_7, %c0_8] : memref<1x2960xf32, #tpu.memory_space<vmem>>, vector<1x400xf32>
    %8 = vector.broadcast %7 : vector<1x400xf32> to vector<16x400xf32>
    %9 = arith.addf %6, %8 : vector<16x400xf32>
    %cst_9 = arith.constant 0.000000e+00 : f32
    %10 = vector.broadcast %cst_9 : f32 to vector<16x400xf32>
    %11 = arith.maximumf %9, %10 : vector<16x400xf32>
    %12 = arith.truncf %11 : vector<16x400xf32> to vector<16x400xbf16>
    %c800 = arith.constant 800 : index
    %c0_10 = arith.constant 0 : index
    %13 = vector.load %arg4[%c800, %c0_10] : memref<1648x400xbf16, #tpu.memory_space<vmem>>, vector<400x400xbf16>
    %cst_11 = arith.constant dense<0.000000e+00> : vector<16x400xf32>
    %14 = tpu.matmul %12, %13, %cst_11 {dimension_numbers = #tpu.dot_dimension_numbers<[1], [0], [0], [1], [0, 0, 1, 1], [], []>} : vector<16x400xbf16>, vector<400x400xbf16>, vector<16x400xf32> -> vector<16x400xf32>
    %c0_12 = arith.constant 0 : index
    %c512 = arith.constant 512 : index
    %15 = vector.load %arg6[%c0_12, %c512] : memref<1x2960xf32, #tpu.memory_space<vmem>>, vector<1x400xf32>
    %16 = vector.broadcast %15 : vector<1x400xf32> to vector<16x400xf32>
    %17 = arith.addf %14, %16 : vector<16x400xf32>
    %cst_13 = arith.constant 0.000000e+00 : f32
    %18 = vector.broadcast %cst_13 : f32 to vector<16x400xf32>
    %19 = arith.maximumf %17, %18 : vector<16x400xf32>
    %20 = arith.truncf %19 : vector<16x400xf32> to vector<16x400xbf16>
    %c0_14 = arith.constant 0 : index
    %c0_15 = arith.constant 0 : index
    %21 = vector.load %arg5[%c0_14, %c0_15] : memref<400x912xbf16, #tpu.memory_space<vmem>>, vector<400x128xbf16>
    %cst_16 = arith.constant dense<0.000000e+00> : vector<16x128xf32>
    %22 = tpu.matmul %20, %21, %cst_16 {dimension_numbers = #tpu.dot_dimension_numbers<[1], [0], [0], [1], [0, 0, 1, 1], [], []>} : vector<16x400xbf16>, vector<400x128xbf16>, vector<16x128xf32> -> vector<16x128xf32>
    %c0_17 = arith.constant 0 : index
    %c2048 = arith.constant 2048 : index
    %23 = vector.load %arg6[%c0_17, %c2048] : memref<1x2960xf32, #tpu.memory_space<vmem>>, vector<1x128xf32>
    %24 = vector.broadcast %23 : vector<1x128xf32> to vector<16x128xf32>
    %25 = arith.addf %22, %24 : vector<16x128xf32>
    %26 = vector.extract_strided_slice %25 {offsets = [0, 0], sizes = [16, 20], strides = [1, 1]} : vector<16x128xf32> to vector<16x20xf32>
    %27 = vector.extract_strided_slice %25 {offsets = [0, 20], sizes = [16, 20], strides = [1, 1]} : vector<16x128xf32> to vector<16x20xf32>
    %c0_18 = arith.constant 0 : index
    %c0_19 = arith.constant 0 : index
    %28 = vector.load %arg2[%c0_18, %c0_19] : memref<16x20xf32, #tpu.memory_space<vmem>>, vector<16x20xf32>
    %cst_20 = arith.constant 5.000000e-01 : f32
    %29 = vector.broadcast %cst_20 : f32 to vector<16x20xf32>
    %30 = arith.mulf %29, %27 : vector<16x20xf32>
    %31 = math.exp %30 : vector<16x20xf32>
    %32 = arith.mulf %28, %31 : vector<16x20xf32>
    %33 = arith.addf %26, %32 : vector<16x20xf32>
    %34 = arith.truncf %33 : vector<16x20xf32> to vector<16x20xbf16>
    %c1200 = arith.constant 1200 : index
    %c0_21 = arith.constant 0 : index
    %35 = vector.load %arg4[%c1200, %c0_21] : memref<1648x400xbf16, #tpu.memory_space<vmem>>, vector<20x400xbf16>
    %cst_22 = arith.constant dense<0.000000e+00> : vector<16x400xf32>
    %36 = tpu.matmul %34, %35, %cst_22 {dimension_numbers = #tpu.dot_dimension_numbers<[1], [0], [0], [1], [0, 0, 1, 1], [], []>} : vector<16x20xbf16>, vector<20x400xbf16>, vector<16x400xf32> -> vector<16x400xf32>
    %c1232 = arith.constant 1232 : index
    %c0_23 = arith.constant 0 : index
    %37 = vector.load %arg4[%c1232, %c0_23] : memref<1648x400xbf16, #tpu.memory_space<vmem>>, vector<16x400xbf16>
    %cst_24 = arith.constant dense<0.000000e+00> : vector<16x400xf32>
    %38 = tpu.matmul %1, %37, %cst_24 {dimension_numbers = #tpu.dot_dimension_numbers<[1], [0], [0], [1], [0, 0, 1, 1], [], []>} : vector<16x16xbf16>, vector<16x400xbf16>, vector<16x400xf32> -> vector<16x400xf32>
    %39 = arith.addf %36, %38 : vector<16x400xf32>
    %c0_25 = arith.constant 0 : index
    %c1024 = arith.constant 1024 : index
    %40 = vector.load %arg6[%c0_25, %c1024] : memref<1x2960xf32, #tpu.memory_space<vmem>>, vector<1x400xf32>
    %41 = vector.broadcast %40 : vector<1x400xf32> to vector<16x400xf32>
    %42 = arith.addf %39, %41 : vector<16x400xf32>
    %cst_26 = arith.constant 0.000000e+00 : f32
    %43 = vector.broadcast %cst_26 : f32 to vector<16x400xf32>
    %44 = arith.maximumf %42, %43 : vector<16x400xf32>
    %45 = arith.truncf %44 : vector<16x400xf32> to vector<16x400xbf16>
    %c1248 = arith.constant 1248 : index
    %c0_27 = arith.constant 0 : index
    %46 = vector.load %arg4[%c1248, %c0_27] : memref<1648x400xbf16, #tpu.memory_space<vmem>>, vector<400x400xbf16>
    %cst_28 = arith.constant dense<0.000000e+00> : vector<16x400xf32>
    %47 = tpu.matmul %45, %46, %cst_28 {dimension_numbers = #tpu.dot_dimension_numbers<[1], [0], [0], [1], [0, 0, 1, 1], [], []>} : vector<16x400xbf16>, vector<400x400xbf16>, vector<16x400xf32> -> vector<16x400xf32>
    %c0_29 = arith.constant 0 : index
    %c1536 = arith.constant 1536 : index
    %48 = vector.load %arg6[%c0_29, %c1536] : memref<1x2960xf32, #tpu.memory_space<vmem>>, vector<1x400xf32>
    %49 = vector.broadcast %48 : vector<1x400xf32> to vector<16x400xf32>
    %50 = arith.addf %47, %49 : vector<16x400xf32>
    %cst_30 = arith.constant 0.000000e+00 : f32
    %51 = vector.broadcast %cst_30 : f32 to vector<16x400xf32>
    %52 = arith.maximumf %50, %51 : vector<16x400xf32>
    %53 = arith.truncf %52 : vector<16x400xf32> to vector<16x400xbf16>
    %c0_31 = arith.constant 0 : index
    %c128 = arith.constant 128 : index
    %54 = vector.load %arg5[%c0_31, %c128] : memref<400x912xbf16, #tpu.memory_space<vmem>>, vector<400x784xbf16>
    %cst_32 = arith.constant dense<0.000000e+00> : vector<16x784xf32>
    %55 = tpu.matmul %53, %54, %cst_32 {dimension_numbers = #tpu.dot_dimension_numbers<[1], [0], [0], [1], [0, 0, 1, 1], [], []>} : vector<16x400xbf16>, vector<400x784xbf16>, vector<16x784xf32> -> vector<16x784xf32>
    %c0_33 = arith.constant 0 : index
    %c2176 = arith.constant 2176 : index
    %56 = vector.load %arg6[%c0_33, %c2176] : memref<1x2960xf32, #tpu.memory_space<vmem>>, vector<1x784xf32>
    %57 = vector.broadcast %56 : vector<1x784xf32> to vector<16x784xf32>
    %58 = arith.addf %55, %57 : vector<16x784xf32>
    %59 = arith.negf %58 : vector<16x784xf32>
    %60 = math.exp %59 : vector<16x784xf32>
    %cst_34 = arith.constant 1.000000e+00 : f32
    %61 = vector.broadcast %cst_34 : f32 to vector<16x784xf32>
    %62 = arith.addf %61, %60 : vector<16x784xf32>
    %63 = arith.divf %61, %62 : vector<16x784xf32>
    %c0_35 = arith.constant 0 : index
    %c0_36 = arith.constant 0 : index
    %64 = vector.load %arg7[%c0_35, %c0_36] : memref<16x784xf32, #tpu.memory_space<vmem>>, vector<16x784xf32>
    tpu.vector_store %arg7[%c0_35, %c0_36], %63 {strides = array<i32>} : memref<16x784xf32, #tpu.memory_space<vmem>>, vector<16x784xf32>,
    %c0_37 = arith.constant 0 : index
    %c0_38 = arith.constant 0 : index
    %65 = vector.load %arg8[%c0_37, %c0_38] : memref<16x128xf32, #tpu.memory_space<vmem>>, vector<16x128xf32>
    tpu.vector_store %arg8[%c0_37, %c0_38], %25 {strides = array<i32>} : memref<16x128xf32, #tpu.memory_space<vmem>>, vector<16x128xf32>,
    return
  }
  func.func @transform_0(%arg0: i32) -> (i32, i32) {
    %c0_i32 = arith.constant 0 : i32
    %c0_i32_0 = arith.constant 0 : i32
    return %arg0, %c0_i32 : i32, i32
  }
  func.func @transform_1(%arg0: i32) -> (i32, i32) {
    %c0_i32 = arith.constant 0 : i32
    %c0_i32_0 = arith.constant 0 : i32
    return %arg0, %c0_i32 : i32, i32
  }
  func.func @transform_2(%arg0: i32) -> (i32, i32) {
    %c0_i32 = arith.constant 0 : i32
    %c0_i32_0 = arith.constant 0 : i32
    return %arg0, %c0_i32 : i32, i32
  }
  func.func @transform_3(%arg0: i32) -> (i32, i32) {
    %c0_i32 = arith.constant 0 : i32
    %c0_i32_0 = arith.constant 0 : i32
    %c0_i32_1 = arith.constant 0 : i32
    return %c0_i32, %c0_i32_0 : i32, i32
  }
  func.func @transform_4(%arg0: i32) -> (i32, i32) {
    %c0_i32 = arith.constant 0 : i32
    %c0_i32_0 = arith.constant 0 : i32
    %c0_i32_1 = arith.constant 0 : i32
    return %c0_i32, %c0_i32_0 : i32, i32
  }
  func.func @transform_5(%arg0: i32) -> (i32, i32) {
    %c0_i32 = arith.constant 0 : i32
    %c0_i32_0 = arith.constant 0 : i32
    %c0_i32_1 = arith.constant 0 : i32
    return %c0_i32, %c0_i32_0 : i32, i32
  }
  func.func @transform_6(%arg0: i32) -> (i32, i32) {
    %c0_i32 = arith.constant 0 : i32
    %c0_i32_0 = arith.constant 0 : i32
    return %arg0, %c0_i32 : i32, i32
  }
  func.func @transform_7(%arg0: i32) -> (i32, i32) {
    %c0_i32 = arith.constant 0 : i32
    %c0_i32_0 = arith.constant 0 : i32
    return %arg0, %c0_i32 : i32, i32
  }
}

</mosaic_0001>

<bundles_post_ra>
// kernel: gen_model_forward.1
= control target key start
LH: loop header
LB: loop body
LE: loop exit
PB: predicated region body
PF: predicated region fallthrough
CT: control target
= control target key end

     0   :  { %v7050_v1 = vmov 0   ;;  %vm261_vm0 = vcmask 130048   ;;  %vm3027_vm1 = vcmask 1041408   ;;  %s7051_s28 = smov 108   ;;  %vm3023_vm2 = vcmask 162816   ;;  %s9321_s3 = inlined_call_operand.vmem [shape: bf16[1648,400], index: 3, kind: input, shape index: {}]   ;;  %s9322_s2 = inlined_call_operand.vmem [shape: bf16[16,16], index: 2, kind: input, shape index: {}]   ;;  %s9323_s0 = inlined_call_operand.vmem [shape: bf16[16,784], index: 0, kind: input, shape index: {}]   ;;  %s9324_s5 = inlined_call_operand.vmem [shape: f32[1,2960], index: 5, kind: input, shape index: {}]   ;;  %s9325_s4 = inlined_call_operand.vmem [shape: bf16[400,912], index: 4, kind: input, shape index: {}]   ;;  %s9326_s7 = inlined_call_operand.vmem [shape: f32[16,128], index: 7, kind: output, shape index: {1}]   ;;  %s9327_s1 = inlined_call_operand.vmem [shape: f32[16,20], index: 1, kind: input, shape index: {}]   ;;  %s9328_s6 = inlined_call_operand.vmem [shape: f32[16,784], index: 6, kind: output, shape index: {0}]  }
   0x1   :  { %v6361_v0 = vld [vmem:[%s9321_s3 + $0x624] ss:$16 sps:$4 sm:$0xff]   ;;  %297 = vmatprep.mubr.bf16.mxu1 %v7050_v1  ;;  %v6365_v3 = vld [vmem:[%s9321_s3 + $0x620] ss:$16 sps:$4 sm:$0xff]   ;;  %v6371_v8 = vld [vmem:[%s9321_s3 + $0x628] ss:$16 sps:$4 sm:$0xff]  }
   0x2   :  { %v6363_v2 = vld [vmem:[%s9321_s3 + $0x4] ss:$16 sps:$4 sm:$0xff]   ;;  %265 = vmatprep.subr.bf16.mxu1 %v6361_v0  ;;  %v6366_v4 = vld [vmem:[%s9321_s3] ss:$16 sps:$4 sm:$0xff]   ;;  %v6373_v9 = vld [vmem:[%s9321_s3 + $0x62c] ss:$16 sps:$4 sm:$0xff]  }
   0x3   :  { %1369 = vmatprep.subr.bf16.mxu0 %v6363_v2  ;;  %v6367_v5 = vld [vmem:[%s9322_s2] sm:$0xff]   ;;  %266 = vmatpush1.bf16.msra.mxu1 %v6365_v3  ;;  %v6388_v17 = vld [vmem:[%s9321_s3 + $0xc] ss:$16 sps:$4 sm:$0xff]   ;;  %v6391_v20 = vld [vmem:[%s9323_s0 + $0x18] ss:$28 sps:$4 sm:$0xff]  }
   0x4   :  { %1370 = vmatpush1.bf16.msra.mxu0 %v6366_v4  ;;  %v6368_v6 = vld [vmem:[%s9321_s3 + $0x24] ss:$16 sps:$4 sm:$0xff]   ;;  %v6370_v7 = vld [vmem:[%s9321_s3 + $0x20] ss:$16 sps:$4 sm:$0xff]   ;;  %308 = vmatprep.subr.bf16.mxu1 %v6373_v9  ;;  %v6386_v21 = vld [vmem:[%s9321_s3 + $0x8] ss:$16 sps:$4 sm:$0xff]  }
   0x5   :  { %1371 = vmatprep.subr.bf16.mxu0 %v6368_v6  ;;  %v6374_v10 = vld [vmem:[%s9321_s3 + $0x44] ss:$16 sps:$4 sm:$0xff]   ;;  %v6376_v11 = vld [vmem:[%s9321_s3 + $0x40] ss:$16 sps:$4 sm:$0xff]   ;;  %v6395_v23 = vld [vmem:[%s9321_s3 + $0x2c] ss:$16 sps:$4 sm:$0xff]  }
   0x6   :  { %5570 = vmatmul.mubr.msk.bf16.vlgmr.msra.gmra.mrb[0].mxu1 %vm261_vm0, %v6367_v5  ;;  %v6377_v12 = vld [vmem:[%s9321_s3 + $0x64] ss:$16 sps:$4 sm:$0xff]   ;;  %v6379_v14 = vld [vmem:[%s9321_s3 + $0x60] ss:$16 sps:$4 sm:$0xff]   ;;  %v6393_v25 = vld [vmem:[%s9321_s3 + $0x28] ss:$16 sps:$4 sm:$0xff]  }
   0x7   :  { %309 = vmatpush1.bf16.msra.mxu1 %v6371_v8  ;;  %340 = vmatprep.mubr.bf16.mxu1 %v7050_v1  ;;  %v6382_v13 = vld [vmem:[%s9321_s3 + $0x604] ss:$16 sps:$4 sm:$0xff]   ;;  %v6380_v15 = vld [vmem:[%s9321_s3 + $0x600] ss:$16 sps:$4 sm:$0xff]   ;;  %v6401_v27 = vld [vmem:[%s9321_s3 + $0x4c] ss:$16 sps:$4 sm:$0xff]  }
   0x8   :  { %1372 = vmatpush1.bf16.msra.mxu0 %v6370_v7  ;;  %1498 = vmatprep.subr.bf16.mxu1 %v6382_v13  ;;  %v6383_v16 = vld [vmem:[%s9321_s3 + $0x84] ss:$16 sps:$4 sm:$0xff]   ;;  %v6385_v18 = vld [vmem:[%s9321_s3 + $0x80] ss:$16 sps:$4 sm:$0xff]   ;;  %v6399_v29 = vld [vmem:[%s9321_s3 + $0x48] ss:$16 sps:$4 sm:$0xff]  }
   0x9   :  { %1373 = vmatprep.subr.bf16.mxu0 %v6374_v10  ;;  %v6389_v19 = vld [vmem:[%s9321_s3 + $0xa4] ss:$16 sps:$4 sm:$0xff]   ;;  %v6392_v22 = vld [vmem:[%s9321_s3 + $0xa0] ss:$16 sps:$4 sm:$0xff]   ;;  %v6407_v31 = vld [vmem:[%s9321_s3 + $0x6c] ss:$16 sps:$4 sm:$0xff]  }
   0xa   :  { %v6396_v24 = vld [vmem:[%s9321_s3 + $0xc4] ss:$16 sps:$4 sm:$0xff]   ;;  %v6398_v26 = vld [vmem:[%s9321_s3 + $0xc0] ss:$16 sps:$4 sm:$0xff]   ;;  %v6405_v33 = vld [vmem:[%s9321_s3 + $0x68] ss:$16 sps:$4 sm:$0xff]  }
   0xb   :  { %v6402_v28 = vld [vmem:[%s9321_s3 + $0xe4] ss:$16 sps:$4 sm:$0xff]   ;;  %v6404_v30 = vld [vmem:[%s9321_s3 + $0xe0] ss:$16 sps:$4 sm:$0xff]   ;;  %v6413_v35 = vld [vmem:[%s9321_s3 + $0x8c] ss:$16 sps:$4 sm:$0xff]  }
   0xc   :  { %1374 = vmatpush1.bf16.msra.mxu0 %v6376_v11  ;;  %v6408_v32 = vld [vmem:[%s9321_s3 + $0x104] ss:$16 sps:$4 sm:$0xff]   ;;  %v6410_v34 = vld [vmem:[%s9321_s3 + $0x100] ss:$16 sps:$4 sm:$0xff]   ;;  %v6411_v37 = vld [vmem:[%s9321_s3 + $0x88] ss:$16 sps:$4 sm:$0xff]  }
   0xd   :  { %1375 = vmatprep.subr.bf16.mxu0 %v6377_v12  ;;  %v6414_v36 = vld [vmem:[%s9321_s3 + $0x124] ss:$16 sps:$4 sm:$0xff]   ;;  %v6416_v38 = vld [vmem:[%s9321_s3 + $0x120] ss:$16 sps:$4 sm:$0xff]   ;;  %v6419_v39 = vld [vmem:[%s9321_s3 + $0xac] ss:$16 sps:$4 sm:$0xff]  }
   0xe   :  { %5571 = vmatmul.mubr.msk.bf16.vlgmr.msra.gmra.mrb[4].mxu1 %vm261_vm0, %v6367_v5  ;;  %v6420_v40 = vld [vmem:[%s9321_s3 + $0x144] ss:$16 sps:$4 sm:$0xff]   ;;  %v6417_v41 = vld [vmem:[%s9321_s3 + $0xa8] ss:$16 sps:$4 sm:$0xff]   ;;  %v6422_v42 = vld [vmem:[%s9321_s3 + $0x140] ss:$16 sps:$4 sm:$0xff]  }
   0xf   :  { %1499 = vmatpush1.bf16.msra.mxu1 %v6380_v15  ;;  %1530 = vmatprep.mubr.bf16.mxu1 %v7050_v1  ;;  %v6425_v43 = vld [vmem:[%s9321_s3 + $0xcc] ss:$16 sps:$4 sm:$0xff]   ;;  %v6426_v44 = vld [vmem:[%s9321_s3 + $0x164] ss:$16 sps:$4 sm:$0xff]   ;;  %v6423_v45 = vld [vmem:[%s9321_s3 + $0xc8] ss:$16 sps:$4 sm:$0xff]  }
  0x10   :  { %1376 = vmatpush1.bf16.msra.mxu0 %v6379_v14  ;;  %1541 = vmatprep.subr.bf16.mxu1 %v6388_v17  ;;  %v6428_v46 = vld [vmem:[%s9321_s3 + $0x160] ss:$16 sps:$4 sm:$0xff]   ;;  %v6431_v48 = vld [vmem:[%s9321_s3 + $0xec] ss:$16 sps:$4 sm:$0xff]   ;;  %v6432_v49 = vld [vmem:[%s9321_s3 + $0x184] ss:$16 sps:$4 sm:$0xff]  }
  0x11   :  { %1377 = vmatprep.subr.bf16.mxu0 %v6383_v16  ;;  %v6458_v47 = vld [vmem:[%s9323_s0 + $0x4] ss:$28 sps:$4 sm:$0xff]   ;;  %v6429_v50 = vld [vmem:[%s9321_s3 + $0xe8] ss:$16 sps:$4 sm:$0xff]   ;;  %v6437_v52 = vld [vmem:[%s9321_s3 + $0x10c] ss:$16 sps:$4 sm:$0xff]  }
  0x12   :  { %1401 = vmatprep.mubr.bf16.mxu0 %v6458_v47  ;;  %v6434_v51 = vld [vmem:[%s9321_s3 + $0x180] ss:$16 sps:$4 sm:$0xff]   ;;  %v6438_v53 = vld [vmem:[%s9321_s3 + $0x1a4] ss:$16 sps:$4 sm:$0xff]   ;;  %v6435_v54 = vld [vmem:[%s9321_s3 + $0x108] ss:$16 sps:$4 sm:$0xff]  }
  0x13   :  { %v6440_v55 = vld [vmem:[%s9321_s3 + $0x1a0] ss:$16 sps:$4 sm:$0xff]   ;;  %v6443_v56 = vld [vmem:[%s9321_s3 + $0x12c] ss:$16 sps:$4 sm:$0xff]   ;;  %v6444_v57 = vld [vmem:[%s9321_s3 + $0x1c4] ss:$16 sps:$4 sm:$0xff]  }
  0x14   :  { %1378 = vmatpush1.bf16.msra.mxu0 %v6385_v18  ;;  %v6441_v58 = vld [vmem:[%s9321_s3 + $0x128] ss:$16 sps:$4 sm:$0xff]   ;;  %v6446_v59 = vld [vmem:[%s9321_s3 + $0x1c0] ss:$16 sps:$4 sm:$0xff]   ;;  %v6449_v60 = vld [vmem:[%s9321_s3 + $0x14c] ss:$16 sps:$4 sm:$0xff]  }
  0x15   :  { %1379 = vmatprep.subr.bf16.mxu0 %v6389_v19  ;;  %v6450_v61 = vld [vmem:[%s9321_s3 + $0x1e4] ss:$16 sps:$4 sm:$0xff]   ;;  %v6447_v62 = vld [vmem:[%s9321_s3 + $0x148] ss:$16 sps:$4 sm:$0xff]   ;;  %v6452_v63 = vld [vmem:[%s9321_s3 + $0x1e0] ss:$16 sps:$4 sm:$0xff]  }
  0x16   :  { %5775 = vmatmul.mubr.msk.bf16.vlgmr.msra.gmra.mrb[8].mxu1 %vm261_vm0, %v6391_v20  ;;  %v6455_v0 = vld [vmem:[%s9321_s3 + $0x16c] ss:$16 sps:$4 sm:$0xff]   ;;  %v6461_v2 = vld [vmem:[%s9321_s3 + $0x204] ss:$16 sps:$4 sm:$0xff]   ;;  %v6453_v4 = vld [vmem:[%s9321_s3 + $0x168] ss:$16 sps:$4 sm:$0xff]  }
  0x17   :  { %1542 = vmatpush1.bf16.msra.mxu1 %v6386_v21  ;;  %1573 = vmatprep.mubr.bf16.mxu1 %v6458_v47  ;;  %v6456_v3 = vld [vmem:[%s9323_s0] ss:$28 sps:$4 sm:$0xff]   ;;  %v6467_v7 = vld [vmem:[%s9321_s3 + $0x224] ss:$16 sps:$4 sm:$0xff]   ;;  %v6462_v8 = vld [vmem:[%s9321_s3 + $0x188] ss:$16 sps:$4 sm:$0xff]  }
  0x18   :  { %1380 = vmatpush1.bf16.msra.mxu0 %v6392_v22  ;;  %1543 = vmatprep.subr.bf16.mxu1 %v6395_v23  ;;  %v6459_v5 = vld [vmem:[%s9321_s3 + $0x200] ss:$16 sps:$4 sm:$0xff]   ;;  %v6464_v6 = vld [vmem:[%s9321_s3 + $0x18c] ss:$16 sps:$4 sm:$0xff]   ;;  %v6473_v11 = vld [vmem:[%s9321_s3 + $0x244] ss:$16 sps:$4 sm:$0xff]  }
  0x19   :  { %1381 = vmatprep.subr.bf16.mxu0 %v6396_v24  ;;  %v6465_v9 = vld [vmem:[%s9321_s3 + $0x220] ss:$16 sps:$4 sm:$0xff]   ;;  %v6470_v10 = vld [vmem:[%s9321_s3 + $0x1ac] ss:$16 sps:$4 sm:$0xff]   ;;  %v6468_v12 = vld [vmem:[%s9321_s3 + $0x1a8] ss:$16 sps:$4 sm:$0xff]  }
  0x1a   :  { %v6471_v13 = vld [vmem:[%s9321_s3 + $0x240] ss:$16 sps:$4 sm:$0xff]   ;;  %v6476_v14 = vld [vmem:[%s9321_s3 + $0x1cc] ss:$16 sps:$4 sm:$0xff]   ;;  %v6479_v15 = vld [vmem:[%s9321_s3 + $0x264] ss:$16 sps:$4 sm:$0xff]  }
  0x1b   :  { %1544 = vmatpush1.bf16.msra.mxu1 %v6393_v25  ;;  %v6474_v16 = vld [vmem:[%s9321_s3 + $0x1c8] ss:$16 sps:$4 sm:$0xff]   ;;  %v6477_v17 = vld [vmem:[%s9321_s3 + $0x260] ss:$16 sps:$4 sm:$0xff]   ;;  %v6482_v18 = vld [vmem:[%s9321_s3 + $0x1ec] ss:$16 sps:$4 sm:$0xff]  }
  0x1c   :  { %1382 = vmatpush1.bf16.msra.mxu0 %v6398_v26  ;;  %1545 = vmatprep.subr.bf16.mxu1 %v6401_v27  ;;  %v6485_v19 = vld [vmem:[%s9321_s3 + $0x284] ss:$16 sps:$4 sm:$0xff]   ;;  %v6480_v20 = vld [vmem:[%s9321_s3 + $0x1e8] ss:$16 sps:$4 sm:$0xff]   ;;  %v6483_v21 = vld [vmem:[%s9321_s3 + $0x280] ss:$16 sps:$4 sm:$0xff]  }
  0x1d   :  { %1383 = vmatprep.subr.bf16.mxu0 %v6402_v28  ;;  %v6488_v22 = vld [vmem:[%s9321_s3 + $0x20c] ss:$16 sps:$4 sm:$0xff]   ;;  %v6491_v23 = vld [vmem:[%s9321_s3 + $0x2a4] ss:$16 sps:$4 sm:$0xff]   ;;  %v6486_v24 = vld [vmem:[%s9321_s3 + $0x208] ss:$16 sps:$4 sm:$0xff]  }
  0x1e   :  { %v6489_v25 = vld [vmem:[%s9321_s3 + $0x2a0] ss:$16 sps:$4 sm:$0xff]   ;;  %v6494_v26 = vld [vmem:[%s9321_s3 + $0x22c] ss:$16 sps:$4 sm:$0xff]   ;;  %v6497_v27 = vld [vmem:[%s9321_s3 + $0x2c4] ss:$16 sps:$4 sm:$0xff]  }
  0x1f   :  { %1546 = vmatpush1.bf16.msra.mxu1 %v6399_v29  ;;  %v6492_v28 = vld [vmem:[%s9321_s3 + $0x228] ss:$16 sps:$4 sm:$0xff]   ;;  %v6495_v29 = vld [vmem:[%s9321_s3 + $0x2c0] ss:$16 sps:$4 sm:$0xff]   ;;  %v6524_v47 = vld [vmem:[%s9321_s3 + $0x2cc] ss:$16 sps:$4 sm:$0xff]  }
  0x20   :  { %1384 = vmatpush1.bf16.msra.mxu0 %v6404_v30  ;;  %1547 = vmatprep.subr.bf16.mxu1 %v6407_v31  ;;  %v6557_v30 = vld [vmem:[%s9323_s0 + $0xc] ss:$28 sps:$4 sm:$0xff]  }
  0x21   :  { %1385 = vmatprep.subr.bf16.mxu0 %v6408_v32  ;;  %v6500_v31 = vld [vmem:[%s9321_s3 + $0x24c] ss:$16 sps:$4 sm:$0xff]   ;;  %v6503_v32 = vld [vmem:[%s9321_s3 + $0x2e4] ss:$16 sps:$4 sm:$0xff]  }
  0x23   :  { %1548 = vmatpush1.bf16.msra.mxu1 %v6405_v33  ;;  %v6498_v33 = vld [vmem:[%s9321_s3 + $0x248] ss:$16 sps:$4 sm:$0xff]  }
  0x24   :  { %1386 = vmatpush1.bf16.msra.mxu0 %v6410_v34  ;;  %1549 = vmatprep.subr.bf16.mxu1 %v6413_v35  ;;  %v6501_v34 = vld [vmem:[%s9321_s3 + $0x2e0] ss:$16 sps:$4 sm:$0xff]   ;;  %v6506_v35 = vld [vmem:[%s9321_s3 + $0x26c] ss:$16 sps:$4 sm:$0xff]  }
  0x25   :  { %1387 = vmatprep.subr.bf16.mxu0 %v6414_v36  ;;  %v6509_v36 = vld [vmem:[%s9321_s3 + $0x304] ss:$16 sps:$4 sm:$0xff]  }
  0x27   :  { %1550 = vmatpush1.bf16.msra.mxu1 %v6411_v37  ;;  %v6504_v37 = vld [vmem:[%s9321_s3 + $0x268] ss:$16 sps:$4 sm:$0xff]  }
  0x28   :  { %1388 = vmatpush1.bf16.msra.mxu0 %v6416_v38  ;;  %1551 = vmatprep.subr.bf16.mxu1 %v6419_v39  ;;  %v6507_v38 = vld [vmem:[%s9321_s3 + $0x300] ss:$16 sps:$4 sm:$0xff]   ;;  %v6512_v39 = vld [vmem:[%s9321_s3 + $0x28c] ss:$16 sps:$4 sm:$0xff]  }
  0x29   :  { %1389 = vmatprep.subr.bf16.mxu0 %v6420_v40  ;;  %v6515_v40 = vld [vmem:[%s9321_s3 + $0x324] ss:$16 sps:$4 sm:$0xff]  }
  0x2b   :  { %1552 = vmatpush1.bf16.msra.mxu1 %v6417_v41  ;;  %v6510_v41 = vld [vmem:[%s9321_s3 + $0x288] ss:$16 sps:$4 sm:$0xff]  }
  0x2c   :  { %1390 = vmatpush1.bf16.msra.mxu0 %v6422_v42  ;;  %1553 = vmatprep.subr.bf16.mxu1 %v6425_v43  ;;  %v6513_v42 = vld [vmem:[%s9321_s3 + $0x320] ss:$16 sps:$4 sm:$0xff]   ;;  %v6518_v43 = vld [vmem:[%s9321_s3 + $0x2ac] ss:$16 sps:$4 sm:$0xff]  }
  0x2d   :  { %1391 = vmatprep.subr.bf16.mxu0 %v6426_v44  ;;  %v6521_v44 = vld [vmem:[%s9321_s3 + $0x344] ss:$16 sps:$4 sm:$0xff]  }
  0x2f   :  { %1554 = vmatpush1.bf16.msra.mxu1 %v6423_v45  ;;  %v6516_v45 = vld [vmem:[%s9321_s3 + $0x2a8] ss:$16 sps:$4 sm:$0xff]  }
  0x30   :  { %1392 = vmatpush1.bf16.msra.mxu0 %v6428_v46  ;;  %1555 = vmatprep.subr.bf16.mxu1 %v6431_v48  ;;  %v6519_v46 = vld [vmem:[%s9321_s3 + $0x340] ss:$16 sps:$4 sm:$0xff]   ;;  %v6527_v48 = vld [vmem:[%s9321_s3 + $0x364] ss:$16 sps:$4 sm:$0xff]  }
  0x31   :  { %1393 = vmatprep.subr.bf16.mxu0 %v6432_v49  ;;  %v6522_v49 = vld [vmem:[%s9321_s3 + $0x2c8] ss:$16 sps:$4 sm:$0xff]  }
  0x33   :  { %1556 = vmatpush1.bf16.msra.mxu1 %v6429_v50  ;;  %v6525_v50 = vld [vmem:[%s9321_s3 + $0x360] ss:$16 sps:$4 sm:$0xff]  }
  0x34   :  { %1394 = vmatpush1.bf16.msra.mxu0 %v6434_v51  ;;  %1557 = vmatprep.subr.bf16.mxu1 %v6437_v52  ;;  %v6530_v51 = vld [vmem:[%s9321_s3 + $0x2ec] ss:$16 sps:$4 sm:$0xff]   ;;  %v6533_v52 = vld [vmem:[%s9321_s3 + $0x384] ss:$16 sps:$4 sm:$0xff]  }
  0x35   :  { %1395 = vmatprep.subr.bf16.mxu0 %v6438_v53  ;;  %v6528_v53 = vld [vmem:[%s9321_s3 + $0x2e8] ss:$16 sps:$4 sm:$0xff]  }
  0x37   :  { %1558 = vmatpush1.bf16.msra.mxu1 %v6435_v54  ;;  %v6531_v54 = vld [vmem:[%s9321_s3 + $0x380] ss:$16 sps:$4 sm:$0xff]  }
  0x38   :  { %1396 = vmatpush1.bf16.msra.mxu0 %v6440_v55  ;;  %1559 = vmatprep.subr.bf16.mxu1 %v6443_v56  ;;  %v6536_v55 = vld [vmem:[%s9321_s3 + $0x30c] ss:$16 sps:$4 sm:$0xff]   ;;  %v6539_v56 = vld [vmem:[%s9321_s3 + $0x3a4] ss:$16 sps:$4 sm:$0xff]  }
  0x39   :  { %1397 = vmatprep.subr.bf16.mxu0 %v6444_v57  ;;  %v6534_v57 = vld [vmem:[%s9321_s3 + $0x308] ss:$16 sps:$4 sm:$0xff]  }
  0x3b   :  { %1560 = vmatpush1.bf16.msra.mxu1 %v6441_v58  ;;  %v6537_v58 = vld [vmem:[%s9321_s3 + $0x3a0] ss:$16 sps:$4 sm:$0xff]  }
  0x3c   :  { %1398 = vmatpush1.bf16.msra.mxu0 %v6446_v59  ;;  %1561 = vmatprep.subr.bf16.mxu1 %v6449_v60  ;;  %v6542_v59 = vld [vmem:[%s9321_s3 + $0x32c] ss:$16 sps:$4 sm:$0xff]   ;;  %v6545_v60 = vld [vmem:[%s9321_s3 + $0x3c4] ss:$16 sps:$4 sm:$0xff]  }
  0x3d   :  { %1399 = vmatprep.subr.bf16.mxu0 %v6450_v61  ;;  %v6540_v61 = vld [vmem:[%s9321_s3 + $0x328] ss:$16 sps:$4 sm:$0xff]  }
  0x3f   :  { %1562 = vmatpush1.bf16.msra.mxu1 %v6447_v62  ;;  %v6543_v62 = vld [vmem:[%s9321_s3 + $0x3c0] ss:$16 sps:$4 sm:$0xff]  }
  0x40   :  { %1400 = vmatpush1.bf16.msra.mxu0 %v6452_v63  ;;  %1563 = vmatprep.subr.bf16.mxu1 %v6455_v0  ;;  %v6548_v63 = vld [vmem:[%s9321_s3 + $0x34c] ss:$16 sps:$4 sm:$0xff]   ;;  %v6551_v0 = vld [vmem:[%s9321_s3 + $0x3e4] ss:$16 sps:$4 sm:$0xff]  }
  0x41   :  { %1412 = vmatprep.subr.bf16.mxu0 %v6461_v2  ;;  %v6546_v2 = vld [vmem:[%s9321_s3 + $0x348] ss:$16 sps:$4 sm:$0xff]  }
  0x43   :  { %1402 = vmatmul.mubr.bf16.vlgmr.msra.gmra.mrb[0].mxu0 %v6456_v3  ;;  %1564 = vmatpush1.bf16.msra.mxu1 %v6453_v4  ;;  %v6554_v4 = vld [vmem:[%s9321_s3 + $0x36c] ss:$16 sps:$4 sm:$0xff]  }
  0x44   :  { %1413 = vmatpush1.bf16.msra.mxu0 %v6459_v5  ;;  %1565 = vmatprep.subr.bf16.mxu1 %v6464_v6  ;;  %v6560_v5 = vld [vmem:[%s9321_s3 + $0x404] ss:$16 sps:$4 sm:$0xff]  }
  0x45   :  { %1414 = vmatprep.subr.bf16.mxu0 %v6467_v7  ;;  %1444 = vmatprep.mubr.bf16.mxu0 %v6557_v30  ;;  %v6555_v6 = vld [vmem:[%s9323_s0 + $0x8] ss:$28 sps:$4 sm:$0xff]  }
  0x46   :  { %v6552_v7 = vld [vmem:[%s9321_s3 + $0x368] ss:$16 sps:$4 sm:$0xff]  }
  0x47   :  { %1566 = vmatpush1.bf16.msra.mxu1 %v6462_v8  ;;  %v6558_v8 = vld [vmem:[%s9321_s3 + $0x400] ss:$16 sps:$4 sm:$0xff]  }
  0x48   :  { %1415 = vmatpush1.bf16.msra.mxu0 %v6465_v9  ;;  %1567 = vmatprep.subr.bf16.mxu1 %v6470_v10  ;;  %v6563_v9 = vld [vmem:[%s9321_s3 + $0x38c] ss:$16 sps:$4 sm:$0xff]   ;;  %v6566_v10 = vld [vmem:[%s9321_s3 + $0x424] ss:$16 sps:$4 sm:$0xff]  }
  0x49   :  { %1416 = vmatprep.subr.bf16.mxu0 %v6473_v11  ;;  %v6653_v11 = vld [vmem:[%s9323_s0 + $0x14] ss:$28 sps:$4 sm:$0xff]  }
  0x4b   :  { %1568 = vmatpush1.bf16.msra.mxu1 %v6468_v12  ;;  %v6561_v12 = vld [vmem:[%s9321_s3 + $0x388] ss:$16 sps:$4 sm:$0xff]  }
  0x4c   :  { %1417 = vmatpush1.bf16.msra.mxu0 %v6471_v13  ;;  %1569 = vmatprep.subr.bf16.mxu1 %v6476_v14  ;;  %v6564_v13 = vld [vmem:[%s9321_s3 + $0x420] ss:$16 sps:$4 sm:$0xff]   ;;  %v6569_v14 = vld [vmem:[%s9321_s3 + $0x3ac] ss:$16 sps:$4 sm:$0xff]  }
  0x4d   :  { %1418 = vmatprep.subr.bf16.mxu0 %v6479_v15  ;;  %v6572_v15 = vld [vmem:[%s9321_s3 + $0x444] ss:$16 sps:$4 sm:$0xff]  }
  0x4f   :  { %1570 = vmatpush1.bf16.msra.mxu1 %v6474_v16  ;;  %v6567_v16 = vld [vmem:[%s9321_s3 + $0x3a8] ss:$16 sps:$4 sm:$0xff]  }
  0x50   :  { %1419 = vmatpush1.bf16.msra.mxu0 %v6477_v17  ;;  %1571 = vmatprep.subr.bf16.mxu1 %v6482_v18  ;;  %v6570_v17 = vld [vmem:[%s9321_s3 + $0x440] ss:$16 sps:$4 sm:$0xff]   ;;  %v6575_v18 = vld [vmem:[%s9321_s3 + $0x3cc] ss:$16 sps:$4 sm:$0xff]  }
  0x51   :  { %1420 = vmatprep.subr.bf16.mxu0 %v6485_v19  ;;  %v6578_v19 = vld [vmem:[%s9321_s3 + $0x464] ss:$16 sps:$4 sm:$0xff]  }
  0x53   :  { %1572 = vmatpush1.bf16.msra.mxu1 %v6480_v20  ;;  %v6573_v20 = vld [vmem:[%s9321_s3 + $0x3c8] ss:$16 sps:$4 sm:$0xff]  }
  0x54   :  { %1421 = vmatpush1.bf16.msra.mxu0 %v6483_v21  ;;  %1584 = vmatprep.subr.bf16.mxu1 %v6488_v22  ;;  %v6576_v21 = vld [vmem:[%s9321_s3 + $0x460] ss:$16 sps:$4 sm:$0xff]   ;;  %v6581_v22 = vld [vmem:[%s9321_s3 + $0x3ec] ss:$16 sps:$4 sm:$0xff]  }
  0x55   :  { %1422 = vmatprep.subr.bf16.mxu0 %v6491_v23  ;;  %v6584_v23 = vld [vmem:[%s9321_s3 + $0x484] ss:$16 sps:$4 sm:$0xff]  }
  0x56   :  { %1574 = vmatmul.mubr.bf16.vlgmr.msra.gmra.mrb[4].mxu1 %v6456_v3  ;;  %v6549_v3 = vld [vmem:[%s9321_s3 + $0x3e0] ss:$16 sps:$4 sm:$0xff]  }
  0x57   :  { %1585 = vmatpush1.bf16.msra.mxu1 %v6486_v24  ;;  %1616 = vmatprep.mubr.bf16.mxu1 %v6557_v30  ;;  %v6579_v24 = vld [vmem:[%s9321_s3 + $0x3e8] ss:$16 sps:$4 sm:$0xff]   ;;  %v6593_v30 = vld [vmem:[%s9321_s3 + $0x42c] ss:$16 sps:$4 sm:$0xff]  }
  0x58   :  { %1423 = vmatpush1.bf16.msra.mxu0 %v6489_v25  ;;  %1586 = vmatprep.subr.bf16.mxu1 %v6494_v26  ;;  %v6582_v25 = vld [vmem:[%s9321_s3 + $0x480] ss:$16 sps:$4 sm:$0xff]   ;;  %v6587_v26 = vld [vmem:[%s9321_s3 + $0x40c] ss:$16 sps:$4 sm:$0xff]  }
  0x59   :  { %1424 = vmatprep.subr.bf16.mxu0 %v6497_v27  ;;  %v6590_v27 = vld [vmem:[%s9321_s3 + $0x4a4] ss:$16 sps:$4 sm:$0xff]  }
  0x5b   :  { %1587 = vmatpush1.bf16.msra.mxu1 %v6492_v28  ;;  %v6585_v28 = vld [vmem:[%s9321_s3 + $0x408] ss:$16 sps:$4 sm:$0xff]  }
  0x5c   :  { %1425 = vmatpush1.bf16.msra.mxu0 %v6495_v29  ;;  %1588 = vmatprep.subr.bf16.mxu1 %v6500_v31  ;;  %v6588_v29 = vld [vmem:[%s9321_s3 + $0x4a0] ss:$16 sps:$4 sm:$0xff]   ;;  %v6596_v31 = vld [vmem:[%s9321_s3 + $0x4c4] ss:$16 sps:$4 sm:$0xff]  }
  0x5d   :  { %1426 = vmatprep.subr.bf16.mxu0 %v6503_v32  ;;  %v6591_v32 = vld [vmem:[%s9321_s3 + $0x428] ss:$16 sps:$4 sm:$0xff]  }
  0x5f   :  { %1589 = vmatpush1.bf16.msra.mxu1 %v6498_v33  ;;  %v6594_v33 = vld [vmem:[%s9321_s3 + $0x4c0] ss:$16 sps:$4 sm:$0xff]  }
  0x60   :  { %1427 = vmatpush1.bf16.msra.mxu0 %v6501_v34  ;;  %1590 = vmatprep.subr.bf16.mxu1 %v6506_v35  ;;  %v6599_v34 = vld [vmem:[%s9321_s3 + $0x44c] ss:$16 sps:$4 sm:$0xff]   ;;  %v6602_v35 = vld [vmem:[%s9321_s3 + $0x4e4] ss:$16 sps:$4 sm:$0xff]  }
  0x61   :  { %1428 = vmatprep.subr.bf16.mxu0 %v6509_v36  ;;  %v6597_v36 = vld [vmem:[%s9321_s3 + $0x448] ss:$16 sps:$4 sm:$0xff]  }
  0x63   :  { %1591 = vmatpush1.bf16.msra.mxu1 %v6504_v37  ;;  %v6600_v37 = vld [vmem:[%s9321_s3 + $0x4e0] ss:$16 sps:$4 sm:$0xff]  }
  0x64   :  { %1429 = vmatpush1.bf16.msra.mxu0 %v6507_v38  ;;  %1592 = vmatprep.subr.bf16.mxu1 %v6512_v39  ;;  %v6605_v38 = vld [vmem:[%s9321_s3 + $0x46c] ss:$16 sps:$4 sm:$0xff]   ;;  %v6608_v39 = vld [vmem:[%s9321_s3 + $0x504] ss:$16 sps:$4 sm:$0xff]  }
  0x65   :  { %1430 = vmatprep.subr.bf16.mxu0 %v6515_v40  ;;  %v6603_v40 = vld [vmem:[%s9321_s3 + $0x468] ss:$16 sps:$4 sm:$0xff]  }
  0x67   :  { %1593 = vmatpush1.bf16.msra.mxu1 %v6510_v41  ;;  %v6606_v41 = vld [vmem:[%s9321_s3 + $0x500] ss:$16 sps:$4 sm:$0xff]  }
  0x68   :  { %1431 = vmatpush1.bf16.msra.mxu0 %v6513_v42  ;;  %1594 = vmatprep.subr.bf16.mxu1 %v6518_v43  ;;  %v6611_v42 = vld [vmem:[%s9321_s3 + $0x48c] ss:$16 sps:$4 sm:$0xff]   ;;  %v6614_v43 = vld [vmem:[%s9321_s3 + $0x524] ss:$16 sps:$4 sm:$0xff]  }
  0x69   :  { %1432 = vmatprep.subr.bf16.mxu0 %v6521_v44  ;;  %v6609_v44 = vld [vmem:[%s9321_s3 + $0x488] ss:$16 sps:$4 sm:$0xff]  }
  0x6b   :  { %1595 = vmatpush1.bf16.msra.mxu1 %v6516_v45  ;;  %v6612_v45 = vld [vmem:[%s9321_s3 + $0x520] ss:$16 sps:$4 sm:$0xff]  }
  0x6c   :  { %1433 = vmatpush1.bf16.msra.mxu0 %v6519_v46  ;;  %1596 = vmatprep.subr.bf16.mxu1 %v6524_v47  ;;  %v6617_v46 = vld [vmem:[%s9321_s3 + $0x4ac] ss:$16 sps:$4 sm:$0xff]   ;;  %v6620_v47 = vld [vmem:[%s9321_s3 + $0x544] ss:$16 sps:$4 sm:$0xff]  }
  0x6d   :  { %1434 = vmatprep.subr.bf16.mxu0 %v6527_v48  ;;  %v6615_v48 = vld [vmem:[%s9321_s3 + $0x4a8] ss:$16 sps:$4 sm:$0xff]  }
  0x6f   :  { %1597 = vmatpush1.bf16.msra.mxu1 %v6522_v49  ;;  %v6618_v49 = vld [vmem:[%s9321_s3 + $0x540] ss:$16 sps:$4 sm:$0xff]  }
  0x70   :  { %1435 = vmatpush1.bf16.msra.mxu0 %v6525_v50  ;;  %1598 = vmatprep.subr.bf16.mxu1 %v6530_v51  ;;  %v6623_v50 = vld [vmem:[%s9321_s3 + $0x4cc] ss:$16 sps:$4 sm:$0xff]   ;;  %v6626_v51 = vld [vmem:[%s9321_s3 + $0x564] ss:$16 sps:$4 sm:$0xff]  }
  0x71   :  { %1436 = vmatprep.subr.bf16.mxu0 %v6533_v52  ;;  %v6621_v52 = vld [vmem:[%s9321_s3 + $0x4c8] ss:$16 sps:$4 sm:$0xff]  }
  0x73   :  { %1599 = vmatpush1.bf16.msra.mxu1 %v6528_v53  ;;  %v6624_v53 = vld [vmem:[%s9321_s3 + $0x560] ss:$16 sps:$4 sm:$0xff]  }
  0x74   :  { %1437 = vmatpush1.bf16.msra.mxu0 %v6531_v54  ;;  %1600 = vmatprep.subr.bf16.mxu1 %v6536_v55  ;;  %v6629_v54 = vld [vmem:[%s9321_s3 + $0x4ec] ss:$16 sps:$4 sm:$0xff]   ;;  %v6632_v55 = vld [vmem:[%s9321_s3 + $0x584] ss:$16 sps:$4 sm:$0xff]  }
  0x75   :  { %1438 = vmatprep.subr.bf16.mxu0 %v6539_v56  ;;  %v6627_v56 = vld [vmem:[%s9321_s3 + $0x4e8] ss:$16 sps:$4 sm:$0xff]  }
  0x77   :  { %1601 = vmatpush1.bf16.msra.mxu1 %v6534_v57  ;;  %v6630_v57 = vld [vmem:[%s9321_s3 + $0x580] ss:$16 sps:$4 sm:$0xff]  }
  0x78   :  { %1439 = vmatpush1.bf16.msra.mxu0 %v6537_v58  ;;  %1602 = vmatprep.subr.bf16.mxu1 %v6542_v59  ;;  %v6635_v58 = vld [vmem:[%s9321_s3 + $0x50c] ss:$16 sps:$4 sm:$0xff]   ;;  %v6638_v59 = vld [vmem:[%s9321_s3 + $0x5a4] ss:$16 sps:$4 sm:$0xff]  }
  0x79   :  { %1440 = vmatprep.subr.bf16.mxu0 %v6545_v60  ;;  %v6633_v60 = vld [vmem:[%s9321_s3 + $0x508] ss:$16 sps:$4 sm:$0xff]  }
  0x7b   :  { %1603 = vmatpush1.bf16.msra.mxu1 %v6540_v61  ;;  %v6636_v61 = vld [vmem:[%s9321_s3 + $0x5a0] ss:$16 sps:$4 sm:$0xff]  }
  0x7c   :  { %1441 = vmatpush1.bf16.msra.mxu0 %v6543_v62  ;;  %1604 = vmatprep.subr.bf16.mxu1 %v6548_v63  ;;  %v6641_v62 = vld [vmem:[%s9321_s3 + $0x52c] ss:$16 sps:$4 sm:$0xff]   ;;  %v6644_v63 = vld [vmem:[%s9321_s3 + $0x5c4] ss:$16 sps:$4 sm:$0xff]  }
  0x7d   :  { %1442 = vmatprep.subr.bf16.mxu0 %v6551_v0  ;;  %v6639_v0 = vld [vmem:[%s9321_s3 + $0x528] ss:$16 sps:$4 sm:$0xff]  }
  0x7f   :  { %1605 = vmatpush1.bf16.msra.mxu1 %v6546_v2  ;;  %v6642_v2 = vld [vmem:[%s9321_s3 + $0x5c0] ss:$16 sps:$4 sm:$0xff]  }
  0x80   :  { %1443 = vmatpush1.bf16.msra.mxu0 %v6549_v3  ;;  %1606 = vmatprep.subr.bf16.mxu1 %v6554_v4  ;;  %v6647_v3 = vld [vmem:[%s9321_s3 + $0x54c] ss:$16 sps:$4 sm:$0xff]   ;;  %v6650_v4 = vld [vmem:[%s9321_s3 + $0x5e4] ss:$16 sps:$4 sm:$0xff]  }
  0x81   :  { %1455 = vmatprep.subr.bf16.mxu0 %v6560_v5  ;;  %v6645_v5 = vld [vmem:[%s9321_s3 + $0x548] ss:$16 sps:$4 sm:$0xff]  }
  0x83   :  { %1445 = vmatmul.mubr.bf16.vlgmr.msra.gmra.mrb[0].mxu0 %v6555_v6  ;;  %1607 = vmatpush1.bf16.msra.mxu1 %v6552_v7  ;;  %v6656_v7 = vld [vmem:[%s9321_s3 + $0x56c] ss:$16 sps:$4 sm:$0xff]  }
  0x84   :  { %1456 = vmatpush1.bf16.msra.mxu0 %v6558_v8  ;;  %1608 = vmatprep.subr.bf16.mxu1 %v6563_v9  ;;  %v6674_v8 = vld [vmem:[%s9321_s3 + $0x644] ss:$16 sps:$4 sm:$0xff]   ;;  %v6651_v9 = vld [vmem:[%s9323_s0 + $0x10] ss:$28 sps:$4 sm:$0xff]  }
  0x85   :  { %1457 = vmatprep.subr.bf16.mxu0 %v6566_v10  ;;  %1487 = vmatprep.mubr.bf16.mxu0 %v6653_v11  ;;  %v6654_v10 = vld [vmem:[%s9321_s3 + $0x568] ss:$16 sps:$4 sm:$0xff]  }
  0x87   :  { %1609 = vmatpush1.bf16.msra.mxu1 %v6561_v12  ;;  %v6659_v12 = vld [vmem:[%s9321_s3 + $0x58c] ss:$16 sps:$4 sm:$0xff]  }
  0x88   :  { %1458 = vmatpush1.bf16.msra.mxu0 %v6564_v13  ;;  %1610 = vmatprep.subr.bf16.mxu1 %v6569_v14  ;;  %v6680_v13 = vld [vmem:[%s9321_s3 + $0x664] ss:$16 sps:$4 sm:$0xff]   ;;  %v6657_v14 = vld [vmem:[%s9321_s3 + $0x588] ss:$16 sps:$4 sm:$0xff]  }
  0x89   :  { %1459 = vmatprep.subr.bf16.mxu0 %v6572_v15  ;;  %v6678_v15 = vld [vmem:[%s9321_s3 + $0x660] ss:$16 sps:$4 sm:$0xff]  }
  0x8b   :  { %1611 = vmatpush1.bf16.msra.mxu1 %v6567_v16  ;;  %v6662_v16 = vld [vmem:[%s9321_s3 + $0x5ac] ss:$16 sps:$4 sm:$0xff]  }
  0x8c   :  { %1460 = vmatpush1.bf16.msra.mxu0 %v6570_v17  ;;  %1612 = vmatprep.subr.bf16.mxu1 %v6575_v18  ;;  %v6686_v17 = vld [vmem:[%s9321_s3 + $0x684] ss:$16 sps:$4 sm:$0xff]   ;;  %v6660_v18 = vld [vmem:[%s9321_s3 + $0x5a8] ss:$16 sps:$4 sm:$0xff]  }
  0x8d   :  { %1461 = vmatprep.subr.bf16.mxu0 %v6578_v19  ;;  %v6684_v19 = vld [vmem:[%s9321_s3 + $0x680] ss:$16 sps:$4 sm:$0xff]  }
  0x8f   :  { %1613 = vmatpush1.bf16.msra.mxu1 %v6573_v20  ;;  %v6665_v20 = vld [vmem:[%s9321_s3 + $0x5cc] ss:$16 sps:$4 sm:$0xff]  }
  0x90   :  { %1462 = vmatpush1.bf16.msra.mxu0 %v6576_v21  ;;  %1614 = vmatprep.subr.bf16.mxu1 %v6581_v22  ;;  %v6692_v21 = vld [vmem:[%s9321_s3 + $0x6a4] ss:$16 sps:$4 sm:$0xff]   ;;  %v6663_v22 = vld [vmem:[%s9321_s3 + $0x5c8] ss:$16 sps:$4 sm:$0xff]  }
  0x91   :  { %1463 = vmatprep.subr.bf16.mxu0 %v6584_v23  ;;  %v6690_v23 = vld [vmem:[%s9321_s3 + $0x6a0] ss:$16 sps:$4 sm:$0xff]  }
  0x93   :  { %1615 = vmatpush1.bf16.msra.mxu1 %v6579_v24  ;;  %v6668_v24 = vld [vmem:[%s9321_s3 + $0x5ec] ss:$16 sps:$4 sm:$0xff]  }
  0x94   :  { %1464 = vmatpush1.bf16.msra.mxu0 %v6582_v25  ;;  %1627 = vmatprep.subr.bf16.mxu1 %v6587_v26  ;;  %v6698_v25 = vld [vmem:[%s9321_s3 + $0x6c4] ss:$16 sps:$4 sm:$0xff]   ;;  %v6666_v26 = vld [vmem:[%s9321_s3 + $0x5e8] ss:$16 sps:$4 sm:$0xff]  }
  0x95   :  { %1465 = vmatprep.subr.bf16.mxu0 %v6590_v27  ;;  %v6696_v27 = vld [vmem:[%s9321_s3 + $0x6c0] ss:$16 sps:$4 sm:$0xff]  }
  0x96   :  { %1617 = vmatmul.mubr.bf16.vlgmr.msra.gmra.mrb[4].mxu1 %v6555_v6  ;;  %v6648_v6 = vld [vmem:[%s9321_s3 + $0x5e0] ss:$16 sps:$4 sm:$0xff]  }
  0x97   :  { %1628 = vmatpush1.bf16.msra.mxu1 %v6585_v28  ;;  %1659 = vmatprep.mubr.bf16.mxu1 %v6653_v11  ;;  %v6672_v11 = vld [vmem:[%s9321_s3 + $0x640] ss:$16 sps:$4 sm:$0xff]   ;;  %v6671_v28 = vld [vmem:[%s9321_s3 + $0x60c] ss:$16 sps:$4 sm:$0xff]  }
  0x98   :  { %1466 = vmatpush1.bf16.msra.mxu0 %v6588_v29  ;;  %1629 = vmatprep.subr.bf16.mxu1 %v6593_v30  ;;  %v6704_v29 = vld [vmem:[%s9321_s3 + $0x6e4] ss:$16 sps:$4 sm:$0xff]   ;;  %v6669_v30 = vld [vmem:[%s9321_s3 + $0x608] ss:$16 sps:$4 sm:$0xff]  }
  0x99   :  { %1467 = vmatprep.subr.bf16.mxu0 %v6596_v31  ;;  %v6677_v31 = vld [vmem:[%s9321_s3 + $0x64c] ss:$16 sps:$4 sm:$0xff]  }
  0x9b   :  { %1630 = vmatpush1.bf16.msra.mxu1 %v6591_v32  ;;  %v6702_v32 = vld [vmem:[%s9321_s3 + $0x6e0] ss:$16 sps:$4 sm:$0xff]  }
  0x9c   :  { %1468 = vmatpush1.bf16.msra.mxu0 %v6594_v33  ;;  %1631 = vmatprep.subr.bf16.mxu1 %v6599_v34  ;;  %v6710_v33 = vld [vmem:[%s9321_s3 + $0x704] ss:$16 sps:$4 sm:$0xff]   ;;  %v6708_v34 = vld [vmem:[%s9321_s3 + $0x700] ss:$16 sps:$4 sm:$0xff]  }
  0x9d   :  { %1469 = vmatprep.subr.bf16.mxu0 %v6602_v35  ;;  %v6716_v35 = vld [vmem:[%s9321_s3 + $0x724] ss:$16 sps:$4 sm:$0xff]  }
  0x9f   :  { %1632 = vmatpush1.bf16.msra.mxu1 %v6597_v36 }
  0xa0   :  { %1470 = vmatpush1.bf16.msra.mxu0 %v6600_v37  ;;  %1633 = vmatprep.subr.bf16.mxu1 %v6605_v38  ;;  %v6714_v38 = vld [vmem:[%s9321_s3 + $0x720] ss:$16 sps:$4 sm:$0xff]  }
  0xa1   :  { %1471 = vmatprep.subr.bf16.mxu0 %v6608_v39 }
  0xa3   :  { %1634 = vmatpush1.bf16.msra.mxu1 %v6603_v40  ;;  %v6722_v40 = vld [vmem:[%s9321_s3 + $0x744] ss:$16 sps:$4 sm:$0xff]  }
  0xa4   :  { %1472 = vmatpush1.bf16.msra.mxu0 %v6606_v41  ;;  %1635 = vmatprep.subr.bf16.mxu1 %v6611_v42  ;;  %v6675_v42 = vld [vmem:[%s9321_s3 + $0x648] ss:$16 sps:$4 sm:$0xff]  }
  0xa5   :  { %1473 = vmatprep.subr.bf16.mxu0 %v6614_v43  ;;  %v6683_v43 = vld [vmem:[%s9321_s3 + $0x66c] ss:$16 sps:$4 sm:$0xff]  }
  0xa7   :  { %1636 = vmatpush1.bf16.msra.mxu1 %v6609_v44  ;;  %v6720_v44 = vld [vmem:[%s9321_s3 + $0x740] ss:$16 sps:$4 sm:$0xff]  }
  0xa8   :  { %1474 = vmatpush1.bf16.msra.mxu0 %v6612_v45  ;;  %1637 = vmatprep.subr.bf16.mxu1 %v6617_v46  ;;  %v6728_v45 = vld [vmem:[%s9321_s3 + $0x764] ss:$16 sps:$4 sm:$0xff]  }
  0xa9   :  { %1475 = vmatprep.subr.bf16.mxu0 %v6620_v47  ;;  %v7048_v46 = vld [vmem:[%s9323_s0 + $0x18] ss:$28 sps:$4 sm:$0xff]  }
  0xaa   :  { %v6681_v47 = vld [vmem:[%s9321_s3 + $0x668] ss:$16 sps:$4 sm:$0xff]  }
  0xab   :  { %1638 = vmatpush1.bf16.msra.mxu1 %v6615_v48  ;;  %v6689_v48 = vld [vmem:[%s9321_s3 + $0x68c] ss:$16 sps:$4 sm:$0xff]  }
  0xac   :  { %1476 = vmatpush1.bf16.msra.mxu0 %v6618_v49  ;;  %1639 = vmatprep.subr.bf16.mxu1 %v6623_v50  ;;  %v6726_v49 = vld [vmem:[%s9321_s3 + $0x760] ss:$16 sps:$4 sm:$0xff]   ;;  %v6734_v50 = vld [vmem:[%s9321_s3 + $0x784] ss:$16 sps:$4 sm:$0xff]  }
  0xad   :  { %1477 = vmatprep.subr.bf16.mxu0 %v6626_v51  ;;  %v6687_v51 = vld [vmem:[%s9321_s3 + $0x688] ss:$16 sps:$4 sm:$0xff]  }
  0xaf   :  { %1640 = vmatpush1.bf16.msra.mxu1 %v6621_v52  ;;  %v6695_v52 = vld [vmem:[%s9321_s3 + $0x6ac] ss:$16 sps:$4 sm:$0xff]  }
  0xb0   :  { %1478 = vmatpush1.bf16.msra.mxu0 %v6624_v53  ;;  %1641 = vmatprep.subr.bf16.mxu1 %v6629_v54  ;;  %v6732_v53 = vld [vmem:[%s9321_s3 + $0x780] ss:$16 sps:$4 sm:$0xff]  }
  0xb1   :  { %1479 = vmatprep.subr.bf16.mxu0 %v6632_v55  ;;  %v6740_v55 = vld [vmem:[%s9321_s3 + $0x7a4] ss:$16 sps:$4 sm:$0xff]  }
  0xb3   :  { %1642 = vmatpush1.bf16.msra.mxu1 %v6627_v56 }
  0xb4   :  { %1480 = vmatpush1.bf16.msra.mxu0 %v6630_v57  ;;  %1643 = vmatprep.subr.bf16.mxu1 %v6635_v58  ;;  %v6693_v58 = vld [vmem:[%s9321_s3 + $0x6a8] ss:$16 sps:$4 sm:$0xff]  }
  0xb5   :  { %1481 = vmatprep.subr.bf16.mxu0 %v6638_v59 }
  0xb7   :  { %1644 = vmatpush1.bf16.msra.mxu1 %v6633_v60  ;;  %v6701_v60 = vld [vmem:[%s9321_s3 + $0x6cc] ss:$16 sps:$4 sm:$0xff]  }
  0xb8   :  { %1482 = vmatpush1.bf16.msra.mxu0 %v6636_v61  ;;  %1645 = vmatprep.subr.bf16.mxu1 %v6641_v62  ;;  %v6738_v61 = vld [vmem:[%s9321_s3 + $0x7a0] ss:$16 sps:$4 sm:$0xff]   ;;  %v6746_v62 = vld [vmem:[%s9321_s3 + $0x7c4] ss:$16 sps:$4 sm:$0xff]  }
  0xb9   :  { %1483 = vmatprep.subr.bf16.mxu0 %v6644_v63  ;;  %v6699_v63 = vld [vmem:[%s9321_s3 + $0x6c8] ss:$16 sps:$4 sm:$0xff]  }
  0xbb   :  { %1646 = vmatpush1.bf16.msra.mxu1 %v6639_v0  ;;  %v6707_v0 = vld [vmem:[%s9321_s3 + $0x6ec] ss:$16 sps:$4 sm:$0xff]  }
  0xbc   :  { %1484 = vmatpush1.bf16.msra.mxu0 %v6642_v2  ;;  %1647 = vmatprep.subr.bf16.mxu1 %v6647_v3  ;;  %v6744_v2 = vld [vmem:[%s9321_s3 + $0x7c0] ss:$16 sps:$4 sm:$0xff]   ;;  %v6705_v3 = vld [vmem:[%s9321_s3 + $0x6e8] ss:$16 sps:$4 sm:$0xff]  }
  0xbd   :  { %1485 = vmatprep.subr.bf16.mxu0 %v6650_v4  ;;  %v6713_v4 = vld [vmem:[%s9321_s3 + $0x70c] ss:$16 sps:$4 sm:$0xff]  }
  0xbf   :  { %1648 = vmatpush1.bf16.msra.mxu1 %v6645_v5  ;;  %v6711_v5 = vld [vmem:[%s9321_s3 + $0x708] ss:$16 sps:$4 sm:$0xff]  }
  0xc0   :  { %1486 = vmatpush1.bf16.msra.mxu0 %v6648_v6  ;;  %1649 = vmatprep.subr.bf16.mxu1 %v6656_v7  ;;  %v6719_v6 = vld [vmem:[%s9321_s3 + $0x72c] ss:$16 sps:$4 sm:$0xff]   ;;  %v6717_v7 = vld [vmem:[%s9321_s3 + $0x728] ss:$16 sps:$4 sm:$0xff]  }
  0xc1   :  { %2380 = vmatprep.subr.bf16.mxu0 %v6674_v8  ;;  %v6725_v8 = vld [vmem:[%s9321_s3 + $0x74c] ss:$16 sps:$4 sm:$0xff]  }
  0xc3   :  { %1488 = vmatmul.mubr.bf16.vlgmr.msra.gmra.mrb[0].mxu0 %v6651_v9  ;;  %1650 = vmatpush1.bf16.msra.mxu1 %v6654_v10  ;;  %v6731_v10 = vld [vmem:[%s9321_s3 + $0x76c] ss:$16 sps:$4 sm:$0xff]  }
  0xc4   :  { %2381 = vmatpush1.bf16.msra.mxu0 %v6672_v11  ;;  %1651 = vmatprep.subr.bf16.mxu1 %v6659_v12  ;;  %v6729_v11 = vld [vmem:[%s9321_s3 + $0x768] ss:$16 sps:$4 sm:$0xff]   ;;  %v6737_v12 = vld [vmem:[%s9321_s3 + $0x78c] ss:$16 sps:$4 sm:$0xff]  }
  0xc5   :  { %2382 = vmatprep.subr.bf16.mxu0 %v6680_v13  ;;  %v6735_v13 = vld [vmem:[%s9321_s3 + $0x788] ss:$16 sps:$4 sm:$0xff]  }
  0xc7   :  { %1652 = vmatpush1.bf16.msra.mxu1 %v6657_v14  ;;  %v6743_v14 = vld [vmem:[%s9321_s3 + $0x7ac] ss:$16 sps:$4 sm:$0xff]  }
  0xc8   :  { %2383 = vmatpush1.bf16.msra.mxu0 %v6678_v15  ;;  %1653 = vmatprep.subr.bf16.mxu1 %v6662_v16  ;;  %v6741_v15 = vld [vmem:[%s9321_s3 + $0x7a8] ss:$16 sps:$4 sm:$0xff]   ;;  %v6749_v16 = vld [vmem:[%s9321_s3 + $0x7cc] ss:$16 sps:$4 sm:$0xff]  }
  0xc9   :  { %2384 = vmatprep.subr.bf16.mxu0 %v6686_v17  ;;  %v6747_v17 = vld [vmem:[%s9321_s3 + $0x7c8] ss:$16 sps:$4 sm:$0xff]  }
  0xcb   :  { %1654 = vmatpush1.bf16.msra.mxu1 %v6660_v18  ;;  %v6752_v18 = vld [vmem:[%s9321_s3 + $0x7e4] ss:$16 sps:$4 sm:$0xff]  }
  0xcc   :  { %2385 = vmatpush1.bf16.msra.mxu0 %v6684_v19  ;;  %1655 = vmatprep.subr.bf16.mxu1 %v6665_v20  ;;  %v6755_v19 = vld [vmem:[%s9321_s3 + $0x7ec] ss:$16 sps:$4 sm:$0xff]   ;;  %v6750_v20 = vld [vmem:[%s9321_s3 + $0x7e0] ss:$16 sps:$4 sm:$0xff]  }
  0xcd   :  { %2386 = vmatprep.subr.bf16.mxu0 %v6692_v21  ;;  %v6753_v21 = vld [vmem:[%s9321_s3 + $0x7e8] ss:$16 sps:$4 sm:$0xff]  }
  0xcf   :  { %1656 = vmatpush1.bf16.msra.mxu1 %v6663_v22  ;;  %v6758_v22 = vld [vmem:[%s9321_s3 + $0x804] ss:$16 sps:$4 sm:$0xff]  }
  0xd0   :  { %2387 = vmatpush1.bf16.msra.mxu0 %v6690_v23  ;;  %1657 = vmatprep.subr.bf16.mxu1 %v6668_v24  ;;  %v6761_v23 = vld [vmem:[%s9321_s3 + $0x80c] ss:$16 sps:$4 sm:$0xff]   ;;  %v6756_v24 = vld [vmem:[%s9321_s3 + $0x800] ss:$16 sps:$4 sm:$0xff]  }
  0xd1   :  { %2388 = vmatprep.subr.bf16.mxu0 %v6698_v25  ;;  %v6759_v25 = vld [vmem:[%s9321_s3 + $0x808] ss:$16 sps:$4 sm:$0xff]  }
  0xd3   :  { %1658 = vmatpush1.bf16.msra.mxu1 %v6666_v26  ;;  %v6764_v26 = vld [vmem:[%s9321_s3 + $0x824] ss:$16 sps:$4 sm:$0xff]  }
  0xd4   :  { %2389 = vmatpush1.bf16.msra.mxu0 %v6696_v27  ;;  %1670 = vmatprep.subr.bf16.mxu1 %v6671_v28  ;;  %v6767_v27 = vld [vmem:[%s9321_s3 + $0x82c] ss:$16 sps:$4 sm:$0xff]   ;;  %v6762_v28 = vld [vmem:[%s9321_s3 + $0x820] ss:$16 sps:$4 sm:$0xff]  }
  0xd5   :  { %2390 = vmatprep.subr.bf16.mxu0 %v6704_v29  ;;  %v6765_v29 = vld [vmem:[%s9321_s3 + $0x828] ss:$16 sps:$4 sm:$0xff]  }
  0xd6   :  { %1660 = vmatmul.mubr.bf16.vlgmr.msra.gmra.mrb[4].mxu1 %v6651_v9  ;;  %v6723_v9 = vld [vmem:[%s9321_s3 + $0x748] ss:$16 sps:$4 sm:$0xff]  }
  0xd7   :  { %1671 = vmatpush1.bf16.msra.mxu1 %v6669_v30  ;;  %1702 = vmatprep.mubr.bf16.mxu1 %v7050_v1  ;;  %v6770_v30 = vld [vmem:[%s9321_s3 + $0x844] ss:$16 sps:$4 sm:$0xff]  }
  0xd8   :  { %2466 = vmatprep.subr.bf16.mxu1 %v6677_v31  ;;  %2391 = vmatpush1.bf16.msra.mxu0 %v6702_v32  ;;  %v6773_v31 = vld [vmem:[%s9321_s3 + $0x84c] ss:$16 sps:$4 sm:$0xff]   ;;  %v1715_v32 = vlaneseq }
  0xd9   :  { %v7771_v36 = vpop.f32.mrb[0].mxu1  ;;  %2392 = vmatprep.subr.bf16.mxu0 %v6710_v33 }
  0xda   :  { %v7773_v37 = vpop.f32.mrb[1].mxu1  ;;  %v7941_v33 = vshrl.u32 %v1715_v32, 7 }
  0xdb   :  { %v7778_v39 = vpop.f32.mrb[2].mxu1 }
  0xdc   :  { %v7783_v41 = vpop.f32.mrb[3].mxu1  ;;  %2393 = vmatpush1.bf16.msra.mxu0 %v6708_v34  ;;  %v7944_v34 = vsub.s32 0, %v7941_v33 }
  0xdd   :  { %2394 = vmatprep.subr.bf16.mxu0 %v6716_v35  ;;  %v7949_v35 = vld [vmem:[%s9324_s5] sm:$0xf] }
  0xe0   :  { %2395 = vmatpush1.bf16.msra.mxu0 %v6714_v38  ;;  %v7952_v38 = vsub.s32 1, %v7941_v33 }
  0xe1   :  { %2396 = vmatprep.subr.bf16.mxu0 %v6722_v40 }
  0xe2   :  { %5776 = vmatmul.mubr.msk.bf16.vlgmr.msra.gmra.mrb[4].mxu1 %vm261_vm0, %v7048_v46  ;;  %v1722_v46 = vrot.slane %v7949_v35, %v7952_v38 }
  0xe3   :  { %2467 = vmatpush1.bf16.msra.mxu1 %v6675_v42 }
  0xe4   :  { %2468 = vmatprep.subr.bf16.mxu1 %v6683_v43  ;;  %2397 = vmatpush1.bf16.msra.mxu0 %v6720_v44  ;;  %v1718_v43 = vrot.slane %v7949_v35, %v7944_v34 }
  0xe5   :  { %2398 = vmatprep.subr.bf16.mxu0 %v6728_v45 }
  0xe7   :  { %2469 = vmatpush1.bf16.msra.mxu1 %v6681_v47 }
  0xe8   :  { %2470 = vmatprep.subr.bf16.mxu1 %v6689_v48  ;;  %2399 = vmatpush1.bf16.msra.mxu0 %v6726_v49 }
  0xe9   :  { %v7822_v54 = vpop.f32.mrb[8].mxu1  ;;  %2400 = vmatprep.subr.bf16.mxu0 %v6734_v50 }
  0xea   :  { %v7827_v56 = vpop.f32.mrb[9].mxu1 }
  0xeb   :  { %v7829_v57 = vpop.f32.mrb[10].mxu1  ;;  %2471 = vmatpush1.bf16.msra.mxu1 %v6687_v51 }
  0xec   :  { %v7834_v59 = vpop.f32.mrb[11].mxu1  ;;  %2472 = vmatprep.subr.bf16.mxu1 %v6695_v52  ;;  %2401 = vmatpush1.bf16.msra.mxu0 %v6732_v53 }
  0xed   :  { %2402 = vmatprep.subr.bf16.mxu0 %v6740_v55 }
  0xef   :  { %2473 = vmatpush1.bf16.msra.mxu1 %v6693_v58 }
  0xf0   :  { %2474 = vmatprep.subr.bf16.mxu1 %v6701_v60  ;;  %2403 = vmatpush1.bf16.msra.mxu0 %v6738_v61 }
  0xf1   :  { %2404 = vmatprep.subr.bf16.mxu0 %v6746_v62 }
  0xf3   :  { %2475 = vmatpush1.bf16.msra.mxu1 %v6699_v63 }
  0xf4   :  { %2476 = vmatprep.subr.bf16.mxu1 %v6707_v0  ;;  %2405 = vmatpush1.bf16.msra.mxu0 %v6744_v2 }
  0xf5   :  { %2406 = vmatprep.subr.bf16.mxu0 %v6752_v18 }
  0xf7   :  { %2477 = vmatpush1.bf16.msra.mxu1 %v6705_v3  ;;  %v6777_v3 = vld [vmem:[%s9321_s3 + $0x868] ss:$16 sps:$4 sm:$0xff]  }
  0xf8   :  { %2478 = vmatprep.subr.bf16.mxu1 %v6713_v4  ;;  %2407 = vmatpush1.bf16.msra.mxu0 %v6750_v20  ;;  %v6782_v4 = vld [vmem:[%s9321_s3 + $0x884] ss:$16 sps:$4 sm:$0xff]   ;;  %v6803_v20 = vld [vmem:[%s9321_s3 + $0x8ec] ss:$16 sps:$4 sm:$0xff]  }
  0xf9   :  { %2408 = vmatprep.subr.bf16.mxu0 %v6758_v22 }
  0xfb   :  { %2479 = vmatpush1.bf16.msra.mxu1 %v6711_v5  ;;  %v6785_v5 = vld [vmem:[%s9321_s3 + $0x88c] ss:$16 sps:$4 sm:$0xff]  }
  0xfc   :  { %2480 = vmatprep.subr.bf16.mxu1 %v6719_v6  ;;  %2409 = vmatpush1.bf16.msra.mxu0 %v6756_v24  ;;  %v6780_v6 = vld [vmem:[%s9321_s3 + $0x880] ss:$16 sps:$4 sm:$0xff]   ;;  %v6801_v24 = vld [vmem:[%s9321_s3 + $0x8e8] ss:$16 sps:$4 sm:$0xff]  }
  0xfd   :  { %2410 = vmatprep.subr.bf16.mxu0 %v6764_v26 }
  0xff   :  { %2481 = vmatpush1.bf16.msra.mxu1 %v6717_v7  ;;  %v6783_v7 = vld [vmem:[%s9321_s3 + $0x888] ss:$16 sps:$4 sm:$0xff]  }
 0x100   :  { %2482 = vmatprep.subr.bf16.mxu1 %v6725_v8  ;;  %2411 = vmatpush1.bf16.msra.mxu0 %v6762_v28  ;;  %v6788_v8 = vld [vmem:[%s9321_s3 + $0x8a4] ss:$16 sps:$4 sm:$0xff]   ;;  %v6809_v28 = vld [vmem:[%s9321_s3 + $0x90c] ss:$16 sps:$4 sm:$0xff]  }
 0x101   :  { %2423 = vmatprep.subr.bf16.mxu0 %v6770_v30 }
 0x103   :  { %2483 = vmatpush1.bf16.msra.mxu1 %v6723_v9  ;;  %v6791_v9 = vld [vmem:[%s9321_s3 + $0x8ac] ss:$16 sps:$4 sm:$0xff]  }
 0x104   :  { %2484 = vmatprep.subr.bf16.mxu1 %v6731_v10  ;;  %v6786_v10 = vld [vmem:[%s9321_s3 + $0x8a0] ss:$16 sps:$4 sm:$0xff]  }
 0x107   :  { %2485 = vmatpush1.bf16.msra.mxu1 %v6729_v11  ;;  %v6789_v11 = vld [vmem:[%s9321_s3 + $0x8a8] ss:$16 sps:$4 sm:$0xff]  }
 0x108   :  { %2486 = vmatprep.subr.bf16.mxu1 %v6737_v12  ;;  %v6794_v12 = vld [vmem:[%s9321_s3 + $0x8c4] ss:$16 sps:$4 sm:$0xff]  }
 0x10b   :  { %2487 = vmatpush1.bf16.msra.mxu1 %v6735_v13  ;;  %v6797_v13 = vld [vmem:[%s9321_s3 + $0x8cc] ss:$16 sps:$4 sm:$0xff]  }
 0x10c   :  { %2488 = vmatprep.subr.bf16.mxu1 %v6743_v14  ;;  %v8015_v14 = vsub.s32 2, %v7941_v33 }
 0x10e   :  { %v1726_v18 = vrot.slane %v7949_v35, %v8015_v14 }
 0x10f   :  { %2489 = vmatpush1.bf16.msra.mxu1 %v6741_v15  ;;  %v8018_v15 = vsub.s32 3, %v7941_v33 }
 0x110   :  { %2490 = vmatprep.subr.bf16.mxu1 %v6749_v16  ;;  %v6792_v16 = vld [vmem:[%s9321_s3 + $0x8c0] ss:$16 sps:$4 sm:$0xff]  }
 0x113   :  { %2491 = vmatpush1.bf16.msra.mxu1 %v6747_v17  ;;  %v6795_v17 = vld [vmem:[%s9321_s3 + $0x8c8] ss:$16 sps:$4 sm:$0xff]  }
 0x114   :  { %2492 = vmatprep.subr.bf16.mxu1 %v6755_v19  ;;  %v6800_v19 = vld [vmem:[%s9321_s3 + $0x8e4] ss:$16 sps:$4 sm:$0xff]  }
 0x117   :  { %2493 = vmatpush1.bf16.msra.mxu1 %v6753_v21  ;;  %v1730_v21 = vrot.slane %v7949_v35, %v8018_v15 }
 0x118   :  { %2494 = vmatprep.subr.bf16.mxu1 %v6761_v23  ;;  %v6798_v23 = vld [vmem:[%s9321_s3 + $0x8e0] ss:$16 sps:$4 sm:$0xff]  }
 0x11b   :  { %2495 = vmatpush1.bf16.msra.mxu1 %v6759_v25 }
 0x11c   :  { %2496 = vmatprep.subr.bf16.mxu1 %v6767_v27  ;;  %v6806_v27 = vld [vmem:[%s9321_s3 + $0x904] ss:$16 sps:$4 sm:$0xff]  }
 0x11f   :  { %2497 = vmatpush1.bf16.msra.mxu1 %v6765_v29 }
 0x120   :  { %2509 = vmatprep.subr.bf16.mxu1 %v6773_v31 }
 0x196   :  { %v1489_v40 = vpop.f32.mrb[0].mxu0 }
 0x197   :  { %v6263_v42 = vadd.f32 %v1489_v40, %v7771_v36  ;;  %v1491_v44 = vpop.f32.mrb[1].mxu0  ;;  %v6804_v40 = vld [vmem:[%s9321_s3 + $0x900] ss:$16 sps:$4 sm:$0xff]  }
 0x198   :  { %v6265_v45 = vadd.f32 %v1491_v44, %v7773_v37  ;;  %v1493_v47 = vpop.f32.mrb[2].mxu0 }
 0x199   :  { %v6264_v48 = vadd.f32 %v6263_v42, %v7822_v54  ;;  %v6267_v49 = vadd.f32 %v1493_v47, %v7778_v39  ;;  %v1495_v50 = vpop.f32.mrb[3].mxu0  ;;  %v6768_v39 = vld [vmem:[%s9321_s3 + $0x840] ss:$16 sps:$4 sm:$0xff]   ;;  %v6807_v42 = vld [vmem:[%s9321_s3 + $0x908] ss:$16 sps:$4 sm:$0xff]  }
 0x19a   :  { %v6266_v51 = vadd.f32 %v6265_v45, %v7827_v56  ;;  %v6269_v52 = vadd.f32 %v1495_v50, %v7783_v41  ;;  %v6771_v41 = vld [vmem:[%s9321_s3 + $0x848] ss:$16 sps:$4 sm:$0xff]   ;;  %v6776_v56 = vld [vmem:[%s9321_s3 + $0x864] ss:$16 sps:$4 sm:$0xff]  }
 0x19b   :  { %v1735_v36 = vadd.f32 %v6264_v48, %v1718_v43  ;;  %v6268_v53 = vadd.f32 %v6267_v49, %v7829_v57  ;;  %v6779_v57 = vld [vmem:[%s9321_s3 + $0x86c] ss:$16 sps:$4 sm:$0xff]   ;;  %v6812_v45 = vld [vmem:[%s9321_s3 + $0x924] ss:$16 sps:$4 sm:$0xff]  }
 0x19c   :  { %v1736_v55 = vadd.f32 %v6266_v51, %v1722_v46  ;;  %v6270_v58 = vadd.f32 %v6269_v52, %v7834_v59  ;;  %v6774_v59 = vld [vmem:[%s9321_s3 + $0x860] ss:$16 sps:$4 sm:$0xff]   ;;  %v6813_v52 = vld [vmem:[%s9321_s3 + $0x928] ss:$16 sps:$4 sm:$0xff]  }
 0x19d   :  { %v1739_v37 = vadd.f32 %v6268_v53, %v1718_v43  ;;  %v1743_v61 = vmax.f32 %v1735_v36, 0.0  ;;  %v6810_v51 = vld [vmem:[%s9321_s3 + $0x920] ss:$16 sps:$4 sm:$0xff]   ;;  %v6818_v36 = vld [vmem:[%s9321_s3 + $0x944] ss:$16 sps:$4 sm:$0xff]  }
 0x19e   :  { %v1740_v60 = vadd.f32 %v6270_v58, %v1722_v46  ;;  %v1744_v63 = vmax.f32 %v1736_v55, 0.0  ;;  %v6815_v46 = vld [vmem:[%s9321_s3 + $0x92c] ss:$16 sps:$4 sm:$0xff]   ;;  %v2580_v55 = vld [vmem:[%s9325_s4 + $0x200] sm:$0xf] }
 0x19f   :  { %v1747_v62 = vmax.f32 %v1739_v37, 0.0  ;;  %v6821_v53 = vld [vmem:[%s9321_s3 + $0x94c] ss:$16 sps:$4 sm:$0xff]   ;;  %v2581_v58 = vld [vmem:[%s9325_s4 + $0x220] sm:$0xf] }
 0x1a0   :  { %v1748_v0 = vmax.f32 %v1740_v60, 0.0  ;;  %v6816_v37 = vld [vmem:[%s9321_s3 + $0x940] ss:$16 sps:$4 sm:$0xff]   ;;  %v6819_v60 = vld [vmem:[%s9321_s3 + $0x948] ss:$16 sps:$4 sm:$0xff]  }
 0x1a1   :  { %v1751_v54 = vpack.c.bf16 %v1747_v62, %v1743_v61  ;;  %v2596_v61 = vld [vmem:[%s9325_s4 + $0x400] sm:$0xf] }
 0x1a2   :  { %v1752_v2 = vpack.c.bf16 %v1748_v0, %v1744_v63  ;;  %v2597_v62 = vld [vmem:[%s9325_s4 + $0x420] sm:$0xf]  ;;  %v5888_v63 = vcombine.low %v2580_v55, %v2581_v58 }
 0x1a3   :  { %v2564_v0 = vld [vmem:[%s9325_s4] sm:$0xf] }
 0x1a4   :  { %2412 = vmatprep.mubr.bf16.mxu0 %v1752_v2  ;;  %2498 = vmatprep.mubr.bf16.mxu1 %v1752_v2  ;;  %v2582_v2 = vld [vmem:[%s9325_s4 + $0x240] sm:$0xf] }
 0x1a5   :  { %2413 = vmatmul.mubr.bf16.vlgmr.msra.gmra.mrb[4].mxu0 %v1751_v54  ;;  %2499 = vmatmul.mubr.bf16.vlgmr.msra.gmra.mrb[12].mxu1 %v1751_v54  ;;  %v2565_v54 = vld [vmem:[%s9325_s4 + $0x20] sm:$0xf] }
 0x1a6   :  { %2424 = vmatpush1.bf16.msra.mxu0 %v6768_v39  ;;  %2510 = vmatpush1.bf16.msra.mxu1 %v6771_v41  ;;  %v2583_v39 = vld [vmem:[%s9325_s4 + $0x260] sm:$0xf]  ;;  %v5896_v41 = vcombine.low %v2596_v61, %v2597_v62 }
 0x1a7   :  { %2425 = vmatprep.subr.bf16.mxu0 %v6776_v56  ;;  %2511 = vmatprep.subr.bf16.mxu1 %v6779_v57  ;;  %v5880_v56 = vcombine.low %v2564_v0, %v2565_v54  ;;  %v2598_v57 = vld [vmem:[%s9325_s4 + $0x440] sm:$0xf] }
 0x1a8   :  { %v2592_v58 = vld [vmem:[%s9325_s4 + $0x380] sm:$0xf] }
 0x1a9   :  { %v2576_v61 = vld [vmem:[%s9325_s4 + $0x180] sm:$0xf] }
 0x1aa   :  { %2426 = vmatpush1.bf16.msra.mxu0 %v6774_v59  ;;  %2512 = vmatpush1.bf16.msra.mxu1 %v6777_v3  ;;  %v2599_v59 = vld [vmem:[%s9325_s4 + $0x460] sm:$0xf]  ;;  %v5889_v3 = vcombine.low %v2582_v2, %v2583_v39 }
 0x1ab   :  { %2427 = vmatprep.subr.bf16.mxu0 %v6782_v4  ;;  %2513 = vmatprep.subr.bf16.mxu1 %v6785_v5  ;;  %v2566_v4 = vld [vmem:[%s9325_s4 + $0x40] sm:$0xf] }
 0x1ac   :  { %v2567_v5 = vld [vmem:[%s9325_s4 + $0x60] sm:$0xf] }
 0x1ad   :  { %v2577_v62 = vld [vmem:[%s9325_s4 + $0x1a0] sm:$0xf] }
 0x1ae   :  { %2428 = vmatpush1.bf16.msra.mxu0 %v6780_v6  ;;  %2514 = vmatpush1.bf16.msra.mxu1 %v6783_v7  ;;  %v2584_v6 = vld [vmem:[%s9325_s4 + $0x280] sm:$0xf]  ;;  %v5886_v0 = vcombine.low %v2576_v61, %v2577_v62 }
 0x1af   :  { %2429 = vmatprep.subr.bf16.mxu0 %v6788_v8  ;;  %2515 = vmatprep.subr.bf16.mxu1 %v6791_v9  ;;  %v2585_v7 = vld [vmem:[%s9325_s4 + $0x2a0] sm:$0xf]  ;;  %v5897_v8 = vcombine.low %v2598_v57, %v2599_v59  ;;  %v5881_v9 = vcombine.low %v2566_v4, %v2567_v5 }
 0x1b0   :  { %v2611_v54 = vld [vmem:[%s9325_s4 + $0x5e0] sm:$0xf] }
 0x1b1   :  { %v2594_v39 = vld [vmem:[%s9325_s4 + $0x3c0] sm:$0xf] }
 0x1b2   :  { %2430 = vmatpush1.bf16.msra.mxu0 %v6786_v10  ;;  %2516 = vmatpush1.bf16.msra.mxu1 %v6789_v11  ;;  %v2600_v10 = vld [vmem:[%s9325_s4 + $0x480] sm:$0xf] }
 0x1b3   :  { %2431 = vmatprep.subr.bf16.mxu0 %v6794_v12  ;;  %2517 = vmatprep.subr.bf16.mxu1 %v6797_v13  ;;  %v2601_v11 = vld [vmem:[%s9325_s4 + $0x4a0] sm:$0xf]  ;;  %v5890_v12 = vcombine.low %v2584_v6, %v2585_v7  ;;  %v1855_v7 = vld [vmem:[%s9324_s5 + $0x4] sm:$0xf] }
 0x1b4   :  { %v2568_v13 = vld [vmem:[%s9325_s4 + $0x80] sm:$0xf] }
 0x1b5   :  { %v1704_v22 = vpop.f32.mrb[4].mxu1  ;;  %v2578_v57 = vld [vmem:[%s9325_s4 + $0x1c0] sm:$0xf] }
 0x1b6   :  { %2432 = vmatpush1.bf16.msra.mxu0 %v6792_v16  ;;  %2518 = vmatpush1.bf16.msra.mxu1 %v6795_v17  ;;  %v1737_v25 = vadd.f32 %v1726_v18, %v1704_v22  ;;  %v1706_v26 = vpop.f32.mrb[5].mxu1  ;;  %v2569_v16 = vld [vmem:[%s9325_s4 + $0xa0] sm:$0xf] }
 0x1b7   :  { %2433 = vmatprep.subr.bf16.mxu0 %v6800_v19  ;;  %2519 = vmatprep.subr.bf16.mxu1 %v6803_v20  ;;  %v1738_v29 = vadd.f32 %v1730_v21, %v1706_v26  ;;  %v1708_v30 = vpop.f32.mrb[6].mxu1  ;;  %v2586_v17 = vld [vmem:[%s9325_s4 + $0x2c0] sm:$0xf]  ;;  %v5898_v19 = vcombine.low %v2600_v10, %v2601_v11  ;;  %v5882_v20 = vcombine.low %v2568_v13, %v2569_v16 }
 0x1b8   :  { %v1741_v31 = vadd.f32 %v1726_v18, %v1708_v30  ;;  %v1710_v32 = vpop.f32.mrb[7].mxu1  ;;  %v1745_v43 = vmax.f32 %v1737_v25, 0.0  ;;  %v2587_v18 = vld [vmem:[%s9325_s4 + $0x2e0] sm:$0xf]  ;;  %v1864_v10 = vrot.slane %v1855_v7, %v7952_v38  ;;  %v1872_v11 = vrot.slane %v1855_v7, %v8018_v15 }
 0x1b9   :  { %v1742_v35 = vadd.f32 %v1730_v21, %v1710_v32  ;;  %v1746_v47 = vmax.f32 %v1738_v29, 0.0  ;;  %v2602_v21 = vld [vmem:[%s9325_s4 + $0x4c0] sm:$0xf] }
 0x1ba   :  { %2434 = vmatpush1.bf16.msra.mxu0 %v6798_v23  ;;  %2520 = vmatpush1.bf16.msra.mxu1 %v6801_v24  ;;  %v1749_v44 = vmax.f32 %v1741_v31, 0.0  ;;  %v2603_v22 = vld [vmem:[%s9325_s4 + $0x4e0] sm:$0xf]  ;;  %v5891_v23 = vcombine.low %v2586_v17, %v2587_v18 }
 0x1bb   :  { %2435 = vmatprep.subr.bf16.mxu0 %v6806_v27  ;;  %2521 = vmatprep.subr.bf16.mxu1 %v6809_v28  ;;  %v1750_v48 = vmax.f32 %v1742_v35, 0.0  ;;  %v2570_v24 = vld [vmem:[%s9325_s4 + $0xc0] sm:$0xf]  ;;  %v5899_v28 = vcombine.low %v2602_v21, %v2603_v22 }
 0x1bc   :  { %v1753_v49 = vpack.c.bf16 %v1749_v44, %v1745_v43  ;;  %v2571_v25 = vld [vmem:[%s9325_s4 + $0xe0] sm:$0xf] }
 0x1bd   :  { %v1754_v50 = vpack.c.bf16 %v1750_v48, %v1746_v47  ;;  %v2588_v26 = vld [vmem:[%s9325_s4 + $0x300] sm:$0xf]  ;;  %v5883_v29 = vcombine.low %v2570_v24, %v2571_v25 }
 0x1be   :  { %2436 = vmatpush1.bf16.msra.mxu0 %v6804_v40  ;;  %2522 = vmatpush1.bf16.msra.mxu1 %v6807_v42  ;;  %v2589_v27 = vld [vmem:[%s9325_s4 + $0x320] sm:$0xf] }
 0x1bf   :  { %2437 = vmatprep.subr.bf16.mxu0 %v6812_v45  ;;  %2523 = vmatprep.subr.bf16.mxu1 %v6815_v46  ;;  %v2604_v30 = vld [vmem:[%s9325_s4 + $0x500] sm:$0xf]  ;;  %v5892_v32 = vcombine.low %v2588_v26, %v2589_v27 }
 0x1c0   :  { %5877 = vmatprep.mubr.msk.bf16.mxu0 %vm261_vm0, %v1754_v50  ;;  %5878 = vmatprep.mubr.msk.bf16.mxu1 %vm261_vm0, %v1754_v50  ;;  %v2605_v31 = vld [vmem:[%s9325_s4 + $0x520] sm:$0xf] }
 0x1c1   :  { %v2572_v35 = vld [vmem:[%s9325_s4 + $0x100] sm:$0xf]  ;;  %v5900_v44 = vcombine.low %v2604_v30, %v2605_v31 }
 0x1c2   :  { %2438 = vmatpush1.bf16.msra.mxu0 %v6810_v51  ;;  %2524 = vmatpush1.bf16.msra.mxu1 %v6813_v52  ;;  %v2573_v40 = vld [vmem:[%s9325_s4 + $0x120] sm:$0xf] }
 0x1c3   :  { %2439 = vmatprep.subr.bf16.mxu0 %v6818_v36  ;;  %2525 = vmatprep.subr.bf16.mxu1 %v6821_v53  ;;  %v2590_v42 = vld [vmem:[%s9325_s4 + $0x340] sm:$0xf]  ;;  %v5884_v45 = vcombine.low %v2572_v35, %v2573_v40 }
 0x1c4   :  { %v2591_v43 = vld [vmem:[%s9325_s4 + $0x360] sm:$0xf] }
 0x1c5   :  { %v2606_v46 = vld [vmem:[%s9325_s4 + $0x540] sm:$0xf]  ;;  %v5893_v48 = vcombine.low %v2590_v42, %v2591_v43 }
 0x1c6   :  { %2440 = vmatpush1.bf16.msra.mxu0 %v6816_v37  ;;  %2526 = vmatpush1.bf16.msra.mxu1 %v6819_v60  ;;  %v2607_v47 = vld [vmem:[%s9325_s4 + $0x560] sm:$0xf] }
 0x1c7   :  { %2815 = vmatprep.subr.bf16.mxu1 %v7050_v1  ;;  %6219 = vmatprep.subr.bf16.mxu0 %v5888_v63  ;;  %v2574_v50 = vld [vmem:[%s9325_s4 + $0x140] sm:$0xf] }
 0x1c8   :  { %v2575_v51 = vld [vmem:[%s9325_s4 + $0x160] sm:$0xf] }
 0x1c9   :  { %2456 = vmatmul.mubr.bf16.vlgmr.msra.gmra.mrb[4].mxu0 %v1753_v49  ;;  %2542 = vmatmul.mubr.bf16.vlgmr.msra.gmra.mrb[12].mxu1 %v1753_v49  ;;  %v5901_v49 = vcombine.low %v2606_v46, %v2607_v47  ;;  %v2608_v52 = vld [vmem:[%s9325_s4 + $0x580] sm:$0xf]  ;;  %v5885_v36 = vcombine.low %v2574_v50, %v2575_v51  ;;  %v6824_v50 = vld [vmem:[%s9321_s3 + $0x9a4] ss:$16 sps:$4 sm:$0xff]   ;;  %v6825_v51 = vld [vmem:[%s9321_s3 + $0x9a8] ss:$16 sps:$4 sm:$0xff]  }
 0x1ca   :  { %2816 = vmatpush1.bf16.msra.mxu1 %v5896_v41  ;;  %6220 = vmatpush3.bf16.msra.mxu0 %v5880_v56  ;;  %v2609_v53 = vld [vmem:[%s9325_s4 + $0x5a0] sm:$0xf] }
 0x1cb   :  { %2817 = vmatprep.subr.bf16.mxu1 %v7050_v1  ;;  %6221 = vmatprep.subr.bf16.mxu0 %v5889_v3  ;;  %v5902_v55 = vcombine.low %v2608_v52, %v2609_v53  ;;  %v2593_v37 = vld [vmem:[%s9325_s4 + $0x3a0] sm:$0xf]  ;;  %v6827_v52 = vld [vmem:[%s9321_s3 + $0x9ac] ss:$16 sps:$4 sm:$0xff]  }
 0x1cc   :  { %v5894_v60 = vcombine.low %v2592_v58, %v2593_v37  ;;  %v2610_v63 = vld [vmem:[%s9325_s4 + $0x5c0] sm:$0xf] }
 0x1cd   :  { %v5903_v2 = vcombine.low %v2610_v63, %v2611_v54  ;;  %v2595_v41 = vld [vmem:[%s9325_s4 + $0x3e0] sm:$0xf] }
 0x1ce   :  { %2818 = vmatpush1.bf16.msra.mxu1 %v5897_v8  ;;  %6222 = vmatpush3.bf16.msra.mxu0 %v5881_v9  ;;  %v5895_v56 = vcombine.low %v2594_v39, %v2595_v41  ;;  %v2579_v59 = vld [vmem:[%s9325_s4 + $0x1e0] sm:$0xf]  ;;  %v1860_v8 = vrot.slane %v1855_v7, %v7944_v34  ;;  %v1868_v9 = vrot.slane %v1855_v7, %v8015_v14  ;;  %v6833_v7 = vld [vmem:[%s9321_s3 + $0x96c] ss:$16 sps:$4 sm:$0xff]  }
 0x1cf   :  { %2819 = vmatprep.subr.bf16.mxu1 %v7050_v1  ;;  %6223 = vmatprep.subr.bf16.mxu0 %v5890_v12  ;;  %v2612_v3 = vld [vmem:[%s9325_s4 + $0x600] sm:$0xf]  ;;  %v5887_v4 = vcombine.low %v2578_v57, %v2579_v59 }
 0x1d0   :  { %v2613_v5 = vld [vmem:[%s9325_s4 + $0x620] sm:$0xf] }
 0x1d1   :  { %v5904_v6 = vcombine.low %v2612_v3, %v2613_v5  ;;  %v6828_v53 = vld [vmem:[%s9321_s3 + $0x960] ss:$16 sps:$4 sm:$0xff]  }
 0x1d2   :  { %2820 = vmatpush1.bf16.msra.mxu1 %v5898_v19  ;;  %6224 = vmatpush3.bf16.msra.mxu0 %v5882_v20 }
 0x1d3   :  { %2821 = vmatprep.subr.bf16.mxu1 %v7050_v1  ;;  %6225 = vmatprep.subr.bf16.mxu0 %v5891_v23 }
 0x1d6   :  { %2822 = vmatpush1.bf16.msra.mxu1 %v5899_v28  ;;  %6226 = vmatpush3.bf16.msra.mxu0 %v5883_v29 }
 0x1d7   :  { %2823 = vmatprep.subr.bf16.mxu1 %v7050_v1  ;;  %6227 = vmatprep.subr.bf16.mxu0 %v5892_v32 }
 0x1da   :  { %2824 = vmatpush1.bf16.msra.mxu1 %v5900_v44  ;;  %6228 = vmatpush3.bf16.msra.mxu0 %v5884_v45 }
 0x1db   :  { %2825 = vmatprep.subr.bf16.mxu1 %v7050_v1  ;;  %6229 = vmatprep.subr.bf16.mxu0 %v5893_v48 }
 0x1de   :  { %2826 = vmatpush1.bf16.msra.mxu1 %v5901_v49  ;;  %6230 = vmatpush3.bf16.msra.mxu0 %v5885_v36  ;;  %v6822_v49 = vld [vmem:[%s9321_s3 + $0x9a0] ss:$16 sps:$4 sm:$0xff]   ;;  %v6830_v36 = vld [vmem:[%s9321_s3 + $0x964] ss:$16 sps:$4 sm:$0xff]  }
 0x1df   :  { %2827 = vmatprep.subr.bf16.mxu1 %v7050_v1  ;;  %6231 = vmatprep.subr.bf16.mxu0 %v5894_v60  ;;  %v5879_v60 = vld [vmem:[%s9324_s5 + $0x10] ss:$0 sm:$0xff] }
 0x1e2   :  { %2828 = vmatpush1.bf16.msra.mxu1 %v5902_v55  ;;  %6232 = vmatpush3.bf16.msra.mxu0 %v5886_v0  ;;  %v7049_v55 = vld [vmem:[%s9322_s2] sm:$0xff]  }
 0x1e3   :  { %2829 = vmatprep.subr.bf16.mxu1 %v7050_v1  ;;  %6233 = vmatprep.subr.bf16.mxu0 %v5895_v56 }
 0x1e6   :  { %2830 = vmatpush1.bf16.msra.mxu1 %v5903_v2  ;;  %6234 = vmatpush3.bf16.msra.mxu0 %v5887_v4 }
 0x1e7   :  { %2831 = vmatprep.subr.bf16.mxu1 %v7050_v1  ;;  %2907 = vmatprep.subr.bf16.mxu0 %v6824_v50  ;;  %v6858_v50 = vld [vmem:[%s9321_s3 + $0xa24] ss:$16 sps:$4 sm:$0xff]  }
 0x1ea   :  { %2832 = vmatpush1.bf16.msra.mxu1 %v5904_v6 }
 0x1eb   :  { %2950 = vmatprep.subr.bf16.mxu1 %v6827_v52  ;;  %v6856_v52 = vld [vmem:[%s9321_s3 + $0xa20] ss:$16 sps:$4 sm:$0xff]  }
 0x29c   :  { %v2457_v12 = vpop.f32.mrb[4].mxu0  ;;  %v2543_v13 = vpop.f32.mrb[12].mxu1 }
 0x29d   :  { %v6271_v16 = vadd.f32 %v2457_v12, %v1860_v8  ;;  %v6275_v17 = vadd.f32 %v2543_v13, %v1868_v9  ;;  %v2459_v18 = vpop.f32.mrb[5].mxu0  ;;  %v2545_v19 = vpop.f32.mrb[13].mxu1  ;;  %v2882_v12 = vld [vmem:[%s9321_s3 + $0x988] sm:$0x33] }
 0x29e   :  { %v6272_v20 = vadd.f32 %v2459_v18, %v1864_v10  ;;  %v6276_v21 = vadd.f32 %v2545_v19, %v1872_v11  ;;  %v2461_v22 = vpop.f32.mrb[6].mxu0  ;;  %v2547_v23 = vpop.f32.mrb[14].mxu1 }
 0x29f   :  { %v6273_v24 = vadd.f32 %v2461_v22, %v1860_v8  ;;  %v6277_v25 = vadd.f32 %v2547_v23, %v1868_v9  ;;  %v2463_v26 = vpop.f32.mrb[7].mxu0  ;;  %v2549_v27 = vpop.f32.mrb[15].mxu1  ;;  %v2552_v30 = vmax.f32 %v6271_v16, 0.0  ;;  %v2554_v31 = vmax.f32 %v6275_v17, 0.0  ;;  %v6831_v8 = vld [vmem:[%s9321_s3 + $0x968] ss:$16 sps:$4 sm:$0xff]  }
 0x2a0   :  { %v6274_v28 = vadd.f32 %v2463_v26, %v1864_v10  ;;  %v6278_v29 = vadd.f32 %v2549_v27, %v1872_v11  ;;  %v2553_v40 = vmax.f32 %v6272_v20, 0.0  ;;  %v2555_v42 = vmax.f32 %v6276_v21, 0.0  ;;  %v2881_v10 = vld [vmem:[%s9321_s3 + $0x980] sm:$0x33]  ;;  %v6843_v21 = vld [vmem:[%s9321_s3 + $0x9cc] ss:$16 sps:$4 sm:$0xff]  }
 0x2a1   :  { %v2556_v32 = vmax.f32 %v6273_v24, 0.0  ;;  %v2558_v35 = vmax.f32 %v6277_v25, 0.0  ;;  %v5917_v11 = vcombine.high %v2881_v10, %v2881_v10  ;;  %v5916_v13 = vcombine.low %v2881_v10, %v2881_v10  ;;  %v6840_v20 = vld [vmem:[%s9321_s3 + $0x9c4] ss:$16 sps:$4 sm:$0xff]   ;;  %v2857_v26 = vld [vmem:[%s9327_s1 + $0x8] sm:$0xff] }
 0x2a2   :  { %v2557_v43 = vmax.f32 %v6274_v28, 0.0  ;;  %v2559_v44 = vmax.f32 %v6278_v29, 0.0  ;;  %v5919_v16 = vcombine.high %v2882_v12, %v2882_v12  ;;  %v5918_v17 = vcombine.low %v2882_v12, %v2882_v12  ;;  %v2856_v24 = vld [vmem:[%s9327_s1] sm:$0xff]  ;;  %v6895_v10 = vld [vmem:[%s9321_s3 + $0xae8] ss:$16 sps:$4 sm:$0xff]  }
 0x2a3   :  { %v2560_v45 = vpack.c.bf16 %v2556_v32, %v2552_v30  ;;  %v2562_v46 = vpack.c.bf16 %v2558_v35, %v2554_v31  ;;  %v3029_v18 = vsel %vm3027_vm1, %v5916_v13, 0  ;;  %v6838_v32 = vld [vmem:[%s9321_s3 + $0x9c0] ss:$16 sps:$4 sm:$0xff]   ;;  %v6841_v35 = vld [vmem:[%s9321_s3 + $0x9c8] ss:$16 sps:$4 sm:$0xff]  }
 0x2a4   :  { %v2561_v47 = vpack.c.bf16 %v2557_v43, %v2553_v40  ;;  %v2563_v48 = vpack.c.bf16 %v2559_v44, %v2555_v42  ;;  %v3035_v19 = vsel %vm3027_vm1, %v5918_v17, 0  ;;  %v6846_v42 = vld [vmem:[%s9321_s3 + $0x9e4] ss:$16 sps:$4 sm:$0xff]   ;;  %v6849_v43 = vld [vmem:[%s9321_s3 + $0x9ec] ss:$16 sps:$4 sm:$0xff]  }
 0x2a5   :  { %v6844_v44 = vld [vmem:[%s9321_s3 + $0x9e0] ss:$16 sps:$4 sm:$0xff]   ;;  %v6903_v12 = vld [vmem:[%s9321_s3 + $0xb0c] ss:$16 sps:$4 sm:$0xff]   ;;  %v6906_v17 = vld [vmem:[%s9321_s3 + $0xb24] ss:$16 sps:$4 sm:$0xff]  }
 0x2a6   :  { %2806 = vmatprep.mubr.bf16.mxu0 %v2561_v47  ;;  %5905 = vmatprep.mubr.msk.bf16.mxu1 %vm261_vm0, %v2563_v48  ;;  %v6855_v47 = vld [vmem:[%s9321_s3 + $0xa0c] ss:$16 sps:$4 sm:$0xff]   ;;  %v6850_v48 = vld [vmem:[%s9321_s3 + $0xa00] ss:$16 sps:$4 sm:$0xff]  }
 0x2a7   :  { %2807 = vmatmul.mubr.bf16.vlgmr.msra.gmra.mrb[8].mxu0 %v2560_v45  ;;  %2848 = vmatmul.mubr.bf16.vlgmr.msra.gmra.mrb[16].mxu1 %v2562_v46  ;;  %v6847_v45 = vld [vmem:[%s9321_s3 + $0x9e8] ss:$16 sps:$4 sm:$0xff]   ;;  %v6852_v46 = vld [vmem:[%s9321_s3 + $0xa04] ss:$16 sps:$4 sm:$0xff]   ;;  %v6898_v13 = vld [vmem:[%s9321_s3 + $0xb00] ss:$16 sps:$4 sm:$0xff]  }
 0x2a8   :  { %2939 = vmatprep.mubr.bf16.mxu0 %v7050_v1  ;;  %2982 = vmatprep.mubr.bf16.mxu1 %v7050_v1 }
 0x2a9   :  { %2908 = vmatpush1.bf16.msra.mxu0 %v6822_v49  ;;  %2951 = vmatpush1.bf16.msra.mxu1 %v6825_v51  ;;  %v6853_v49 = vld [vmem:[%s9321_s3 + $0xa08] ss:$16 sps:$4 sm:$0xff]   ;;  %v6861_v51 = vld [vmem:[%s9321_s3 + $0xa2c] ss:$16 sps:$4 sm:$0xff]  }
 0x2aa   :  { %3040 = vmatprep.subr.bf16.mxu0 %v6830_v36  ;;  %3083 = vmatprep.subr.bf16.mxu1 %v6833_v7  ;;  %v6859_v36 = vld [vmem:[%s9321_s3 + $0xa28] ss:$16 sps:$4 sm:$0xff]   ;;  %v6894_v7 = vld [vmem:[%s9321_s3 + $0xae4] ss:$16 sps:$4 sm:$0xff]  }
 0x2af   :  { %5910 = vmatmul.mubr.msk.bf16.vlgmr.msra.gmra.mrb[12].mxu0 %vm261_vm0, %v7049_v55  ;;  %5911 = vmatmul.mubr.msk.bf16.vlgmr.msra.gmra.mrb[20].mxu1 %vm261_vm0, %v7049_v55  ;;  %v6867_v55 = vld [vmem:[%s9321_s3 + $0xa4c] ss:$16 sps:$4 sm:$0xff]  }
 0x2b0   :  { %3041 = vmatpush1.bf16.msra.mxu0 %v6828_v53  ;;  %3072 = vmatprep.mubr.bf16.mxu0 %v7050_v1  ;;  %v6864_v53 = vld [vmem:[%s9321_s3 + $0xa44] ss:$16 sps:$4 sm:$0xff]  }
 0x2b1   :  { %3115 = vmatprep.mubr.bf16.mxu1 %v7050_v1  ;;  %3084 = vmatpush1.bf16.msra.mxu1 %v6831_v8  ;;  %v6897_v8 = vld [vmem:[%s9321_s3 + $0xaec] ss:$16 sps:$4 sm:$0xff]  }
 0x2b2   :  { %5920 = vmatprep.subr.msk.bf16.mxu0 %vm3027_vm1, %v5917_v11  ;;  %5922 = vmatprep.subr.msk.bf16.mxu1 %vm3027_vm1, %v5919_v16  ;;  %v6900_v11 = vld [vmem:[%s9321_s3 + $0xb04] ss:$16 sps:$4 sm:$0xff]   ;;  %v6901_v16 = vld [vmem:[%s9321_s3 + $0xb08] ss:$16 sps:$4 sm:$0xff]  }
 0x2b4   :  { %3043 = vmatpush1.bf16.msra.mxu0 %v3029_v18  ;;  %v6909_v18 = vld [vmem:[%s9321_s3 + $0xb2c] ss:$16 sps:$4 sm:$0xff]  }
 0x2b5   :  { %3086 = vmatpush1.bf16.msra.mxu1 %v3035_v19  ;;  %3793 = vmatprep.subr.bf16.mxu0 %v6840_v20  ;;  %v6904_v19 = vld [vmem:[%s9321_s3 + $0xb20] ss:$16 sps:$4 sm:$0xff]   ;;  %v6907_v20 = vld [vmem:[%s9321_s3 + $0xb28] ss:$16 sps:$4 sm:$0xff]  }
 0x2b6   :  { %3879 = vmatprep.subr.bf16.mxu1 %v6843_v21  ;;  %v6912_v21 = vld [vmem:[%s9321_s3 + $0xb44] ss:$16 sps:$4 sm:$0xff]  }
 0x37a   :  { %v6235_v58 = vpop.f32.mrb[8].mxu0  ;;  %v2849_v37 = vpop.f32.mrb[16].mxu1 }
 0x37b   :  { %v6236_v61 = vpop.f32.mrb[9].mxu0  ;;  %v2851_v62 = vpop.f32.mrb[17].mxu1 }
 0x37c   :  { %v6237_v63 = vadd.f32 %v6236_v61, %v6235_v58  ;;  %v6238_v0 = vpop.f32.mrb[10].mxu0  ;;  %v2852_v54 = vpop.f32.mrb[18].mxu1  ;;  %v6862_v58 = vld [vmem:[%s9321_s3 + $0xa40] ss:$16 sps:$4 sm:$0xff]   ;;  %v6873_v61 = vld [vmem:[%s9321_s3 + $0xa6c] ss:$16 sps:$4 sm:$0xff]  }
 0x37d   :  { %v6239_v2 = vpop.f32.mrb[11].mxu0  ;;  %v2854_v39 = vpop.f32.mrb[19].mxu1  ;;  %v6868_v62 = vld [vmem:[%s9321_s3 + $0xa60] ss:$16 sps:$4 sm:$0xff]  }
 0x37e   :  { %v2809_v41 = vadd.f32 %v6237_v63, %v5879_v60  ;;  %v6240_v56 = vadd.f32 %v6239_v2, %v6238_v0  ;;  %v6871_v63 = vld [vmem:[%s9321_s3 + $0xa68] ss:$16 sps:$4 sm:$0xff]   ;;  %v6876_v0 = vld [vmem:[%s9321_s3 + $0xa84] ss:$16 sps:$4 sm:$0xff]   ;;  %v6874_v2 = vld [vmem:[%s9321_s3 + $0xa80] ss:$16 sps:$4 sm:$0xff]  }
 0x37f   :  { %v6877_v39 = vld [vmem:[%s9321_s3 + $0xa88] ss:$16 sps:$4 sm:$0xff]  }
 0x380   :  { %v2850_v57 = vadd.f32 %v2849_v37, %v2809_v41  ;;  %v2812_v59 = vadd.f32 %v6240_v56, %v5879_v60  ;;  %v6865_v37 = vld [vmem:[%s9321_s3 + $0xa48] ss:$16 sps:$4 sm:$0xff]   ;;  %v6870_v60 = vld [vmem:[%s9321_s3 + $0xa64] ss:$16 sps:$4 sm:$0xff]   ;;  %v6885_v56 = vld [vmem:[%s9321_s3 + $0xaac] ss:$16 sps:$4 sm:$0xff]  }
 0x381   :  { %v6882_v41 = vld [vmem:[%s9321_s3 + $0xaa4] ss:$16 sps:$4 sm:$0xff]  }
 0x382   :  { %v2858_v3 = vmul.f32 0.5, %v2850_v57  ;;  %5555 = vst [vmem:[%s9326_s7] sm:$0xff] %v2850_v57  ;;  %v2853_v4 = vadd.f32 %v2852_v54, %v2812_v59  ;;  %v6879_v54 = vld [vmem:[%s9321_s3 + $0xa8c] ss:$16 sps:$4 sm:$0xff]   ;;  %v6883_v59 = vld [vmem:[%s9321_s3 + $0xaa8] ss:$16 sps:$4 sm:$0xff]  }
 0x384   :  { %v2860_v5 = vmul.f32 1.442695, %v2858_v3  ;;  %v2859_v6 = vmul.f32 0.5, %v2853_v4  ;;  %5556 = vst [vmem:[%s9326_s7 + $0x8] sm:$0xff] %v2853_v4  ;;  %v6888_v3 = vld [vmem:[%s9321_s3 + $0xac4] ss:$16 sps:$4 sm:$0xff]  }
 0x386   :  { %6988 = vpow2.f32 %v2860_v5  ;;  %v2862_v9 = vmul.f32 1.442695, %v2859_v6  ;;  %v6886_v5 = vld [vmem:[%s9321_s3 + $0xac0] ss:$16 sps:$4 sm:$0xff]   ;;  %v6889_v6 = vld [vmem:[%s9321_s3 + $0xac8] ss:$16 sps:$4 sm:$0xff]  }
 0x388   :  { %6990 = vpow2.f32 %v2862_v9  ;;  %v6892_v9 = vld [vmem:[%s9321_s3 + $0xae0] ss:$16 sps:$4 sm:$0xff]  }
 0x390   :  { %v6989_v22 = vpop.eup %6988 }
 0x391   :  { %2866 = vrot.lane.b32.xlu0 %v6989_v22, %s7051_s28  ;;  %v6915_v22 = vld [vmem:[%s9321_s3 + $0xb4c] ss:$16 sps:$4 sm:$0xff]  }
 0x392   :  { %v6991_v23 = vpop.eup %6990 }
 0x395   :  { %2868 = vrot.lane.b32.xlu0 %v6991_v23, %s7051_s28  ;;  %v6910_v23 = vld [vmem:[%s9321_s3 + $0xb40] ss:$16 sps:$4 sm:$0xff]  }
 0x403   :  { %v2867_v25 = vpop.permute.xlu0 %2866 }
 0x404   :  { %v2872_v27 = vmul.f32 %v2867_v25, %v2856_v24  ;;  %v6913_v24 = vld [vmem:[%s9321_s3 + $0xb48] ss:$16 sps:$4 sm:$0xff]   ;;  %v6918_v25 = vld [vmem:[%s9321_s3 + $0xb64] ss:$16 sps:$4 sm:$0xff]  }
 0x406   :  { %v2874_v30 = vadd.f32 %v2872_v27, %v2850_v57  ;;  %v6880_v57 = vld [vmem:[%s9321_s3 + $0xaa0] ss:$16 sps:$4 sm:$0xff]  }
 0x407   :  { %v2869_v28 = vpop.permute.xlu0 %2868  ;;  %v6916_v27 = vld [vmem:[%s9321_s3 + $0xb60] ss:$16 sps:$4 sm:$0xff]  }
 0x408   :  { %v2873_v29 = vmul.f32 %v2869_v28, %v2857_v26  ;;  %v6921_v26 = vld [vmem:[%s9321_s3 + $0xb6c] ss:$16 sps:$4 sm:$0xff]   ;;  %v6919_v28 = vld [vmem:[%s9321_s3 + $0xb68] ss:$16 sps:$4 sm:$0xff]  }
 0x40a   :  { %v2875_v31 = vadd.f32 %v2873_v29, %v2853_v4  ;;  %v6891_v4 = vld [vmem:[%s9321_s3 + $0xacc] ss:$16 sps:$4 sm:$0xff]   ;;  %v6924_v29 = vld [vmem:[%s9321_s3 + $0xb84] ss:$16 sps:$4 sm:$0xff]  }
 0x40c   :  { %v2876_v40 = vpack.c.bf16 %v2875_v31, %v2874_v30  ;;  %v6927_v30 = vld [vmem:[%s9321_s3 + $0xb8c] ss:$16 sps:$4 sm:$0xff]   ;;  %v6922_v31 = vld [vmem:[%s9321_s3 + $0xb80] ss:$16 sps:$4 sm:$0xff]  }
 0x40e   :  { %5921 = vmatmul.mubr.msk.bf16.vlgmr.msra.gmra.mrb[12].mxu0 %vm3023_vm2, %v2876_v40  ;;  %5923 = vmatmul.mubr.msk.bf16.vlgmr.msra.gmra.mrb[20].mxu1 %vm3023_vm2, %v2876_v40  ;;  %v6933_v40 = vld [vmem:[%s9321_s3 + $0xbac] ss:$16 sps:$4 sm:$0xff]  }
 0x40f   :  { %3794 = vmatpush1.bf16.msra.mxu0 %v6838_v32  ;;  %3880 = vmatpush1.bf16.msra.mxu1 %v6841_v35  ;;  %v6925_v32 = vld [vmem:[%s9321_s3 + $0xb88] ss:$16 sps:$4 sm:$0xff]   ;;  %v6930_v35 = vld [vmem:[%s9321_s3 + $0xba4] ss:$16 sps:$4 sm:$0xff]  }
 0x410   :  { %3795 = vmatprep.subr.bf16.mxu0 %v6846_v42  ;;  %3881 = vmatprep.subr.bf16.mxu1 %v6849_v43  ;;  %v6928_v42 = vld [vmem:[%s9321_s3 + $0xba0] ss:$16 sps:$4 sm:$0xff]   ;;  %v6931_v43 = vld [vmem:[%s9321_s3 + $0xba8] ss:$16 sps:$4 sm:$0xff]  }
 0x413   :  { %3796 = vmatpush1.bf16.msra.mxu0 %v6844_v44  ;;  %3882 = vmatpush1.bf16.msra.mxu1 %v6847_v45  ;;  %v6936_v44 = vld [vmem:[%s9321_s3 + $0xbc4] ss:$16 sps:$4 sm:$0xff]   ;;  %v6939_v45 = vld [vmem:[%s9321_s3 + $0xbcc] ss:$16 sps:$4 sm:$0xff]  }
 0x414   :  { %3797 = vmatprep.subr.bf16.mxu0 %v6852_v46  ;;  %3883 = vmatprep.subr.bf16.mxu1 %v6855_v47  ;;  %v3126_v46 = vld [vmem:[%s9324_s5 + $0x8] sm:$0xf] }
 0x415   :  { %v3131_v47 = vrot.slane %v3126_v46, %v7944_v34 }
 0x417   :  { %3798 = vmatpush1.bf16.msra.mxu0 %v6850_v48  ;;  %3884 = vmatpush1.bf16.msra.mxu1 %v6853_v49  ;;  %v3139_v48 = vrot.slane %v3126_v46, %v8015_v14  ;;  %v3135_v49 = vrot.slane %v3126_v46, %v7952_v38 }
 0x418   :  { %3799 = vmatprep.subr.bf16.mxu0 %v6858_v50  ;;  %3885 = vmatprep.subr.bf16.mxu1 %v6861_v51  ;;  %v3143_v50 = vrot.slane %v3126_v46, %v8018_v15  ;;  %v6973_v46 = vld [vmem:[%s9321_s3 + $0xc88] ss:$16 sps:$4 sm:$0xff]  }
 0x41b   :  { %3800 = vmatpush1.bf16.msra.mxu0 %v6856_v52  ;;  %3886 = vmatpush1.bf16.msra.mxu1 %v6859_v36 }
 0x41c   :  { %3801 = vmatprep.subr.bf16.mxu0 %v6864_v53  ;;  %3887 = vmatprep.subr.bf16.mxu1 %v6867_v55 }
 0x41f   :  { %3802 = vmatpush1.bf16.msra.mxu0 %v6862_v58  ;;  %3888 = vmatpush1.bf16.msra.mxu1 %v6865_v37 }
 0x420   :  { %3803 = vmatprep.subr.bf16.mxu0 %v6870_v60  ;;  %3889 = vmatprep.subr.bf16.mxu1 %v6873_v61 }
 0x423   :  { %3804 = vmatpush1.bf16.msra.mxu0 %v6868_v62  ;;  %3890 = vmatpush1.bf16.msra.mxu1 %v6871_v63 }
 0x424   :  { %3805 = vmatprep.subr.bf16.mxu0 %v6876_v0  ;;  %3891 = vmatprep.subr.bf16.mxu1 %v6879_v54 }
 0x427   :  { %3806 = vmatpush1.bf16.msra.mxu0 %v6874_v2  ;;  %3892 = vmatpush1.bf16.msra.mxu1 %v6877_v39 }
 0x428   :  { %3807 = vmatprep.subr.bf16.mxu0 %v6882_v41  ;;  %3893 = vmatprep.subr.bf16.mxu1 %v6885_v56 }
 0x42b   :  { %3808 = vmatpush1.bf16.msra.mxu0 %v6880_v57  ;;  %3894 = vmatpush1.bf16.msra.mxu1 %v6883_v59 }
 0x42c   :  { %3809 = vmatprep.subr.bf16.mxu0 %v6888_v3  ;;  %3895 = vmatprep.subr.bf16.mxu1 %v6891_v4 }
 0x42f   :  { %3810 = vmatpush1.bf16.msra.mxu0 %v6886_v5  ;;  %3896 = vmatpush1.bf16.msra.mxu1 %v6889_v6 }
 0x430   :  { %3811 = vmatprep.subr.bf16.mxu0 %v6894_v7  ;;  %3897 = vmatprep.subr.bf16.mxu1 %v6897_v8 }
 0x433   :  { %3812 = vmatpush1.bf16.msra.mxu0 %v6892_v9  ;;  %3898 = vmatpush1.bf16.msra.mxu1 %v6895_v10 }
 0x434   :  { %3813 = vmatprep.subr.bf16.mxu0 %v6900_v11  ;;  %3899 = vmatprep.subr.bf16.mxu1 %v6903_v12  ;;  %v6934_v12 = vld [vmem:[%s9321_s3 + $0xbc0] ss:$16 sps:$4 sm:$0xff]  }
 0x437   :  { %3814 = vmatpush1.bf16.msra.mxu0 %v6898_v13  ;;  %3900 = vmatpush1.bf16.msra.mxu1 %v6901_v16  ;;  %v6937_v13 = vld [vmem:[%s9321_s3 + $0xbc8] ss:$16 sps:$4 sm:$0xff]   ;;  %v6942_v16 = vld [vmem:[%s9321_s3 + $0xbe4] ss:$16 sps:$4 sm:$0xff]  }
 0x438   :  { %3815 = vmatprep.subr.bf16.mxu0 %v6906_v17  ;;  %3901 = vmatprep.subr.bf16.mxu1 %v6909_v18  ;;  %v6945_v17 = vld [vmem:[%s9321_s3 + $0xbec] ss:$16 sps:$4 sm:$0xff]   ;;  %v6940_v18 = vld [vmem:[%s9321_s3 + $0xbe0] ss:$16 sps:$4 sm:$0xff]  }
 0x43b   :  { %3816 = vmatpush1.bf16.msra.mxu0 %v6904_v19  ;;  %3902 = vmatpush1.bf16.msra.mxu1 %v6907_v20  ;;  %v6943_v19 = vld [vmem:[%s9321_s3 + $0xbe8] ss:$16 sps:$4 sm:$0xff]   ;;  %v6948_v20 = vld [vmem:[%s9321_s3 + $0xc04] ss:$16 sps:$4 sm:$0xff]  }
 0x43c   :  { %3817 = vmatprep.subr.bf16.mxu0 %v6912_v21  ;;  %3903 = vmatprep.subr.bf16.mxu1 %v6915_v22  ;;  %v6951_v21 = vld [vmem:[%s9321_s3 + $0xc0c] ss:$16 sps:$4 sm:$0xff]   ;;  %v6946_v22 = vld [vmem:[%s9321_s3 + $0xc00] ss:$16 sps:$4 sm:$0xff]  }
 0x43f   :  { %3818 = vmatpush1.bf16.msra.mxu0 %v6910_v23  ;;  %3904 = vmatpush1.bf16.msra.mxu1 %v6913_v24  ;;  %v6949_v23 = vld [vmem:[%s9321_s3 + $0xc08] ss:$16 sps:$4 sm:$0xff]   ;;  %v6954_v24 = vld [vmem:[%s9321_s3 + $0xc24] ss:$16 sps:$4 sm:$0xff]  }
 0x440   :  { %3819 = vmatprep.subr.bf16.mxu0 %v6918_v25  ;;  %3905 = vmatprep.subr.bf16.mxu1 %v6921_v26  ;;  %v6957_v25 = vld [vmem:[%s9321_s3 + $0xc2c] ss:$16 sps:$4 sm:$0xff]   ;;  %v6952_v26 = vld [vmem:[%s9321_s3 + $0xc20] ss:$16 sps:$4 sm:$0xff]  }
 0x443   :  { %3820 = vmatpush1.bf16.msra.mxu0 %v6916_v27  ;;  %3906 = vmatpush1.bf16.msra.mxu1 %v6919_v28  ;;  %v6955_v27 = vld [vmem:[%s9321_s3 + $0xc28] ss:$16 sps:$4 sm:$0xff]   ;;  %v6960_v28 = vld [vmem:[%s9321_s3 + $0xc44] ss:$16 sps:$4 sm:$0xff]  }
 0x444   :  { %3821 = vmatprep.subr.bf16.mxu0 %v6924_v29  ;;  %3907 = vmatprep.subr.bf16.mxu1 %v6927_v30  ;;  %v6963_v29 = vld [vmem:[%s9321_s3 + $0xc4c] ss:$16 sps:$4 sm:$0xff]   ;;  %v6958_v30 = vld [vmem:[%s9321_s3 + $0xc40] ss:$16 sps:$4 sm:$0xff]  }
 0x447   :  { %3822 = vmatpush1.bf16.msra.mxu0 %v6922_v31  ;;  %3908 = vmatpush1.bf16.msra.mxu1 %v6925_v32  ;;  %v6961_v31 = vld [vmem:[%s9321_s3 + $0xc48] ss:$16 sps:$4 sm:$0xff]   ;;  %v6966_v32 = vld [vmem:[%s9321_s3 + $0xc64] ss:$16 sps:$4 sm:$0xff]  }
 0x448   :  { %3823 = vmatprep.subr.bf16.mxu0 %v6930_v35  ;;  %3909 = vmatprep.subr.bf16.mxu1 %v6933_v40  ;;  %v6969_v35 = vld [vmem:[%s9321_s3 + $0xc6c] ss:$16 sps:$4 sm:$0xff]   ;;  %v6964_v40 = vld [vmem:[%s9321_s3 + $0xc60] ss:$16 sps:$4 sm:$0xff]  }
 0x44b   :  { %3824 = vmatpush1.bf16.msra.mxu0 %v6928_v42  ;;  %3910 = vmatpush1.bf16.msra.mxu1 %v6931_v43  ;;  %v6967_v42 = vld [vmem:[%s9321_s3 + $0xc68] ss:$16 sps:$4 sm:$0xff]   ;;  %v6972_v43 = vld [vmem:[%s9321_s3 + $0xc84] ss:$16 sps:$4 sm:$0xff]  }
 0x44c   :  { %3836 = vmatprep.subr.bf16.mxu0 %v6936_v44  ;;  %3922 = vmatprep.subr.bf16.mxu1 %v6939_v45  ;;  %v6975_v44 = vld [vmem:[%s9321_s3 + $0xc8c] ss:$16 sps:$4 sm:$0xff]   ;;  %v6970_v45 = vld [vmem:[%s9321_s3 + $0xc80] ss:$16 sps:$4 sm:$0xff]  }
 0x4e1   :  { %v3074_v51 = vpop.f32.mrb[12].mxu0  ;;  %v3117_v52 = vpop.f32.mrb[20].mxu1 }
 0x4e2   :  { %v3148_v36 = vadd.f32 %v3131_v47, %v3074_v51  ;;  %v3150_v53 = vadd.f32 %v3139_v48, %v3117_v52  ;;  %v3076_v55 = vpop.f32.mrb[13].mxu0  ;;  %v3119_v58 = vpop.f32.mrb[21].mxu1  ;;  %v6984_v51 = vld [vmem:[%s9321_s3 + $0xcc4] ss:$16 sps:$4 sm:$0xff]   ;;  %v6987_v52 = vld [vmem:[%s9321_s3 + $0xccc] ss:$16 sps:$4 sm:$0xff]  }
 0x4e3   :  { %v3149_v37 = vadd.f32 %v3135_v49, %v3076_v55  ;;  %v3151_v60 = vadd.f32 %v3143_v50, %v3119_v58  ;;  %v3078_v61 = vpop.f32.mrb[14].mxu0  ;;  %v3121_v62 = vpop.f32.mrb[22].mxu1  ;;  %v3978_v55 = vld [vmem:[%s9325_s4 + $0xc] sm:$0xff] }
 0x4e4   :  { %v3152_v63 = vadd.f32 %v3131_v47, %v3078_v61  ;;  %v3154_v0 = vadd.f32 %v3139_v48, %v3121_v62  ;;  %v3080_v54 = vpop.f32.mrb[15].mxu0  ;;  %v3123_v2 = vpop.f32.mrb[23].mxu1  ;;  %v3156_v56 = vmax.f32 %v3148_v36, 0.0  ;;  %v3158_v57 = vmax.f32 %v3150_v53, 0.0  ;;  %v6978_v47 = vld [vmem:[%s9321_s3 + $0xca4] ss:$16 sps:$4 sm:$0xff]  }
 0x4e5   :  { %v3153_v39 = vadd.f32 %v3135_v49, %v3080_v54  ;;  %v3155_v41 = vadd.f32 %v3143_v50, %v3123_v2  ;;  %v3157_v4 = vmax.f32 %v3149_v37, 0.0  ;;  %v3159_v5 = vmax.f32 %v3151_v60, 0.0  ;;  %v6981_v48 = vld [vmem:[%s9321_s3 + $0xcac] ss:$16 sps:$4 sm:$0xff]   ;;  %v6976_v49 = vld [vmem:[%s9321_s3 + $0xca0] ss:$16 sps:$4 sm:$0xff]  }
 0x4e6   :  { %v3160_v59 = vmax.f32 %v3152_v63, 0.0  ;;  %v3162_v3 = vmax.f32 %v3154_v0, 0.0  ;;  %v6979_v50 = vld [vmem:[%s9321_s3 + $0xca8] ss:$16 sps:$4 sm:$0xff]   ;;  %v3982_v58 = vld [vmem:[%s9325_s4 + $0x2c] sm:$0xff] }
 0x4e7   :  { %v3161_v6 = vmax.f32 %v3153_v39, 0.0  ;;  %v3163_v7 = vmax.f32 %v3155_v41, 0.0  ;;  %v3977_v36 = vld [vmem:[%s9325_s4 + $0x4] sm:$0xff]  ;;  %v6982_v37 = vld [vmem:[%s9321_s3 + $0xcc0] ss:$16 sps:$4 sm:$0xff]   ;;  %v6029_v62 = vcombine.high %v3978_v55, %v3982_v58  ;;  %v6028_v41 = vcombine.low %v3978_v55, %v3982_v58 }
 0x4e8   :  { %v3164_v8 = vpack.c.bf16 %v3160_v59, %v3156_v56  ;;  %v8506_v9 = vpack.c.bf16 %v3162_v3, %v3158_v57  ;;  %v3981_v53 = vld [vmem:[%s9325_s4 + $0x24] sm:$0xff]  ;;  %v3986_v54 = vld [vmem:[%s9325_s4 + $0x4c] sm:$0xff] }
 0x4e9   :  { %v3165_v10 = vpack.c.bf16 %v3161_v6, %v3157_v4  ;;  %v3167_v11 = vpack.c.bf16 %v3163_v7, %v3159_v5  ;;  %v6985_v60 = vld [vmem:[%s9321_s3 + $0xcc8] ss:$16 sps:$4 sm:$0xff]   ;;  %v6027_v61 = vcombine.high %v3977_v36, %v3981_v53  ;;  %v3990_v2 = vld [vmem:[%s9325_s4 + $0x6c] sm:$0xff]  ;;  %v6026_v39 = vcombine.low %v3977_v36, %v3981_v53 }
 0x4ea   :  { %v3985_v63 = vld [vmem:[%s9325_s4 + $0x44] sm:$0xff]  ;;  %v6036_v57 = vcombine.high %v3986_v54, %v3990_v2  ;;  %v3994_v4 = vld [vmem:[%s9325_s4 + $0x8c] sm:$0xff]  ;;  %v6035_v7 = vcombine.low %v3986_v54, %v3990_v2 }
 0x4eb   :  { %3825 = vmatprep.mubr.bf16.mxu0 %v3165_v10  ;;  %3911 = vmatprep.mubr.bf16.mxu1 %v3165_v10  ;;  %v3989_v0 = vld [vmem:[%s9325_s4 + $0x64] sm:$0xff]  ;;  %v3998_v5 = vld [vmem:[%s9325_s4 + $0xac] sm:$0xff] }
 0x4ec   :  { %3826 = vmatmul.mubr.bf16.vlgmr.msra.gmra.mrb[16].mxu0 %v3164_v8  ;;  %3912 = vmatmul.mubr.bf16.vlgmr.msra.gmra.mrb[24].mxu1 %v3164_v8  ;;  %v6034_v56 = vcombine.high %v3985_v63, %v3989_v0  ;;  %v3993_v59 = vld [vmem:[%s9325_s4 + $0x84] sm:$0xff]  ;;  %v6033_v6 = vcombine.low %v3985_v63, %v3989_v0  ;;  %v6043_v10 = vcombine.high %v3994_v4, %v3998_v5  ;;  %v4034_v36 = vld [vmem:[%s9325_s4 + $0x1cc] sm:$0xff] }
 0x4ed   :  { %3837 = vmatpush1.bf16.msra.mxu0 %v6934_v12  ;;  %3923 = vmatpush1.bf16.msra.mxu1 %v6937_v13  ;;  %v3997_v3 = vld [vmem:[%s9325_s4 + $0xa4] sm:$0xff]  ;;  %v4006_v13 = vld [vmem:[%s9325_s4 + $0xec] sm:$0xff] }
 0x4ee   :  { %6024 = vmatprep.mubr.msk.bf16.mxu0 %vm261_vm0, %v3167_v11  ;;  %6025 = vmatprep.mubr.msk.bf16.mxu1 %vm261_vm0, %v3167_v11  ;;  %v6041_v8 = vcombine.high %v3993_v59, %v3997_v3  ;;  %v4001_v11 = vld [vmem:[%s9325_s4 + $0xc4] sm:$0xff]  ;;  %v4038_v53 = vld [vmem:[%s9325_s4 + $0x1ec] sm:$0xff] }
 0x4ef   :  { %3838 = vmatprep.subr.bf16.mxu0 %v6942_v16  ;;  %3924 = vmatprep.subr.bf16.mxu1 %v6945_v17  ;;  %v4005_v12 = vld [vmem:[%s9325_s4 + $0xe4] sm:$0xff]  ;;  %v6040_v16 = vcombine.low %v3993_v59, %v3997_v3  ;;  %v6042_v17 = vcombine.low %v3994_v4, %v3998_v5  ;;  %v4042_v63 = vld [vmem:[%s9325_s4 + $0x20c] sm:$0xff]  ;;  %v6077_v2 = vcombine.low %v4034_v36, %v4038_v53 }
 0x4f0   :  { %v4046_v0 = vld [vmem:[%s9325_s4 + $0x22c] sm:$0xff] }
 0x4f1   :  { %3839 = vmatpush1.bf16.msra.mxu0 %v6940_v18  ;;  %3925 = vmatpush1.bf16.msra.mxu1 %v6943_v19  ;;  %v6048_v18 = vcombine.high %v4001_v11, %v4005_v12  ;;  %v4050_v59 = vld [vmem:[%s9325_s4 + $0x24c] sm:$0xff]  ;;  %v6084_v5 = vcombine.low %v4042_v63, %v4046_v0 }
 0x4f2   :  { %3840 = vmatprep.subr.bf16.mxu0 %v6948_v20  ;;  %3926 = vmatprep.subr.bf16.mxu1 %v6951_v21  ;;  %v4009_v20 = vld [vmem:[%s9325_s4 + $0x104] sm:$0xff]  ;;  %v4054_v3 = vld [vmem:[%s9325_s4 + $0x26c] sm:$0xff] }
 0x4f3   :  { %v4013_v21 = vld [vmem:[%s9325_s4 + $0x124] sm:$0xff] }
 0x4f5   :  { %3841 = vmatpush1.bf16.msra.mxu0 %v6946_v22  ;;  %3927 = vmatpush1.bf16.msra.mxu1 %v6949_v23  ;;  %v4010_v22 = vld [vmem:[%s9325_s4 + $0x10c] sm:$0xff] }
 0x4f6   :  { %3842 = vmatprep.subr.bf16.mxu0 %v6954_v24  ;;  %3928 = vmatprep.subr.bf16.mxu1 %v6957_v25  ;;  %v4014_v23 = vld [vmem:[%s9325_s4 + $0x12c] sm:$0xff]  ;;  %v6047_v24 = vcombine.low %v4001_v11, %v4005_v12 }
 0x4f7   :  { %v4058_v11 = vld [vmem:[%s9325_s4 + $0x28c] sm:$0xff] }
 0x4f8   :  { %v4062_v12 = vld [vmem:[%s9325_s4 + $0x2ac] sm:$0xff] }
 0x4f9   :  { %3843 = vmatpush1.bf16.msra.mxu0 %v6952_v26  ;;  %3929 = vmatpush1.bf16.msra.mxu1 %v6955_v27  ;;  %v6055_v26 = vcombine.high %v4009_v20, %v4013_v21  ;;  %v6057_v27 = vcombine.high %v4010_v22, %v4014_v23 }
 0x4fa   :  { %3844 = vmatprep.subr.bf16.mxu0 %v6960_v28  ;;  %3930 = vmatprep.subr.bf16.mxu1 %v6963_v29  ;;  %v4017_v28 = vld [vmem:[%s9325_s4 + $0x144] sm:$0xff] }
 0x4fb   :  { %v4021_v29 = vld [vmem:[%s9325_s4 + $0x164] sm:$0xff] }
 0x4fd   :  { %3845 = vmatpush1.bf16.msra.mxu0 %v6958_v30  ;;  %3931 = vmatpush1.bf16.msra.mxu1 %v6961_v31  ;;  %v4018_v30 = vld [vmem:[%s9325_s4 + $0x14c] sm:$0xff] }
 0x4fe   :  { %3846 = vmatprep.subr.bf16.mxu0 %v6966_v32  ;;  %3932 = vmatprep.subr.bf16.mxu1 %v6969_v35  ;;  %v4022_v31 = vld [vmem:[%s9325_s4 + $0x16c] sm:$0xff]  ;;  %v6054_v32 = vcombine.low %v4009_v20, %v4013_v21  ;;  %v6056_v35 = vcombine.low %v4010_v22, %v4014_v23  ;;  %v6098_v23 = vcombine.low %v4058_v11, %v4062_v12 }
 0x4ff   :  { %v4066_v20 = vld [vmem:[%s9325_s4 + $0x2cc] sm:$0xff] }
 0x500   :  { %v4070_v21 = vld [vmem:[%s9325_s4 + $0x2ec] sm:$0xff] }
 0x501   :  { %3847 = vmatpush1.bf16.msra.mxu0 %v6964_v40  ;;  %3933 = vmatpush1.bf16.msra.mxu1 %v6967_v42  ;;  %v6062_v40 = vcombine.high %v4017_v28, %v4021_v29  ;;  %v6064_v42 = vcombine.high %v4018_v30, %v4022_v31 }
 0x502   :  { %3848 = vmatprep.subr.bf16.mxu0 %v6972_v43  ;;  %3934 = vmatprep.subr.bf16.mxu1 %v6975_v44  ;;  %v4025_v43 = vld [vmem:[%s9325_s4 + $0x184] sm:$0xff] }
 0x503   :  { %v4029_v44 = vld [vmem:[%s9325_s4 + $0x1a4] sm:$0xff] }
 0x504   :  { %v6068_v55 = vcombine.low %v4025_v43, %v4029_v44 }
 0x505   :  { %3849 = vmatpush1.bf16.msra.mxu0 %v6970_v45  ;;  %3935 = vmatpush1.bf16.msra.mxu1 %v6973_v46  ;;  %v4026_v45 = vld [vmem:[%s9325_s4 + $0x18c] sm:$0xff] }
 0x506   :  { %3850 = vmatprep.subr.bf16.mxu0 %v6978_v47  ;;  %3936 = vmatprep.subr.bf16.mxu1 %v6981_v48  ;;  %v4030_v46 = vld [vmem:[%s9325_s4 + $0x1ac] sm:$0xff]  ;;  %v6061_v47 = vcombine.low %v4017_v28, %v4021_v29  ;;  %v6063_v48 = vcombine.low %v4018_v30, %v4022_v31  ;;  %v6105_v31 = vcombine.low %v4066_v20, %v4070_v21 }
 0x507   :  { %v6070_v58 = vcombine.low %v4026_v45, %v4030_v46  ;;  %v4074_v28 = vld [vmem:[%s9325_s4 + $0x30c] sm:$0xff] }
 0x508   :  { %v4078_v29 = vld [vmem:[%s9325_s4 + $0x32c] sm:$0xff] }
 0x509   :  { %3851 = vmatpush1.bf16.msra.mxu0 %v6976_v49  ;;  %3937 = vmatpush1.bf16.msra.mxu1 %v6979_v50  ;;  %v6069_v49 = vcombine.high %v4025_v43, %v4029_v44  ;;  %v6071_v50 = vcombine.high %v4026_v45, %v4030_v46  ;;  %v4082_v43 = vld [vmem:[%s9325_s4 + $0x34c] sm:$0xff]  ;;  %v6112_v46 = vcombine.low %v4074_v28, %v4078_v29 }
 0x50a   :  { %3852 = vmatprep.subr.bf16.mxu0 %v6984_v51  ;;  %3938 = vmatprep.subr.bf16.mxu1 %v6987_v52  ;;  %v4033_v51 = vld [vmem:[%s9325_s4 + $0x1c4] sm:$0xff]  ;;  %v4086_v44 = vld [vmem:[%s9325_s4 + $0x36c] sm:$0xff] }
 0x50b   :  { %v4037_v52 = vld [vmem:[%s9325_s4 + $0x1e4] sm:$0xff] }
 0x50c   :  { %v6075_v54 = vcombine.low %v4033_v51, %v4037_v52 }
 0x50d   :  { %3853 = vmatpush1.bf16.msra.mxu0 %v6982_v37  ;;  %3939 = vmatpush1.bf16.msra.mxu1 %v6985_v60  ;;  %v6076_v37 = vcombine.high %v4033_v51, %v4037_v52  ;;  %v6078_v60 = vcombine.high %v4034_v36, %v4038_v53  ;;  %v4089_v51 = vld [vmem:[%s9325_s4 + $0x384] sm:$0xff]  ;;  %v4090_v36 = vld [vmem:[%s9325_s4 + $0x38c] sm:$0xff] }
 0x50e   :  { %5117 = vmatprep.subr.bf16.mxu0 %v6027_v61  ;;  %5203 = vmatprep.subr.bf16.mxu1 %v6029_v62  ;;  %v4041_v61 = vld [vmem:[%s9325_s4 + $0x204] sm:$0xff] }
 0x50f   :  { %v4045_v62 = vld [vmem:[%s9325_s4 + $0x224] sm:$0xff] }
 0x510   :  { %3869 = vmatmul.mubr.bf16.vlgmr.msra.gmra.mrb[16].mxu0 %v8506_v9  ;;  %3955 = vmatmul.mubr.bf16.vlgmr.msra.gmra.mrb[24].mxu1 %v8506_v9  ;;  %v4002_v9 = vld [vmem:[%s9325_s4 + $0xcc] sm:$0xff]  ;;  %v6082_v4 = vcombine.low %v4041_v61, %v4045_v62  ;;  %v4093_v52 = vld [vmem:[%s9325_s4 + $0x3a4] sm:$0xff] }
 0x511   :  { %5118 = vmatpush1.bf16.msra.mxu0 %v6026_v39  ;;  %5204 = vmatpush1.bf16.msra.mxu1 %v6028_v41  ;;  %v6050_v19 = vcombine.high %v4002_v9, %v4006_v13  ;;  %v6049_v25 = vcombine.low %v4002_v9, %v4006_v13  ;;  %v6083_v39 = vcombine.high %v4041_v61, %v4045_v62  ;;  %v4097_v61 = vld [vmem:[%s9325_s4 + $0x3c4] sm:$0xff] }
 0x512   :  { %5119 = vmatprep.subr.bf16.mxu0 %v6034_v56  ;;  %5205 = vmatprep.subr.bf16.mxu1 %v6036_v57  ;;  %v6085_v41 = vcombine.high %v4042_v63, %v4046_v0  ;;  %v4049_v56 = vld [vmem:[%s9325_s4 + $0x244] sm:$0xff]  ;;  %v6091_v13 = vcombine.low %v4050_v59, %v4054_v3  ;;  %v6125_v53 = vcombine.high %v4089_v51, %v4093_v52  ;;  %v4098_v63 = vld [vmem:[%s9325_s4 + $0x3cc] sm:$0xff] }
 0x513   :  { %v4053_v57 = vld [vmem:[%s9325_s4 + $0x264] sm:$0xff] }
 0x514   :  { %v6089_v9 = vcombine.low %v4049_v56, %v4053_v57  ;;  %v4101_v62 = vld [vmem:[%s9325_s4 + $0x3e4] sm:$0xff] }
 0x515   :  { %5120 = vmatpush1.bf16.msra.mxu0 %v6033_v6  ;;  %5206 = vmatpush1.bf16.msra.mxu1 %v6035_v7  ;;  %v6090_v6 = vcombine.high %v4049_v56, %v4053_v57  ;;  %v6092_v7 = vcombine.high %v4050_v59, %v4054_v3  ;;  %v6132_v0 = vcombine.high %v4097_v61, %v4101_v62  ;;  %v4105_v56 = vld [vmem:[%s9325_s4 + $0x404] sm:$0xff]  ;;  %v4106_v59 = vld [vmem:[%s9325_s4 + $0x40c] sm:$0xff] }
 0x516   :  { %5121 = vmatprep.subr.bf16.mxu0 %v6041_v8  ;;  %5207 = vmatprep.subr.bf16.mxu1 %v6043_v10  ;;  %v4057_v8 = vld [vmem:[%s9325_s4 + $0x284] sm:$0xff] }
 0x517   :  { %v4061_v10 = vld [vmem:[%s9325_s4 + $0x2a4] sm:$0xff] }
 0x518   :  { %v6096_v22 = vcombine.low %v4057_v8, %v4061_v10  ;;  %v4109_v57 = vld [vmem:[%s9325_s4 + $0x424] sm:$0xff] }
 0x519   :  { %5122 = vmatpush1.bf16.msra.mxu0 %v6040_v16  ;;  %5208 = vmatpush1.bf16.msra.mxu1 %v6042_v17  ;;  %v6097_v16 = vcombine.high %v4057_v8, %v4061_v10  ;;  %v6099_v17 = vcombine.high %v4058_v11, %v4062_v12  ;;  %v6139_v3 = vcombine.high %v4105_v56, %v4109_v57  ;;  %v3268_v8 = vld [vmem:[%s9324_s5 + $0xc] sm:$0xf] }
 0x51a   :  { %5123 = vmatprep.subr.bf16.mxu0 %v6048_v18  ;;  %5209 = vmatprep.subr.bf16.mxu1 %v6050_v19  ;;  %v4065_v18 = vld [vmem:[%s9325_s4 + $0x2c4] sm:$0xff]  ;;  %v3273_v10 = vrot.slane %v3268_v8, %v7944_v34  ;;  %v3281_v11 = vrot.slane %v3268_v8, %v8015_v14  ;;  %v3277_v12 = vrot.slane %v3268_v8, %v7952_v38 }
 0x51b   :  { %v4069_v19 = vld [vmem:[%s9325_s4 + $0x2e4] sm:$0xff] }
 0x51c   :  { %v6103_v30 = vcombine.low %v4065_v18, %v4069_v19 }
 0x51d   :  { %5124 = vmatpush1.bf16.msra.mxu0 %v6047_v24  ;;  %5210 = vmatpush1.bf16.msra.mxu1 %v6049_v25  ;;  %v6104_v24 = vcombine.high %v4065_v18, %v4069_v19  ;;  %v6106_v25 = vcombine.high %v4066_v20, %v4070_v21 }
 0x51e   :  { %5125 = vmatprep.subr.bf16.mxu0 %v6055_v26  ;;  %5211 = vmatprep.subr.bf16.mxu1 %v6057_v27  ;;  %v4073_v26 = vld [vmem:[%s9325_s4 + $0x304] sm:$0xff] }
 0x51f   :  { %v4077_v27 = vld [vmem:[%s9325_s4 + $0x324] sm:$0xff] }
 0x520   :  { %v6110_v45 = vcombine.low %v4073_v26, %v4077_v27 }
 0x521   :  { %5126 = vmatpush1.bf16.msra.mxu0 %v6054_v32  ;;  %5212 = vmatpush1.bf16.msra.mxu1 %v6056_v35  ;;  %v6111_v32 = vcombine.high %v4073_v26, %v4077_v27  ;;  %v6113_v35 = vcombine.high %v4074_v28, %v4078_v29 }
 0x522   :  { %5127 = vmatprep.subr.bf16.mxu0 %v6062_v40  ;;  %5213 = vmatprep.subr.bf16.mxu1 %v6064_v42  ;;  %v4081_v40 = vld [vmem:[%s9325_s4 + $0x344] sm:$0xff] }
 0x523   :  { %v4085_v42 = vld [vmem:[%s9325_s4 + $0x364] sm:$0xff] }
 0x525   :  { %5128 = vmatpush1.bf16.msra.mxu0 %v6061_v47  ;;  %5214 = vmatpush1.bf16.msra.mxu1 %v6063_v48  ;;  %v6118_v47 = vcombine.high %v4081_v40, %v4085_v42  ;;  %v6120_v48 = vcombine.high %v4082_v43, %v4086_v44 }
 0x526   :  { %5129 = vmatprep.subr.bf16.mxu0 %v6069_v49  ;;  %5215 = vmatprep.subr.bf16.mxu1 %v6071_v50  ;;  %v6117_v49 = vcombine.low %v4081_v40, %v4085_v42  ;;  %v6119_v50 = vcombine.low %v4082_v43, %v4086_v44 }
 0x529   :  { %5130 = vmatpush1.bf16.msra.mxu0 %v6068_v55  ;;  %5216 = vmatpush1.bf16.msra.mxu1 %v6070_v58  ;;  %v4094_v55 = vld [vmem:[%s9325_s4 + $0x3ac] sm:$0xff]  ;;  %v6124_v58 = vcombine.low %v4089_v51, %v4093_v52 }
 0x52a   :  { %5131 = vmatprep.subr.bf16.mxu0 %v6076_v37  ;;  %5217 = vmatprep.subr.bf16.mxu1 %v6078_v60  ;;  %v6126_v37 = vcombine.low %v4090_v36, %v4094_v55  ;;  %v6127_v60 = vcombine.high %v4090_v36, %v4094_v55  ;;  %v4118_v51 = vld [vmem:[%s9325_s4 + $0x46c] sm:$0xff] }
 0x52d   :  { %5132 = vmatpush1.bf16.msra.mxu0 %v6075_v54  ;;  %5218 = vmatpush1.bf16.msra.mxu1 %v6077_v2  ;;  %v4102_v54 = vld [vmem:[%s9325_s4 + $0x3ec] sm:$0xff]  ;;  %v6131_v2 = vcombine.low %v4097_v61, %v4101_v62 }
 0x52e   :  { %5133 = vmatprep.subr.bf16.mxu0 %v6083_v39  ;;  %5219 = vmatprep.subr.bf16.mxu1 %v6085_v41  ;;  %v6133_v39 = vcombine.low %v4098_v63, %v4102_v54  ;;  %v6134_v41 = vcombine.high %v4098_v63, %v4102_v54  ;;  %v4126_v61 = vld [vmem:[%s9325_s4 + $0x4ac] sm:$0xff] }
 0x531   :  { %5134 = vmatpush1.bf16.msra.mxu0 %v6082_v4  ;;  %5220 = vmatpush1.bf16.msra.mxu1 %v6084_v5  ;;  %v4110_v4 = vld [vmem:[%s9325_s4 + $0x42c] sm:$0xff]  ;;  %v6138_v5 = vcombine.low %v4105_v56, %v4109_v57 }
 0x532   :  { %5135 = vmatprep.subr.bf16.mxu0 %v6090_v6  ;;  %5221 = vmatprep.subr.bf16.mxu1 %v6092_v7  ;;  %v6140_v6 = vcombine.low %v4106_v59, %v4110_v4  ;;  %v6141_v7 = vcombine.high %v4106_v59, %v4110_v4  ;;  %v4134_v56 = vld [vmem:[%s9325_s4 + $0x4ec] sm:$0xff] }
 0x535   :  { %5136 = vmatpush1.bf16.msra.mxu0 %v6089_v9  ;;  %5222 = vmatpush1.bf16.msra.mxu1 %v6091_v13  ;;  %v3285_v9 = vrot.slane %v3268_v8, %v8018_v15  ;;  %v4142_v8 = vld [vmem:[%s9325_s4 + $0x52c] sm:$0xff] }
 0x536   :  { %5137 = vmatprep.subr.bf16.mxu0 %v6097_v16  ;;  %5223 = vmatprep.subr.bf16.mxu1 %v6099_v17 }
 0x539   :  { %5138 = vmatpush1.bf16.msra.mxu0 %v6096_v22  ;;  %5224 = vmatpush1.bf16.msra.mxu1 %v6098_v23 }
 0x53a   :  { %5139 = vmatprep.subr.bf16.mxu0 %v6104_v24  ;;  %5225 = vmatprep.subr.bf16.mxu1 %v6106_v25 }
 0x53d   :  { %5140 = vmatpush1.bf16.msra.mxu0 %v6103_v30  ;;  %5226 = vmatpush1.bf16.msra.mxu1 %v6105_v31 }
 0x53e   :  { %5141 = vmatprep.subr.bf16.mxu0 %v6111_v32  ;;  %5227 = vmatprep.subr.bf16.mxu1 %v6113_v35 }
 0x541   :  { %5142 = vmatpush1.bf16.msra.mxu0 %v6110_v45  ;;  %5228 = vmatpush1.bf16.msra.mxu1 %v6112_v46  ;;  %v4113_v46 = vld [vmem:[%s9325_s4 + $0x444] sm:$0xff] }
 0x542   :  { %5143 = vmatprep.subr.bf16.mxu0 %v6118_v47  ;;  %5229 = vmatprep.subr.bf16.mxu1 %v6120_v48 }
 0x545   :  { %5144 = vmatpush1.bf16.msra.mxu0 %v6117_v49  ;;  %5230 = vmatpush1.bf16.msra.mxu1 %v6119_v50  ;;  %v4117_v49 = vld [vmem:[%s9325_s4 + $0x464] sm:$0xff]  ;;  %v4114_v50 = vld [vmem:[%s9325_s4 + $0x44c] sm:$0xff] }
 0x546   :  { %5145 = vmatprep.subr.bf16.mxu0 %v6125_v53  ;;  %5231 = vmatprep.subr.bf16.mxu1 %v6127_v60  ;;  %v4121_v53 = vld [vmem:[%s9325_s4 + $0x484] sm:$0xff]  ;;  %v6146_v55 = vcombine.high %v4113_v46, %v4117_v49  ;;  %v4122_v60 = vld [vmem:[%s9325_s4 + $0x48c] sm:$0xff]  ;;  %v6145_v62 = vcombine.low %v4113_v46, %v4117_v49  ;;  %v6147_v63 = vcombine.low %v4114_v50, %v4118_v51 }
 0x547   :  { %v6155_v54 = vcombine.high %v4122_v60, %v4126_v61  ;;  %v6154_v59 = vcombine.low %v4122_v60, %v4126_v61  ;;  %v4169_v46 = vld [vmem:[%s9325_s4 + $0x604] sm:$0xff]  ;;  %v3979_v60 = vld [vmem:[%s9325_s4 + $0x14] sm:$0xff] }
 0x548   :  { %v4173_v49 = vld [vmem:[%s9325_s4 + $0x624] sm:$0xff]  ;;  %v3983_v61 = vld [vmem:[%s9325_s4 + $0x34] sm:$0xff] }
 0x549   :  { %5146 = vmatpush1.bf16.msra.mxu0 %v6124_v58  ;;  %5232 = vmatpush1.bf16.msra.mxu1 %v6126_v37  ;;  %v6148_v58 = vcombine.high %v4114_v50, %v4118_v51  ;;  %v4125_v37 = vld [vmem:[%s9325_s4 + $0x4a4] sm:$0xff]  ;;  %v4170_v50 = vld [vmem:[%s9325_s4 + $0x60c] sm:$0xff] }
 0x54a   :  { %5147 = vmatprep.subr.bf16.mxu0 %v6132_v0  ;;  %5233 = vmatprep.subr.bf16.mxu1 %v6134_v41  ;;  %v6153_v0 = vcombine.high %v4121_v53, %v4125_v37  ;;  %v4130_v41 = vld [vmem:[%s9325_s4 + $0x4cc] sm:$0xff]  ;;  %v6152_v57 = vcombine.low %v4121_v53, %v4125_v37 }
 0x54b   :  { %v6162_v4 = vcombine.high %v4130_v41, %v4134_v56  ;;  %v4174_v51 = vld [vmem:[%s9325_s4 + $0x62c] sm:$0xff] }
 0x54c   :  { %v6197_v37 = vcombine.high %v4170_v50, %v4174_v51 }
 0x54d   :  { %5148 = vmatpush1.bf16.msra.mxu0 %v6131_v2  ;;  %5234 = vmatpush1.bf16.msra.mxu1 %v6133_v39  ;;  %v4129_v2 = vld [vmem:[%s9325_s4 + $0x4c4] sm:$0xff] }
 0x54e   :  { %5160 = vmatprep.subr.bf16.mxu0 %v6139_v3  ;;  %5246 = vmatprep.subr.bf16.mxu1 %v6141_v7  ;;  %v4133_v39 = vld [vmem:[%s9325_s4 + $0x4e4] sm:$0xff]  ;;  %v4138_v7 = vld [vmem:[%s9325_s4 + $0x50c] sm:$0xff] }
 0x54f   :  { %v6160_v3 = vcombine.high %v4129_v2, %v4133_v39 }
 0x5e3   :  { %v3870_v13 = vpop.f32.mrb[16].mxu0  ;;  %v3956_v16 = vpop.f32.mrb[24].mxu1 }
 0x5e4   :  { %v6279_v17 = vadd.f32 %v3870_v13, %v3273_v10  ;;  %v6283_v18 = vadd.f32 %v3956_v16, %v3281_v11  ;;  %v3872_v19 = vpop.f32.mrb[17].mxu0  ;;  %v3958_v20 = vpop.f32.mrb[25].mxu1  ;;  %v4145_v13 = vld [vmem:[%s9325_s4 + $0x544] sm:$0xff] }
 0x5e5   :  { %v6280_v21 = vadd.f32 %v3872_v19, %v3277_v12  ;;  %v6284_v22 = vadd.f32 %v3958_v20, %v3285_v9  ;;  %v3874_v23 = vpop.f32.mrb[18].mxu0  ;;  %v3960_v24 = vpop.f32.mrb[26].mxu1  ;;  %v4149_v16 = vld [vmem:[%s9325_s4 + $0x564] sm:$0xff]  ;;  %v6168_v20 = vcombine.low %v4138_v7, %v4142_v8 }
 0x5e6   :  { %v6281_v25 = vadd.f32 %v3874_v23, %v3273_v10  ;;  %v6285_v26 = vadd.f32 %v3960_v24, %v3281_v11  ;;  %v3876_v27 = vpop.f32.mrb[19].mxu0  ;;  %v3962_v28 = vpop.f32.mrb[27].mxu1  ;;  %v3965_v31 = vmax.f32 %v6279_v17, 0.0  ;;  %v3967_v32 = vmax.f32 %v6283_v18, 0.0  ;;  %v4146_v17 = vld [vmem:[%s9325_s4 + $0x54c] sm:$0xff]  ;;  %v4153_v23 = vld [vmem:[%s9325_s4 + $0x584] sm:$0xff] }
 0x5e7   :  { %v6282_v29 = vadd.f32 %v3876_v27, %v3277_v12  ;;  %v6286_v30 = vadd.f32 %v3962_v28, %v3285_v9  ;;  %v3966_v42 = vmax.f32 %v6280_v21, 0.0  ;;  %v3968_v43 = vmax.f32 %v6284_v22, 0.0  ;;  %v4150_v18 = vld [vmem:[%s9325_s4 + $0x56c] sm:$0xff]  ;;  %v4157_v24 = vld [vmem:[%s9325_s4 + $0x5a4] sm:$0xff] }
 0x5e8   :  { %v3969_v35 = vmax.f32 %v6281_v25, 0.0  ;;  %v3971_v40 = vmax.f32 %v6285_v26, 0.0  ;;  %v6159_v10 = vcombine.low %v4129_v2, %v4133_v39  ;;  %v6161_v11 = vcombine.low %v4130_v41, %v4134_v56  ;;  %v4154_v25 = vld [vmem:[%s9325_s4 + $0x58c] sm:$0xff]  ;;  %v3980_v41 = vld [vmem:[%s9325_s4 + $0x1c] sm:$0xf] }
 0x5e9   :  { %v3970_v44 = vmax.f32 %v6282_v29, 0.0  ;;  %v3972_v45 = vmax.f32 %v6286_v30, 0.0  ;;  %v6169_v9 = vcombine.high %v4138_v7, %v4142_v8  ;;  %v6174_v21 = vcombine.high %v4145_v13, %v4149_v16  ;;  %v4158_v26 = vld [vmem:[%s9325_s4 + $0x5ac] sm:$0xff]  ;;  %v3984_v56 = vld [vmem:[%s9325_s4 + $0x3c] sm:$0xf] }
 0x5ea   :  { %v8828_v47 = vpack.c.bf16 %v3969_v35, %v3965_v31  ;;  %v8830_v48 = vpack.c.bf16 %v3971_v40, %v3967_v32  ;;  %v6176_v22 = vcombine.high %v4146_v17, %v4150_v18  ;;  %v6173_v27 = vcombine.low %v4145_v13, %v4149_v16  ;;  %v4161_v31 = vld [vmem:[%s9325_s4 + $0x5c4] sm:$0xff]  ;;  %v4162_v35 = vld [vmem:[%s9325_s4 + $0x5cc] sm:$0xff]  ;;  %v3988_v7 = vld [vmem:[%s9325_s4 + $0x5c] sm:$0xf] }
 0x5eb   :  { %v8841_v52 = vpack.c.bf16 %v3970_v44, %v3966_v42  ;;  %v8843_v36 = vpack.c.bf16 %v3972_v45, %v3968_v43  ;;  %v6175_v28 = vcombine.low %v4146_v17, %v4150_v18  ;;  %v6181_v29 = vcombine.high %v4153_v23, %v4157_v24  ;;  %v4165_v32 = vld [vmem:[%s9325_s4 + $0x5e4] sm:$0xff]  ;;  %v4166_v40 = vld [vmem:[%s9325_s4 + $0x5ec] sm:$0xff]  ;;  %v4060_v13 = vld [vmem:[%s9325_s4 + $0x29c] sm:$0xf] }
 0x5ec   :  { %v6183_v30 = vcombine.high %v4154_v25, %v4158_v26  ;;  %v6180_v42 = vcombine.low %v4153_v23, %v4157_v24  ;;  %v6182_v43 = vcombine.low %v4154_v25, %v4158_v26  ;;  %v6188_v44 = vcombine.high %v4161_v31, %v4165_v32  ;;  %v4064_v16 = vld [vmem:[%s9325_s4 + $0x2bc] sm:$0xf]  ;;  %v4003_v23 = vld [vmem:[%s9325_s4 + $0xd4] sm:$0xff] }
 0x5ed   :  { %5149 = vmatprep.mubr.bf16.mxu0 %v8841_v52  ;;  %5235 = vmatprep.mubr.bf16.mxu1 %v8841_v52  ;;  %v6190_v45 = vcombine.high %v4162_v35, %v4166_v40  ;;  %v6187_v53 = vcombine.low %v4161_v31, %v4165_v32  ;;  %v6031_v2 = vcombine.high %v3979_v60, %v3983_v61  ;;  %v4068_v24 = vld [vmem:[%s9325_s4 + $0x2dc] sm:$0xf]  ;;  %v4011_v32 = vld [vmem:[%s9325_s4 + $0x114] sm:$0xff] }
 0x5ee   :  { %5150 = vmatmul.mubr.bf16.vlgmr.msra.gmra.mrb[20].mxu0 %v8828_v47  ;;  %5236 = vmatmul.mubr.bf16.vlgmr.msra.gmra.mrb[28].mxu1 %v8828_v47  ;;  %v4072_v25 = vld [vmem:[%s9325_s4 + $0x2fc] sm:$0xf] }
 0x5ef   :  { %5161 = vmatpush1.bf16.msra.mxu0 %v6138_v5  ;;  %5247 = vmatpush1.bf16.msra.mxu1 %v6140_v6  ;;  %v4137_v5 = vld [vmem:[%s9325_s4 + $0x504] sm:$0xff]  ;;  %v4008_v31 = vld [vmem:[%s9325_s4 + $0xfc] sm:$0xf] }
 0x5f0   :  { %6201 = vmatprep.mubr.msk.bf16.mxu0 %vm261_vm0, %v8843_v36  ;;  %6202 = vmatprep.mubr.msk.bf16.mxu1 %vm261_vm0, %v8843_v36  ;;  %v4141_v6 = vld [vmem:[%s9325_s4 + $0x524] sm:$0xff] }
 0x5f1   :  { %5162 = vmatprep.subr.bf16.mxu0 %v6146_v55  ;;  %5248 = vmatprep.subr.bf16.mxu1 %v6148_v58  ;;  %v6167_v12 = vcombine.high %v4137_v5, %v4141_v6  ;;  %v6166_v19 = vcombine.low %v4137_v5, %v4141_v6  ;;  %v6189_v55 = vcombine.low %v4162_v35, %v4166_v40  ;;  %v4015_v35 = vld [vmem:[%s9325_s4 + $0x134] sm:$0xff]  ;;  %v4076_v40 = vld [vmem:[%s9325_s4 + $0x31c] sm:$0xf] }
 0x5f2   :  { %v6195_v58 = vcombine.high %v4169_v46, %v4173_v49  ;;  %v6030_v5 = vcombine.low %v3979_v60, %v3983_v61  ;;  %v6032_v6 = vcombine.low %v3980_v41, %v3984_v56  ;;  %v4096_v41 = vld [vmem:[%s9325_s4 + $0x3bc] sm:$0xf] }
 0x5f3   :  { %5163 = vmatpush1.bf16.msra.mxu0 %v6145_v62  ;;  %5249 = vmatpush1.bf16.msra.mxu1 %v6147_v63  ;;  %v4044_v62 = vld [vmem:[%s9325_s4 + $0x21c] sm:$0xf] }
 0x5f4   :  { %5164 = vmatprep.subr.bf16.mxu0 %v6153_v0  ;;  %5250 = vmatprep.subr.bf16.mxu1 %v6155_v54  ;;  %v4048_v63 = vld [vmem:[%s9325_s4 + $0x23c] sm:$0xf]  ;;  %v6194_v0 = vcombine.low %v4169_v46, %v4173_v49  ;;  %v6196_v54 = vcombine.low %v4170_v50, %v4174_v51  ;;  %v4019_v51 = vld [vmem:[%s9325_s4 + $0x154] sm:$0xff] }
 0x5f5   :  { %v6088_v39 = vcombine.low %v4044_v62, %v4048_v63  ;;  %v4012_v46 = vld [vmem:[%s9325_s4 + $0x11c] sm:$0xf] }
 0x5f6   :  { %v4016_v50 = vld [vmem:[%s9325_s4 + $0x13c] sm:$0xf] }
 0x5f7   :  { %5165 = vmatpush1.bf16.msra.mxu0 %v6152_v57  ;;  %5251 = vmatpush1.bf16.msra.mxu1 %v6154_v59  ;;  %v3987_v57 = vld [vmem:[%s9325_s4 + $0x54] sm:$0xff]  ;;  %v6060_v60 = vcombine.low %v4012_v46, %v4016_v50  ;;  %v4020_v62 = vld [vmem:[%s9325_s4 + $0x15c] sm:$0xf] }
 0x5f8   :  { %5166 = vmatprep.subr.bf16.mxu0 %v6160_v3  ;;  %5252 = vmatprep.subr.bf16.mxu1 %v6162_v4  ;;  %v3991_v59 = vld [vmem:[%s9325_s4 + $0x74] sm:$0xff]  ;;  %v4052_v3 = vld [vmem:[%s9325_s4 + $0x25c] sm:$0xf] }
 0x5f9   :  { %v4056_v4 = vld [vmem:[%s9325_s4 + $0x27c] sm:$0xf]  ;;  %v6038_v8 = vcombine.high %v3987_v57, %v3991_v59  ;;  %v6037_v17 = vcombine.low %v3987_v57, %v3991_v59  ;;  %v4071_v46 = vld [vmem:[%s9325_s4 + $0x2f4] sm:$0xff] }
 0x5fb   :  { %5167 = vmatpush1.bf16.msra.mxu0 %v6159_v10  ;;  %5253 = vmatpush1.bf16.msra.mxu1 %v6161_v11  ;;  %v6095_v10 = vcombine.low %v4052_v3, %v4056_v4  ;;  %v3992_v11 = vld [vmem:[%s9325_s4 + $0x7c] sm:$0xf] }
 0x5fc   :  { %5168 = vmatprep.subr.bf16.mxu0 %v6167_v12  ;;  %5254 = vmatprep.subr.bf16.mxu1 %v6169_v9  ;;  %v3995_v12 = vld [vmem:[%s9325_s4 + $0x94] sm:$0xff]  ;;  %v6039_v18 = vcombine.low %v3988_v7, %v3992_v11  ;;  %v4028_v3 = vld [vmem:[%s9325_s4 + $0x19c] sm:$0xf] }
 0x5fd   :  { %v3999_v9 = vld [vmem:[%s9325_s4 + $0xb4] sm:$0xff] }
 0x5fe   :  { %v6044_v26 = vcombine.low %v3995_v12, %v3999_v9  ;;  %v4039_v7 = vld [vmem:[%s9325_s4 + $0x1f4] sm:$0xff] }
 0x5ff   :  { %5169 = vmatpush1.bf16.msra.mxu0 %v6166_v19  ;;  %5255 = vmatpush1.bf16.msra.mxu1 %v6168_v20  ;;  %v6045_v19 = vcombine.high %v3995_v12, %v3999_v9  ;;  %v3996_v20 = vld [vmem:[%s9325_s4 + $0x9c] sm:$0xf] }
 0x600   :  { %5170 = vmatprep.subr.bf16.mxu0 %v6174_v21  ;;  %5256 = vmatprep.subr.bf16.mxu1 %v6176_v22  ;;  %v6102_v21 = vcombine.low %v4060_v13, %v4064_v16  ;;  %v4000_v22 = vld [vmem:[%s9325_s4 + $0xbc] sm:$0xf] }
 0x601   :  { %v4036_v13 = vld [vmem:[%s9325_s4 + $0x1dc] sm:$0xf] }
 0x603   :  { %5171 = vmatpush1.bf16.msra.mxu0 %v6173_v27  ;;  %5257 = vmatpush1.bf16.msra.mxu1 %v6175_v28  ;;  %v6046_v27 = vcombine.low %v3996_v20, %v4000_v22 }
 0x604   :  { %5172 = vmatprep.subr.bf16.mxu0 %v6181_v29  ;;  %5258 = vmatprep.subr.bf16.mxu1 %v6183_v30  ;;  %v4004_v29 = vld [vmem:[%s9325_s4 + $0xdc] sm:$0xf]  ;;  %v6109_v30 = vcombine.low %v4068_v24, %v4072_v25  ;;  %v4051_v24 = vld [vmem:[%s9325_s4 + $0x254] sm:$0xff] }
 0x605   :  { %v4055_v25 = vld [vmem:[%s9325_s4 + $0x274] sm:$0xff] }
 0x607   :  { %5173 = vmatpush1.bf16.msra.mxu0 %v6180_v42  ;;  %5259 = vmatpush1.bf16.msra.mxu1 %v6182_v43  ;;  %v4080_v42 = vld [vmem:[%s9325_s4 + $0x33c] sm:$0xf] }
 0x608   :  { %5174 = vmatprep.subr.bf16.mxu0 %v6188_v44  ;;  %5260 = vmatprep.subr.bf16.mxu1 %v6190_v45  ;;  %v6053_v44 = vcombine.low %v4004_v29, %v4008_v31  ;;  %v6059_v45 = vcombine.high %v4011_v32, %v4015_v35  ;;  %v6116_v49 = vcombine.low %v4076_v40, %v4080_v42  ;;  %v4059_v31 = vld [vmem:[%s9325_s4 + $0x294] sm:$0xff] }
 0x609   :  { %v6094_v29 = vcombine.high %v4051_v24, %v4055_v25 }
 0x60b   :  { %5175 = vmatpush1.bf16.msra.mxu0 %v6187_v53  ;;  %5261 = vmatpush1.bf16.msra.mxu1 %v6189_v55  ;;  %v4023_v53 = vld [vmem:[%s9325_s4 + $0x174] sm:$0xff]  ;;  %v4084_v55 = vld [vmem:[%s9325_s4 + $0x35c] sm:$0xf] }
 0x60c   :  { %5176 = vmatprep.subr.bf16.mxu0 %v6195_v58  ;;  %5262 = vmatprep.subr.bf16.mxu1 %v6197_v37  ;;  %v4088_v58 = vld [vmem:[%s9325_s4 + $0x37c] sm:$0xf]  ;;  %v6058_v37 = vcombine.low %v4011_v32, %v4015_v35  ;;  %v6066_v61 = vcombine.high %v4019_v51, %v4023_v53  ;;  %v6065_v56 = vcombine.low %v4019_v51, %v4023_v53  ;;  %v4063_v32 = vld [vmem:[%s9325_s4 + $0x2b4] sm:$0xff] }
 0x60d   :  { %v6123_v63 = vcombine.low %v4084_v55, %v4088_v58  ;;  %v6093_v35 = vcombine.low %v4051_v24, %v4055_v25  ;;  %v6101_v42 = vcombine.high %v4059_v31, %v4063_v32  ;;  %v4132_v53 = vld [vmem:[%s9325_s4 + $0x4dc] sm:$0xf]  ;;  %v4075_v58 = vld [vmem:[%s9325_s4 + $0x314] sm:$0xff] }
 0x60e   :  { %v4136_v55 = vld [vmem:[%s9325_s4 + $0x4fc] sm:$0xf]  ;;  %v4115_v25 = vld [vmem:[%s9325_s4 + $0x454] sm:$0xff] }
 0x60f   :  { %5177 = vmatpush1.bf16.msra.mxu0 %v6194_v0  ;;  %5263 = vmatpush1.bf16.msra.mxu1 %v6196_v54  ;;  %v4024_v0 = vld [vmem:[%s9325_s4 + $0x17c] sm:$0xf]  ;;  %v4027_v54 = vld [vmem:[%s9325_s4 + $0x194] sm:$0xff] }
 0x610   :  { %5289 = vmatprep.subr.bf16.mxu0 %v6031_v2  ;;  %6241 = vmatprep.subr.bf16.mxu1 %v6088_v39  ;;  %v4031_v2 = vld [vmem:[%s9325_s4 + $0x1b4] sm:$0xff]  ;;  %v4092_v39 = vld [vmem:[%s9325_s4 + $0x39c] sm:$0xf]  ;;  %v6067_v57 = vcombine.low %v4020_v62, %v4024_v0 }
 0x611   :  { %v6073_v59 = vcombine.high %v4027_v54, %v4031_v2  ;;  %v6130_v4 = vcombine.low %v4092_v39, %v4096_v41  ;;  %v6072_v11 = vcombine.low %v4027_v54, %v4031_v2  ;;  %v4144_v0 = vld [vmem:[%s9325_s4 + $0x53c] sm:$0xf]  ;;  %v4083_v54 = vld [vmem:[%s9325_s4 + $0x354] sm:$0xff] }
 0x612   :  { %5193 = vmatmul.mubr.bf16.vlgmr.msra.gmra.mrb[20].mxu0 %v8830_v48  ;;  %5279 = vmatmul.mubr.bf16.vlgmr.msra.gmra.mrb[28].mxu1 %v8830_v48  ;;  %v4087_v2 = vld [vmem:[%s9325_s4 + $0x374] sm:$0xff]  ;;  %v4176_v24 = vld [vmem:[%s9325_s4 + $0x63c] sm:$0xf] }
 0x613   :  { %5290 = vmatpush1.bf16.msra.mxu0 %v6030_v5  ;;  %5321 = vmatprep.mubr.bf16.mxu0 %v8841_v52  ;;  %v4032_v5 = vld [vmem:[%s9325_s4 + $0x1bc] sm:$0xf] }
 0x614   :  { %6242 = vmatpush3.bf16.msra.mxu1 %v6032_v6  ;;  %5407 = vmatprep.mubr.bf16.mxu1 %v8841_v52  ;;  %v4007_v52 = vld [vmem:[%s9325_s4 + $0xf4] sm:$0xff]  ;;  %v6074_v12 = vcombine.low %v4028_v3, %v4032_v5  ;;  %v6121_v5 = vcombine.low %v4083_v54, %v4087_v2 }
 0x615   :  { %5291 = vmatprep.subr.bf16.mxu0 %v6038_v8  ;;  %6243 = vmatprep.subr.bf16.mxu1 %v6095_v10  ;;  %v6052_v28 = vcombine.high %v4003_v23, %v4007_v52  ;;  %v6051_v43 = vcombine.low %v4003_v23, %v4007_v52  ;;  %v4035_v6 = vld [vmem:[%s9325_s4 + $0x1d4] sm:$0xff]  ;;  %v4100_v8 = vld [vmem:[%s9325_s4 + $0x3dc] sm:$0xf] }
 0x616   :  { %v4104_v10 = vld [vmem:[%s9325_s4 + $0x3fc] sm:$0xf]  ;;  %v6080_v9 = vcombine.high %v4035_v6, %v4039_v7  ;;  %v6079_v20 = vcombine.low %v4035_v6, %v4039_v7  ;;  %v4091_v3 = vld [vmem:[%s9325_s4 + $0x394] sm:$0xff] }
 0x617   :  { %5292 = vmatpush1.bf16.msra.mxu0 %v6037_v17  ;;  %v6137_v16 = vcombine.low %v4100_v8, %v4104_v10  ;;  %v4040_v17 = vld [vmem:[%s9325_s4 + $0x1fc] sm:$0xf] }
 0x618   :  { %6244 = vmatpush3.bf16.msra.mxu1 %v6039_v18  ;;  %5293 = vmatprep.subr.bf16.mxu0 %v6045_v19  ;;  %v4043_v18 = vld [vmem:[%s9325_s4 + $0x214] sm:$0xff]  ;;  %v4108_v23 = vld [vmem:[%s9325_s4 + $0x41c] sm:$0xf] }
 0x619   :  { %6245 = vmatprep.subr.bf16.mxu1 %v6102_v21  ;;  %v4047_v19 = vld [vmem:[%s9325_s4 + $0x234] sm:$0xff]  ;;  %v6081_v21 = vcombine.low %v4036_v13, %v4040_v17  ;;  %v4112_v52 = vld [vmem:[%s9325_s4 + $0x43c] sm:$0xf] }
 0x61a   :  { %v6087_v22 = vcombine.high %v4043_v18, %v4047_v19  ;;  %v4156_v8 = vld [vmem:[%s9325_s4 + $0x59c] sm:$0xf] }
 0x61b   :  { %5294 = vmatpush1.bf16.msra.mxu0 %v6044_v26  ;;  %v6086_v26 = vcombine.low %v4043_v18, %v4047_v19  ;;  %v4160_v10 = vld [vmem:[%s9325_s4 + $0x5bc] sm:$0xf]  ;;  %v4107_v19 = vld [vmem:[%s9325_s4 + $0x414] sm:$0xff] }
 0x61c   :  { %6246 = vmatpush3.bf16.msra.mxu1 %v6046_v27  ;;  %5295 = vmatprep.subr.bf16.mxu0 %v6052_v28  ;;  %v6144_v27 = vcombine.low %v4108_v23, %v4112_v52  ;;  %v4116_v28 = vld [vmem:[%s9325_s4 + $0x45c] sm:$0xf]  ;;  %v6186_v13 = vcombine.low %v4156_v8, %v4160_v10 }
 0x61d   :  { %6247 = vmatprep.subr.bf16.mxu1 %v6109_v30  ;;  %v4120_v30 = vld [vmem:[%s9325_s4 + $0x47c] sm:$0xf] }
 0x61e   :  { %v6151_v40 = vcombine.low %v4116_v28, %v4120_v30  ;;  %v4164_v17 = vld [vmem:[%s9325_s4 + $0x5dc] sm:$0xf]  ;;  %v4123_v30 = vld [vmem:[%s9325_s4 + $0x494] sm:$0xff] }
 0x61f   :  { %5296 = vmatpush1.bf16.msra.mxu0 %v6051_v43  ;;  %v4124_v43 = vld [vmem:[%s9325_s4 + $0x49c] sm:$0xf] }
 0x620   :  { %6248 = vmatpush3.bf16.msra.mxu1 %v6053_v44  ;;  %5297 = vmatprep.subr.bf16.mxu0 %v6059_v45  ;;  %v4128_v44 = vld [vmem:[%s9325_s4 + $0x4bc] sm:$0xf]  ;;  %v4067_v45 = vld [vmem:[%s9325_s4 + $0x2d4] sm:$0xff] }
 0x621   :  { %6249 = vmatprep.subr.bf16.mxu1 %v6116_v49  ;;  %v6100_v49 = vcombine.low %v4059_v31, %v4063_v32  ;;  %v6158_v50 = vcombine.low %v4124_v43, %v4128_v44  ;;  %v6108_v51 = vcombine.high %v4067_v45, %v4071_v46  ;;  %v4168_v18 = vld [vmem:[%s9325_s4 + $0x5fc] sm:$0xf]  ;;  %v4127_v31 = vld [vmem:[%s9325_s4 + $0x4b4] sm:$0xff] }
 0x622   :  { %v4172_v52 = vld [vmem:[%s9325_s4 + $0x61c] sm:$0xf]  ;;  %v4143_v43 = vld [vmem:[%s9325_s4 + $0x534] sm:$0xff] }
 0x623   :  { %5298 = vmatpush1.bf16.msra.mxu0 %v6058_v37  ;;  %v4079_v37 = vld [vmem:[%s9325_s4 + $0x334] sm:$0xff]  ;;  %v6200_v28 = vcombine.low %v4172_v52, %v4176_v24 }
 0x624   :  { %6250 = vmatpush3.bf16.msra.mxu1 %v6060_v60  ;;  %5299 = vmatprep.subr.bf16.mxu0 %v6066_v61  ;;  %v6107_v60 = vcombine.low %v4067_v45, %v4071_v46  ;;  %v6165_v61 = vcombine.low %v4132_v53, %v4136_v55  ;;  %v6115_v62 = vcombine.high %v4075_v58, %v4079_v37  ;;  %v4147_v46 = vld [vmem:[%s9325_s4 + $0x554] sm:$0xff] }
 0x625   :  { %6251 = vmatprep.subr.bf16.mxu1 %v6123_v63  ;;  %v4140_v63 = vld [vmem:[%s9325_s4 + $0x51c] sm:$0xf]  ;;  %v6114_v39 = vcombine.low %v4075_v58, %v4079_v37  ;;  %v4155_v53 = vld [vmem:[%s9325_s4 + $0x594] sm:$0xff] }
 0x626   :  { %v6172_v41 = vcombine.low %v4140_v63, %v4144_v0  ;;  %v4159_v55 = vld [vmem:[%s9325_s4 + $0x5b4] sm:$0xff] }
 0x627   :  { %5300 = vmatpush1.bf16.msra.mxu0 %v6065_v56  ;;  %v6122_v56 = vcombine.high %v4083_v54, %v4087_v2  ;;  %v6185_v37 = vcombine.high %v4155_v53, %v4159_v55  ;;  %v4171_v0 = vld [vmem:[%s9325_s4 + $0x614] sm:$0xff] }
 0x628   :  { %6252 = vmatpush3.bf16.msra.mxu1 %v6067_v57  ;;  %5301 = vmatprep.subr.bf16.mxu0 %v6073_v59  ;;  %v4148_v57 = vld [vmem:[%s9325_s4 + $0x55c] sm:$0xf]  ;;  %v4175_v54 = vld [vmem:[%s9325_s4 + $0x634] sm:$0xff] }
 0x629   :  { %6253 = vmatprep.subr.bf16.mxu1 %v6130_v4  ;;  %v4152_v59 = vld [vmem:[%s9325_s4 + $0x57c] sm:$0xf]  ;;  %v4095_v4 = vld [vmem:[%s9325_s4 + $0x3b4] sm:$0xff] }
 0x62a   :  { %v6179_v6 = vcombine.low %v4148_v57, %v4152_v59  ;;  %v6129_v7 = vcombine.high %v4091_v3, %v4095_v4 }
 0x62b   :  { %5302 = vmatpush1.bf16.msra.mxu0 %v6072_v11  ;;  %v4099_v11 = vld [vmem:[%s9325_s4 + $0x3d4] sm:$0xff] }
 0x62c   :  { %6254 = vmatpush3.bf16.msra.mxu1 %v6074_v12  ;;  %5303 = vmatprep.subr.bf16.mxu0 %v6080_v9  ;;  %v4103_v12 = vld [vmem:[%s9325_s4 + $0x3f4] sm:$0xff]  ;;  %v6128_v9 = vcombine.low %v4091_v3, %v4095_v4 }
 0x62d   :  { %6255 = vmatprep.subr.bf16.mxu1 %v6137_v16  ;;  %v6136_v16 = vcombine.high %v4099_v11, %v4103_v12 }
 0x62f   :  { %5304 = vmatpush1.bf16.msra.mxu0 %v6079_v20  ;;  %v4111_v20 = vld [vmem:[%s9325_s4 + $0x434] sm:$0xff] }
 0x630   :  { %6256 = vmatpush3.bf16.msra.mxu1 %v6081_v21  ;;  %5305 = vmatprep.subr.bf16.mxu0 %v6087_v22  ;;  %v6135_v21 = vcombine.low %v4099_v11, %v4103_v12  ;;  %v6193_v22 = vcombine.low %v4164_v17, %v4168_v18  ;;  %v6143_v23 = vcombine.high %v4107_v19, %v4111_v20 }
 0x631   :  { %5416 = vmatprep.subr.bf16.mxu1 %v7050_v1 }
 0x633   :  { %5408 = vmatmul.mubr.bf16.vlgmr.msra.gmra.mrb[32].mxu1 %v8828_v47  ;;  %5306 = vmatpush1.bf16.msra.mxu0 %v6086_v26  ;;  %v4119_v26 = vld [vmem:[%s9325_s4 + $0x474] sm:$0xff] }
 0x634   :  { %5417 = vmatpush1.bf16.msra.mxu1 %v6144_v27  ;;  %6204 = vmatprep.mubr.msk.bf16.mxu1 %vm261_vm0, %v8843_v36  ;;  %v6142_v27 = vcombine.low %v4107_v19, %v4111_v20  ;;  %v6149_v32 = vcombine.low %v4115_v25, %v4119_v26 }
 0x635   :  { %5307 = vmatprep.subr.bf16.mxu0 %v6094_v29  ;;  %5418 = vmatprep.subr.bf16.mxu1 %v7050_v1  ;;  %v6150_v29 = vcombine.high %v4115_v25, %v4119_v26 }
 0x637   :  { %5308 = vmatpush1.bf16.msra.mxu0 %v6093_v35  ;;  %v6157_v35 = vcombine.high %v4123_v30, %v4127_v31 }
 0x638   :  { %5419 = vmatpush1.bf16.msra.mxu1 %v6151_v40  ;;  %5309 = vmatprep.subr.bf16.mxu0 %v6101_v42  ;;  %v4135_v40 = vld [vmem:[%s9325_s4 + $0x4f4] sm:$0xff] }
 0x639   :  { %5420 = vmatprep.subr.bf16.mxu1 %v7050_v1 }
 0x63b   :  { %5310 = vmatpush1.bf16.msra.mxu0 %v6100_v49  ;;  %v4151_v49 = vld [vmem:[%s9325_s4 + $0x574] sm:$0xff] }
 0x63c   :  { %5421 = vmatpush1.bf16.msra.mxu1 %v6158_v50  ;;  %5311 = vmatprep.subr.bf16.mxu0 %v6108_v51  ;;  %v6178_v51 = vcombine.high %v4147_v46, %v4151_v49  ;;  %v6177_v58 = vcombine.low %v4147_v46, %v4151_v49 }
 0x63d   :  { %5422 = vmatprep.subr.bf16.mxu1 %v7050_v1 }
 0x63f   :  { %5312 = vmatpush1.bf16.msra.mxu0 %v6107_v60  ;;  %v4163_v60 = vld [vmem:[%s9325_s4 + $0x5d4] sm:$0xff] }
 0x640   :  { %5423 = vmatpush1.bf16.msra.mxu1 %v6165_v61  ;;  %5313 = vmatprep.subr.bf16.mxu0 %v6115_v62  ;;  %v4167_v61 = vld [vmem:[%s9325_s4 + $0x5f4] sm:$0xff]  ;;  %v6184_v62 = vcombine.low %v4155_v53, %v4159_v55 }
 0x641   :  { %5424 = vmatprep.subr.bf16.mxu1 %v7050_v1  ;;  %v6192_v63 = vcombine.high %v4163_v60, %v4167_v61  ;;  %v6191_v2 = vcombine.low %v4163_v60, %v4167_v61 }
 0x643   :  { %5314 = vmatpush1.bf16.msra.mxu0 %v6114_v39  ;;  %v6199_v39 = vcombine.high %v4171_v0, %v4175_v54 }
 0x644   :  { %5425 = vmatpush1.bf16.msra.mxu1 %v6172_v41  ;;  %5315 = vmatprep.subr.bf16.mxu0 %v6122_v56  ;;  %v6198_v41 = vcombine.low %v4171_v0, %v4175_v54  ;;  %v9261_v56 = vld [vmem:[%s9324_s5 + $0x11] sm:$0x7f]  ;;  %v4205_v54 = vsub.s32 6, %v7941_v33 }
 0x645   :  { %5426 = vmatprep.subr.bf16.mxu1 %v7050_v1  ;;  %v4182_v57 = vrot.slane %v9261_v56, %v7944_v34  ;;  %v4190_v59 = vrot.slane %v9261_v56, %v8015_v14  ;;  %v4186_v3 = vrot.slane %v9261_v56, %v7952_v38  ;;  %v4194_v4 = vrot.slane %v9261_v56, %v8018_v15 }
 0x647   :  { %5316 = vmatpush1.bf16.msra.mxu0 %v6121_v5 }
 0x648   :  { %5427 = vmatpush1.bf16.msra.mxu1 %v6179_v6  ;;  %5317 = vmatprep.subr.bf16.mxu0 %v6129_v7 }
 0x649   :  { %5428 = vmatprep.subr.bf16.mxu1 %v7050_v1 }
 0x64b   :  { %5318 = vmatpush1.bf16.msra.mxu0 %v6128_v9 }
 0x64c   :  { %5429 = vmatpush1.bf16.msra.mxu1 %v6186_v13  ;;  %5319 = vmatprep.subr.bf16.mxu0 %v6136_v16 }
 0x64d   :  { %5430 = vmatprep.subr.bf16.mxu1 %v7050_v1 }
 0x64f   :  { %5320 = vmatpush1.bf16.msra.mxu0 %v6135_v21 }
 0x650   :  { %5431 = vmatpush1.bf16.msra.mxu1 %v6193_v22  ;;  %5332 = vmatprep.subr.bf16.mxu0 %v6143_v23 }
 0x651   :  { %5432 = vmatprep.subr.bf16.mxu1 %v7050_v1  ;;  %v4131_v1 = vld [vmem:[%s9325_s4 + $0x4d4] sm:$0xff] }
 0x652   :  { %5322 = vmatmul.mubr.bf16.vlgmr.msra.gmra.mrb[24].mxu0 %v8828_v47  ;;  %v6156_v47 = vcombine.low %v4123_v30, %v4127_v31  ;;  %v6164_v42 = vcombine.high %v4131_v1, %v4135_v40  ;;  %v6163_v44 = vcombine.low %v4131_v1, %v4135_v40 }
 0x653   :  { %5333 = vmatpush1.bf16.msra.mxu0 %v6142_v27  ;;  %6203 = vmatprep.mubr.msk.bf16.mxu0 %vm261_vm0, %v8843_v36  ;;  %v4139_v36 = vld [vmem:[%s9325_s4 + $0x514] sm:$0xff] }
 0x654   :  { %5433 = vmatpush1.bf16.msra.mxu1 %v6200_v28  ;;  %5334 = vmatprep.subr.bf16.mxu0 %v6150_v29  ;;  %v6171_v45 = vcombine.high %v4139_v36, %v4143_v43  ;;  %v6170_v50 = vcombine.low %v4139_v36, %v4143_v43 }
 0x657   :  { %5449 = vmatmul.mubr.bf16.vlgmr.msra.gmra.mrb[36].mxu1 %v8830_v48  ;;  %5335 = vmatpush1.bf16.msra.mxu0 %v6149_v32 }
 0x658   :  { %5336 = vmatprep.subr.bf16.mxu0 %v6157_v35 }
 0x65b   :  { %5337 = vmatpush1.bf16.msra.mxu0 %v6156_v47 }
 0x65c   :  { %5338 = vmatprep.subr.bf16.mxu0 %v6164_v42 }
 0x65f   :  { %5339 = vmatpush1.bf16.msra.mxu0 %v6163_v44 }
 0x660   :  { %5340 = vmatprep.subr.bf16.mxu0 %v6171_v45 }
 0x663   :  { %5341 = vmatpush1.bf16.msra.mxu0 %v6170_v50 }
 0x664   :  { %5342 = vmatprep.subr.bf16.mxu0 %v6178_v51 }
 0x667   :  { %5343 = vmatpush1.bf16.msra.mxu0 %v6177_v58 }
 0x668   :  { %5344 = vmatprep.subr.bf16.mxu0 %v6185_v37 }
 0x66b   :  { %5345 = vmatpush1.bf16.msra.mxu0 %v6184_v62 }
 0x66c   :  { %5346 = vmatprep.subr.bf16.mxu0 %v6192_v63 }
 0x66f   :  { %5347 = vmatpush1.bf16.msra.mxu0 %v6191_v2  ;;  %v4206_v2 = vrot.slane %v9261_v56, %v4205_v54 }
 0x670   :  { %5348 = vmatprep.subr.bf16.mxu0 %v6199_v39 }
 0x673   :  { %5349 = vmatpush1.bf16.msra.mxu0 %v6198_v41 }
 0x676   :  { %5365 = vmatmul.mubr.bf16.vlgmr.msra.gmra.mrb[24].mxu0 %v8830_v48 }
 0x6e5   :  { %v5194_v5 = vpop.f32.mrb[20].mxu0  ;;  %v5280_v6 = vpop.f32.mrb[28].mxu1 }
 0x6e6   :  { %v6287_v48 = vadd.f32 %v5194_v5, %v4182_v57  ;;  %v6291_v7 = vadd.f32 %v5280_v6, %v4190_v59  ;;  %v5196_v8 = vpop.f32.mrb[21].mxu0  ;;  %v5282_v10 = vpop.f32.mrb[29].mxu1 }
 0x6e7   :  { %v6288_v11 = vadd.f32 %v5196_v8, %v4186_v3  ;;  %v6292_v12 = vadd.f32 %v5282_v10, %v4194_v4  ;;  %v5198_v9 = vpop.f32.mrb[22].mxu0  ;;  %v5284_v13 = vpop.f32.mrb[30].mxu1 }
 0x6e8   :  { %v6205_v34 = vmul.f32 -1.442695, %v6287_v48  ;;  %v6207_v16 = vmul.f32 -1.442695, %v6291_v7  ;;  %v6289_v17 = vadd.f32 %v5198_v9, %v4182_v57  ;;  %v6293_v14 = vadd.f32 %v5284_v13, %v4190_v59  ;;  %v5200_v18 = vpop.f32.mrb[23].mxu0  ;;  %v5286_v19 = vpop.f32.mrb[31].mxu1 }
 0x6e9   :  { %v6206_v38 = vmul.f32 -1.442695, %v6288_v11  ;;  %v6208_v20 = vmul.f32 -1.442695, %v6292_v12  ;;  %v6290_v21 = vadd.f32 %v5200_v18, %v4186_v3  ;;  %v6294_v15 = vadd.f32 %v5286_v19, %v4194_v4 }
 0x6ea   :  { %6992 = vpow2.f32 %v6205_v34  ;;  %v6212_v22 = vmul.f32 -1.442695, %v6289_v17  ;;  %v6214_v23 = vmul.f32 -1.442695, %v6293_v14  ;;  %v4197_v9 = vsub.s32 4, %v7941_v33 }
 0x6eb   :  { %6994 = vpow2.f32 %v6207_v16  ;;  %v6213_v52 = vmul.f32 -1.442695, %v6290_v21  ;;  %v6215_v24 = vmul.f32 -1.442695, %v6294_v15  ;;  %v4201_v13 = vsub.s32 5, %v7941_v33 }
 0x6ec   :  { %6996 = vpow2.f32 %v6206_v38  ;;  %v4198_v16 = vrot.slane %v9261_v56, %v4197_v9 }
 0x6ed   :  { %6998 = vpow2.f32 %v6208_v20  ;;  %v4202_v17 = vrot.slane %v9261_v56, %v4201_v13 }
 0x6ee   :  { %7000 = vpow2.f32 %v6212_v22 }
 0x6ef   :  { %7002 = vpow2.f32 %v6214_v23 }
 0x6f0   :  { %7004 = vpow2.f32 %v6213_v52 }
 0x6f1   :  { %7006 = vpow2.f32 %v6215_v24 }
 0x6f4   :  { %v6993_v25 = vpop.eup %6992 }
 0x6f5   :  { %v6995_v26 = vpop.eup %6994  ;;  %v5499_v27 = vadd.f32 1.0, %v6993_v25 }
 0x6f6   :  { %v6997_v28 = vpop.eup %6996  ;;  %v5501_v29 = vadd.f32 1.0, %v6995_v26 }
 0x6f7   :  { %v6999_v30 = vpop.eup %6998  ;;  %7008 = vrcp.f32 %v5499_v27  ;;  %v5500_v31 = vadd.f32 1.0, %v6997_v28 }
 0x6f8   :  { %v7001_v32 = vpop.eup %7000  ;;  %7010 = vrcp.f32 %v5501_v29  ;;  %v5502_v35 = vadd.f32 1.0, %v6999_v30 }
 0x6f9   :  { %v7003_v1 = vpop.eup %7002  ;;  %7012 = vrcp.f32 %v5500_v31  ;;  %v5506_v40 = vadd.f32 1.0, %v7001_v32 }
 0x6fa   :  { %v7005_v47 = vpop.eup %7004  ;;  %7014 = vrcp.f32 %v5502_v35  ;;  %v5508_v42 = vadd.f32 1.0, %v7003_v1 }
 0x6fb   :  { %v7007_v36 = vpop.eup %7006  ;;  %7016 = vrcp.f32 %v5506_v40  ;;  %v5507_v43 = vadd.f32 1.0, %v7005_v47 }
 0x6fc   :  { %7018 = vrcp.f32 %v5508_v42  ;;  %v5509_v44 = vadd.f32 1.0, %v7007_v36 }
 0x6fd   :  { %7020 = vrcp.f32 %v5507_v43 }
 0x6fe   :  { %7022 = vrcp.f32 %v5509_v44 }
 0x701   :  { %v7009_v45 = vpop.eup %7008 }
 0x702   :  { %v7011_v46 = vpop.eup %7010  ;;  %5541 = vst [vmem:[%s9328_s6] sm:$0xff] %v7009_v45 }
 0x703   :  { %v7013_v49 = vpop.eup %7012  ;;  %5543 = vst [vmem:[%s9328_s6 + $0x10] sm:$0xff] %v7011_v46 }
 0x704   :  { %v7015_v50 = vpop.eup %7014  ;;  %5542 = vst [vmem:[%s9328_s6 + $0x8] sm:$0xff] %v7013_v49 }
 0x705   :  { %v7017_v51 = vpop.eup %7016  ;;  %5544 = vst [vmem:[%s9328_s6 + $0x18] sm:$0xff] %v7015_v50 }
 0x706   :  { %v7019_v53 = vpop.eup %7018  ;;  %5548 = vst [vmem:[%s9328_s6 + $0x38] sm:$0xff] %v7017_v51  ;;  %v6257_v55 = vpop.f32.mrb[32].mxu1 }
 0x707   :  { %v7021_v58 = vpop.eup %7020  ;;  %5550 = vst [vmem:[%s9328_s6 + $0x48] sm:$0xff] %v7019_v53  ;;  %v6258_v37 = vpop.f32.mrb[33].mxu1 }
 0x708   :  { %v7023_v60 = vpop.eup %7022  ;;  %5549 = vst [vmem:[%s9328_s6 + $0x40] sm:$0xff] %v7021_v58  ;;  %v6259_v61 = vadd.f32 %v6258_v37, %v6257_v55  ;;  %v6260_v62 = vpop.f32.mrb[34].mxu1 }
 0x709   :  { %5551 = vst [vmem:[%s9328_s6 + $0x50] sm:$0xff] %v7023_v60  ;;  %v6261_v63 = vpop.f32.mrb[35].mxu1 }
 0x70a   :  { %v6262_v0 = vadd.f32 %v6261_v63, %v6260_v62  ;;  %v5410_v39 = vadd.f32 %v6259_v61, %v4206_v2 }
 0x70c   :  { %v5413_v3 = vadd.f32 %v6262_v0, %v4206_v2 }
 0x72a   :  { %v5450_v41 = vpop.f32.mrb[36].mxu1 }
 0x72b   :  { %v5451_v57 = vadd.f32 %v5450_v41, %v5410_v39  ;;  %v5452_v59 = vpop.f32.mrb[37].mxu1 }
 0x72c   :  { %v5453_v4 = vpop.f32.mrb[38].mxu1 }
 0x72d   :  { %v6211_v5 = vmul.f32 -1.442695, %v5451_v57  ;;  %v5454_v6 = vadd.f32 %v5453_v4, %v5413_v3  ;;  %v5455_v48 = vpop.f32.mrb[39].mxu1 }
 0x72f   :  { %7024 = vpow2.f32 %v6211_v5  ;;  %v6218_v7 = vmul.f32 -1.442695, %v5454_v6 }
 0x731   :  { %7026 = vpow2.f32 %v6218_v7 }
 0x739   :  { %v7025_v8 = vpop.eup %7024 }
 0x73a   :  { %v5505_v10 = vadd.f32 1.0, %v7025_v8 }
 0x73b   :  { %v7027_v11 = vpop.eup %7026 }
 0x73c   :  { %7028 = vrcp.f32 %v5505_v10  ;;  %v5512_v12 = vadd.f32 1.0, %v7027_v11 }
 0x73e   :  { %7030 = vrcp.f32 %v5512_v12 }
 0x746   :  { %v7029_v34 = vpop.eup %7028 }
 0x747   :  { %5547 = vst.msk [vmem:[%s9328_s6 + $0x30] sm:$0xff] %vm261_vm0, %v7029_v34 }
 0x748   :  { %v7031_v14 = vpop.eup %7030 }
 0x749   :  { %5554 = vst.msk [vmem:[%s9328_s6 + $0x68] sm:$0xff] %vm261_vm0, %v7031_v14  ;;  %v5366_v18 = vpop.f32.mrb[24].mxu0 }
 0x74a   :  { %v6295_v19 = vadd.f32 %v5366_v18, %v4198_v16  ;;  %v5368_v38 = vpop.f32.mrb[25].mxu0 }
 0x74b   :  { %v6296_v33 = vadd.f32 %v5368_v38, %v4202_v17  ;;  %v5370_v20 = vpop.f32.mrb[26].mxu0 }
 0x74c   :  { %v6209_v21 = vmul.f32 -1.442695, %v6295_v19  ;;  %v6297_v15 = vadd.f32 %v5370_v20, %v4198_v16  ;;  %v5372_v22 = vpop.f32.mrb[27].mxu0 }
 0x74d   :  { %v6210_v23 = vmul.f32 -1.442695, %v6296_v33  ;;  %v6298_v52 = vadd.f32 %v5372_v22, %v4202_v17 }
 0x74e   :  { %7032 = vpow2.f32 %v6209_v21  ;;  %v6216_v24 = vmul.f32 -1.442695, %v6297_v15 }
 0x74f   :  { %7034 = vpow2.f32 %v6210_v23  ;;  %v6217_v56 = vmul.f32 -1.442695, %v6298_v52 }
 0x750   :  { %7036 = vpow2.f32 %v6216_v24 }
 0x751   :  { %7038 = vpow2.f32 %v6217_v56 }
 0x758   :  { %v7033_v25 = vpop.eup %7032 }
 0x759   :  { %v7035_v26 = vpop.eup %7034  ;;  %v5503_v27 = vadd.f32 1.0, %v7033_v25 }
 0x75a   :  { %v7037_v28 = vpop.eup %7036  ;;  %v5504_v29 = vadd.f32 1.0, %v7035_v26 }
 0x75b   :  { %v7039_v30 = vpop.eup %7038  ;;  %7040 = vrcp.f32 %v5503_v27  ;;  %v5510_v31 = vadd.f32 1.0, %v7037_v28 }
 0x75c   :  { %7042 = vrcp.f32 %v5504_v29  ;;  %v5511_v32 = vadd.f32 1.0, %v7039_v30 }
 0x75d   :  { %7044 = vrcp.f32 %v5510_v31 }
 0x75e   :  { %7046 = vrcp.f32 %v5511_v32 }
 0x765   :  { %v7041_v35 = vpop.eup %7040 }
 0x766   :  { %v7043_v1 = vpop.eup %7042  ;;  %5545 = vst [vmem:[%s9328_s6 + $0x20] sm:$0xff] %v7041_v35 }
 0x767   :  { %v7045_v40 = vpop.eup %7044  ;;  %5546 = vst [vmem:[%s9328_s6 + $0x28] sm:$0xff] %v7043_v1 }
 0x768   :  { %v7047_v47 = vpop.eup %7046  ;;  %5552 = vst [vmem:[%s9328_s6 + $0x58] sm:$0xff] %v7045_v40 }
 0x769   :  { %5553 = vst [vmem:[%s9328_s6 + $0x60] sm:$0xff] %v7047_v47 }

</bundles_post_ra>
